<compile_context>
chip_gen: v6e
topology: v6e:2x2x1
jax: 0.10.0
libtpu: 0.0.40
codegen_flags: <defaults>
</compile_context>

<pallas_src>
import jax
import jax.numpy as jnp
from jax.experimental import pallas as pl
from jax.experimental.pallas import tpu as pltpu


def _round_up(x, m):
    return ((x + m - 1) // m) * m


def _leaky_relu(h, slope=0.2):
    return jnp.where(h > 0, h, slope * h)


def generator_kernel(x_ref,
                     w1_ref, b1_ref,
                     w2_ref, b2_ref,
                     w3_ref, b3_ref,
                     w4_ref, b4_ref,
                     out_ref):
    # fc1 + LeakyReLU(0.2)   (dropout = identity in eval mode)
    h = jnp.dot(x_ref[...], w1_ref[...], preferred_element_type=jnp.float32)
    h = _leaky_relu(h + b1_ref[...]).astype(jnp.bfloat16)

    # fc2 + LeakyReLU(0.2)
    h = jnp.dot(h, w2_ref[...], preferred_element_type=jnp.float32)
    h = _leaky_relu(h + b2_ref[...]).astype(jnp.bfloat16)

    # fc3 + LeakyReLU(0.2)
    h = jnp.dot(h, w3_ref[...], preferred_element_type=jnp.float32)
    h = _leaky_relu(h + b3_ref[...]).astype(jnp.bfloat16)

    # fc4 + tanh
    h = jnp.dot(h, w4_ref[...], preferred_element_type=jnp.float32)
    out_ref[...] = jnp.tanh(h + b4_ref[...]).astype(out_ref.dtype)


def generator_forward(x, params, *, tm=128):
    """x: [B, 100] float32; params: dict of (w, b) per layer, w = [in, out], b = [1, out]."""
    B, in_dim = x.shape
    (w1, b1), (w2, b2), (w3, b3), (w4, b4) = (
        params["fc1"], params["fc2"], params["fc3"], params["fc4"])
    out_dim = w4.shape[1]

    # --- pad ragged dims to lane multiples (zeros do not change the math) ---
    in_pad = _round_up(in_dim, 128)          # 100 -> 128
    out_pad = _round_up(out_dim, 128)        # 784 -> 896

    # --- batch tiling: big tiles; small batches run in one grid step ---
    tile_m = min(tm, _round_up(B, 8))        # sublane-aligned
    B_pad = _round_up(B, tile_m)
    grid = (B_pad // tile_m,)

    # --- cast to bf16 for the MXU, pad where needed (biases stay f32) ---
    bf16 = jnp.bfloat16
    x_p = jnp.pad(x.astype(bf16), ((0, B_pad - B), (0, in_pad - in_dim)))
    w1_p = jnp.pad(w1.astype(bf16), ((0, in_pad - in_dim), (0, 0)))
    w2_p = w2.astype(bf16)
    w3_p = w3.astype(bf16)
    w4_p = jnp.pad(w4.astype(bf16), ((0, 0), (0, out_pad - out_dim)))
    b4_p = jnp.pad(b4, ((0, 0), (0, out_pad - out_dim)))

    def full(arr):
        # whole-array block, constant block index across the batch grid
        shape = arr.shape
        return pl.BlockSpec(shape, lambda i: (0,) * len(shape))

    out_padded = pl.pallas_call(
        generator_kernel,
        out_shape=jax.ShapeDtypeStruct((B_pad, out_pad), x.dtype),
        grid_spec=pltpu.PrefetchScalarGridSpec(
            num_scalar_prefetch=0,
            grid=grid,
            in_specs=[
                pl.BlockSpec((tile_m, in_pad), lambda i: (i, 0)),   # x tile
                full(w1_p), full(b1),
                full(w2_p), full(b2),
                full(w3_p), full(b3),
                full(w4_p), full(b4_p),
            ],
            out_specs=pl.BlockSpec((tile_m, out_pad), lambda i: (i, 0)),
        ),
        compiler_params=pltpu.CompilerParams(
            dimension_semantics=("parallel",),
            vmem_limit_bytes=32 << 20,
        ),
    )(x_p, w1_p, b1, w2_p, b2, w3_p, b3, w4_p, b4_p)

    return out_padded[:B, :out_dim]


def init_params(key, g_output_dim=784, dtype=jnp.float32):
    """Deterministic synthetic init mimicking nn.Linear shapes (weights stored [in, out])."""
    dims = [(100, 256), (256, 512), (512, 1024), (1024, g_output_dim)]
    names = ["fc1", "fc2", "fc3", "fc4"]
    params = {}
    for name, (din, dout) in zip(names, dims):
        key, kw, kb = jax.random.split(key, 3)
        bound = 1.0 / jnp.sqrt(din)
        w = jax.random.uniform(kw, (din, dout), dtype, -bound, bound)
        b = jax.random.uniform(kb, (1, dout), dtype, -bound, bound)
        params[name] = (w, b)
    return params


def reference_forward_f32(x, params):
    h = x
    for name in ["fc1", "fc2", "fc3"]:
        w, b = params[name]
        h = jnp.dot(h, w) + b
        h = jnp.where(h > 0, h, 0.2 * h)
    w, b = params["fc4"]
    return jnp.tanh(jnp.dot(h, w) + b)


def reference_forward_bf16(x, params):
    """Pure-JAX reference using the same bf16-input / f32-accumulate scheme as the kernel."""
    h = x.astype(jnp.bfloat16)
    for name in ["fc1", "fc2", "fc3"]:
        w, b = params[name]
        h = jnp.dot(h, w.astype(jnp.bfloat16),
                    preferred_element_type=jnp.float32) + b
        h = jnp.where(h > 0, h, 0.2 * h).astype(jnp.bfloat16)
    w, b = params["fc4"]
    h = jnp.dot(h, w.astype(jnp.bfloat16), preferred_element_type=jnp.float32) + b
    return jnp.tanh(h)


if __name__ == "__main__":
    key = jax.random.PRNGKey(0)
    k_params, k_x = jax.random.split(key)

    g_output_dim = 784          # MNIST 28*28
    batch = 16

    params = init_params(k_params, g_output_dim)
    x = jax.random.normal(k_x, (batch, 100), jnp.float32)

    out = generator_forward(x, params, tm=128)
    out = jax.block_until_ready(out)
    assert out.shape == (batch, g_output_dim), out.shape

    # primary check: against a reference that uses the same bf16/f32-accum math
    ref_bf16 = reference_forward_bf16(x, params)
    assert jnp.allclose(out, ref_bf16, atol=1e-2, rtol=1e-2), \
        float(jnp.max(jnp.abs(out - ref_bf16)))

    # sanity check: close to the full-f32 reference (looser tol due to bf16 inputs)
    ref_f32 = reference_forward_f32(x, params)
    assert jnp.allclose(out, ref_f32, atol=5e-2, rtol=5e-2), \
        float(jnp.max(jnp.abs(out - ref_f32)))

    print("KERNEL_OK")
</pallas_src>

<mosaic_0001>
module attributes {stable_mosaic.version = 11 : i64} {
  func.func @generator_kernel(%arg0: i32, %arg1: memref<16x128xbf16, #tpu.memory_space<vmem>>, %arg2: memref<128x256xbf16, #tpu.memory_space<vmem>>, %arg3: memref<1x256xf32, #tpu.memory_space<vmem>>, %arg4: memref<256x512xbf16, #tpu.memory_space<vmem>>, %arg5: memref<1x512xf32, #tpu.memory_space<vmem>>, %arg6: memref<512x1024xbf16, #tpu.memory_space<vmem>>, %arg7: memref<1x1024xf32, #tpu.memory_space<vmem>>, %arg8: memref<1024x896xbf16, #tpu.memory_space<vmem>>, %arg9: memref<1x896xf32, #tpu.memory_space<vmem>>, %arg10: memref<16x896xf32, #tpu.memory_space<vmem>>) attributes {dimension_semantics = [#tpu.dimension_semantics<parallel>], iteration_bounds = array<i64: 1>, scalar_prefetch = 0 : i64, scratch_operands = 0 : i64, tpu.core_type = #tpu.core_type<tc>, window_params = [{transform_indices = @transform_0, window_bounds = array<i64: 16, 128>}, {pipeline_mode = #tpu.pipeline_mode<synchronous>, transform_indices = @transform_1, window_bounds = array<i64: 128, 256>}, {pipeline_mode = #tpu.pipeline_mode<synchronous>, transform_indices = @transform_2, window_bounds = array<i64: 1, 256>}, {pipeline_mode = #tpu.pipeline_mode<synchronous>, transform_indices = @transform_3, window_bounds = array<i64: 256, 512>}, {pipeline_mode = #tpu.pipeline_mode<synchronous>, transform_indices = @transform_4, window_bounds = array<i64: 1, 512>}, {pipeline_mode = #tpu.pipeline_mode<synchronous>, transform_indices = @transform_5, window_bounds = array<i64: 512, 1024>}, {pipeline_mode = #tpu.pipeline_mode<synchronous>, transform_indices = @transform_6, window_bounds = array<i64: 1, 1024>}, {pipeline_mode = #tpu.pipeline_mode<synchronous>, transform_indices = @transform_7, window_bounds = array<i64: 1024, 896>}, {pipeline_mode = #tpu.pipeline_mode<synchronous>, transform_indices = @transform_8, window_bounds = array<i64: 1, 896>}, {transform_indices = @transform_9, window_bounds = array<i64: 16, 896>}]} {
    %c0 = arith.constant 0 : index
    %c0_0 = arith.constant 0 : index
    %0 = vector.load %arg1[%c0, %c0_0] : memref<16x128xbf16, #tpu.memory_space<vmem>>, vector<16x128xbf16>
    %c0_1 = arith.constant 0 : index
    %c0_2 = arith.constant 0 : index
    %1 = vector.load %arg2[%c0_1, %c0_2] : memref<128x256xbf16, #tpu.memory_space<vmem>>, vector<128x256xbf16>
    %cst = arith.constant dense<0.000000e+00> : vector<16x256xf32>
    %2 = tpu.matmul %0, %1, %cst {dimension_numbers = #tpu.dot_dimension_numbers<[1], [0], [0], [1], [0, 0, 1, 1], [], []>} : vector<16x128xbf16>, vector<128x256xbf16>, vector<16x256xf32> -> vector<16x256xf32>
    %c0_3 = arith.constant 0 : index
    %c0_4 = arith.constant 0 : index
    %3 = vector.load %arg3[%c0_3, %c0_4] : memref<1x256xf32, #tpu.memory_space<vmem>>, vector<1x256xf32>
    %4 = vector.broadcast %3 : vector<1x256xf32> to vector<16x256xf32>
    %5 = arith.addf %2, %4 : vector<16x256xf32>
    %cst_5 = arith.constant 0.000000e+00 : f32
    %6 = vector.broadcast %cst_5 : f32 to vector<16x256xf32>
    %7 = arith.cmpf ogt, %5, %6 : vector<16x256xf32>
    %cst_6 = arith.constant 2.000000e-01 : f32
    %8 = vector.broadcast %cst_6 : f32 to vector<16x256xf32>
    %9 = arith.mulf %8, %5 : vector<16x256xf32>
    %10 = arith.select %7, %5, %9 : vector<16x256xi1>, vector<16x256xf32>
    %11 = arith.truncf %10 : vector<16x256xf32> to vector<16x256xbf16>
    %c0_7 = arith.constant 0 : index
    %c0_8 = arith.constant 0 : index
    %12 = vector.load %arg4[%c0_7, %c0_8] : memref<256x512xbf16, #tpu.memory_space<vmem>>, vector<256x512xbf16>
    %cst_9 = arith.constant dense<0.000000e+00> : vector<16x512xf32>
    %13 = tpu.matmul %11, %12, %cst_9 {dimension_numbers = #tpu.dot_dimension_numbers<[1], [0], [0], [1], [0, 0, 1, 1], [], []>} : vector<16x256xbf16>, vector<256x512xbf16>, vector<16x512xf32> -> vector<16x512xf32>
    %c0_10 = arith.constant 0 : index
    %c0_11 = arith.constant 0 : index
    %14 = vector.load %arg5[%c0_10, %c0_11] : memref<1x512xf32, #tpu.memory_space<vmem>>, vector<1x512xf32>
    %15 = vector.broadcast %14 : vector<1x512xf32> to vector<16x512xf32>
    %16 = arith.addf %13, %15 : vector<16x512xf32>
    %cst_12 = arith.constant 0.000000e+00 : f32
    %17 = vector.broadcast %cst_12 : f32 to vector<16x512xf32>
    %18 = arith.cmpf ogt, %16, %17 : vector<16x512xf32>
    %cst_13 = arith.constant 2.000000e-01 : f32
    %19 = vector.broadcast %cst_13 : f32 to vector<16x512xf32>
    %20 = arith.mulf %19, %16 : vector<16x512xf32>
    %21 = arith.select %18, %16, %20 : vector<16x512xi1>, vector<16x512xf32>
    %22 = arith.truncf %21 : vector<16x512xf32> to vector<16x512xbf16>
    %c0_14 = arith.constant 0 : index
    %c0_15 = arith.constant 0 : index
    %23 = vector.load %arg6[%c0_14, %c0_15] : memref<512x1024xbf16, #tpu.memory_space<vmem>>, vector<512x1024xbf16>
    %cst_16 = arith.constant dense<0.000000e+00> : vector<16x1024xf32>
    %24 = tpu.matmul %22, %23, %cst_16 {dimension_numbers = #tpu.dot_dimension_numbers<[1], [0], [0], [1], [0, 0, 1, 1], [], []>} : vector<16x512xbf16>, vector<512x1024xbf16>, vector<16x1024xf32> -> vector<16x1024xf32>
    %c0_17 = arith.constant 0 : index
    %c0_18 = arith.constant 0 : index
    %25 = vector.load %arg7[%c0_17, %c0_18] : memref<1x1024xf32, #tpu.memory_space<vmem>>, vector<1x1024xf32>
    %26 = vector.broadcast %25 : vector<1x1024xf32> to vector<16x1024xf32>
    %27 = arith.addf %24, %26 : vector<16x1024xf32>
    %cst_19 = arith.constant 0.000000e+00 : f32
    %28 = vector.broadcast %cst_19 : f32 to vector<16x1024xf32>
    %29 = arith.cmpf ogt, %27, %28 : vector<16x1024xf32>
    %cst_20 = arith.constant 2.000000e-01 : f32
    %30 = vector.broadcast %cst_20 : f32 to vector<16x1024xf32>
    %31 = arith.mulf %30, %27 : vector<16x1024xf32>
    %32 = arith.select %29, %27, %31 : vector<16x1024xi1>, vector<16x1024xf32>
    %33 = arith.truncf %32 : vector<16x1024xf32> to vector<16x1024xbf16>
    %c0_21 = arith.constant 0 : index
    %c0_22 = arith.constant 0 : index
    %34 = vector.load %arg8[%c0_21, %c0_22] : memref<1024x896xbf16, #tpu.memory_space<vmem>>, vector<1024x896xbf16>
    %cst_23 = arith.constant dense<0.000000e+00> : vector<16x896xf32>
    %35 = tpu.matmul %33, %34, %cst_23 {dimension_numbers = #tpu.dot_dimension_numbers<[1], [0], [0], [1], [0, 0, 1, 1], [], []>} : vector<16x1024xbf16>, vector<1024x896xbf16>, vector<16x896xf32> -> vector<16x896xf32>
    %c0_24 = arith.constant 0 : index
    %c0_25 = arith.constant 0 : index
    %36 = vector.load %arg9[%c0_24, %c0_25] : memref<1x896xf32, #tpu.memory_space<vmem>>, vector<1x896xf32>
    %37 = vector.broadcast %36 : vector<1x896xf32> to vector<16x896xf32>
    %38 = arith.addf %35, %37 : vector<16x896xf32>
    %39 = math.tanh %38 : vector<16x896xf32>
    %c0_26 = arith.constant 0 : index
    %c0_27 = arith.constant 0 : index
    %40 = vector.load %arg10[%c0_26, %c0_27] : memref<16x896xf32, #tpu.memory_space<vmem>>, vector<16x896xf32>
    tpu.vector_store %arg10[%c0_26, %c0_27], %39 {strides = array<i32>} : memref<16x896xf32, #tpu.memory_space<vmem>>, vector<16x896xf32>,
    return
  }
  func.func @transform_0(%arg0: i32) -> (i32, i32) {
    %c0_i32 = arith.constant 0 : i32
    %c0_i32_0 = arith.constant 0 : i32
    return %arg0, %c0_i32 : i32, i32
  }
  func.func @transform_1(%arg0: i32) -> (i32, i32) {
    %c0_i32 = arith.constant 0 : i32
    %c0_i32_0 = arith.constant 0 : i32
    %c0_i32_1 = arith.constant 0 : i32
    return %c0_i32, %c0_i32_0 : i32, i32
  }
  func.func @transform_2(%arg0: i32) -> (i32, i32) {
    %c0_i32 = arith.constant 0 : i32
    %c0_i32_0 = arith.constant 0 : i32
    %c0_i32_1 = arith.constant 0 : i32
    return %c0_i32, %c0_i32_0 : i32, i32
  }
  func.func @transform_3(%arg0: i32) -> (i32, i32) {
    %c0_i32 = arith.constant 0 : i32
    %c0_i32_0 = arith.constant 0 : i32
    %c0_i32_1 = arith.constant 0 : i32
    return %c0_i32, %c0_i32_0 : i32, i32
  }
  func.func @transform_4(%arg0: i32) -> (i32, i32) {
    %c0_i32 = arith.constant 0 : i32
    %c0_i32_0 = arith.constant 0 : i32
    %c0_i32_1 = arith.constant 0 : i32
    return %c0_i32, %c0_i32_0 : i32, i32
  }
  func.func @transform_5(%arg0: i32) -> (i32, i32) {
    %c0_i32 = arith.constant 0 : i32
    %c0_i32_0 = arith.constant 0 : i32
    %c0_i32_1 = arith.constant 0 : i32
    return %c0_i32, %c0_i32_0 : i32, i32
  }
  func.func @transform_6(%arg0: i32) -> (i32, i32) {
    %c0_i32 = arith.constant 0 : i32
    %c0_i32_0 = arith.constant 0 : i32
    %c0_i32_1 = arith.constant 0 : i32
    return %c0_i32, %c0_i32_0 : i32, i32
  }
  func.func @transform_7(%arg0: i32) -> (i32, i32) {
    %c0_i32 = arith.constant 0 : i32
    %c0_i32_0 = arith.constant 0 : i32
    %c0_i32_1 = arith.constant 0 : i32
    return %c0_i32, %c0_i32_0 : i32, i32
  }
  func.func @transform_8(%arg0: i32) -> (i32, i32) {
    %c0_i32 = arith.constant 0 : i32
    %c0_i32_0 = arith.constant 0 : i32
    %c0_i32_1 = arith.constant 0 : i32
    return %c0_i32, %c0_i32_0 : i32, i32
  }
  func.func @transform_9(%arg0: i32) -> (i32, i32) {
    %c0_i32 = arith.constant 0 : i32
    %c0_i32_0 = arith.constant 0 : i32
    return %arg0, %c0_i32 : i32, i32
  }
}

</mosaic_0001>

<bundles_post_ra>
// kernel: tpu_custom_call.1
= control target key start
LH: loop header
LB: loop body
LE: loop exit
PB: predicated region body
PF: predicated region fallthrough
CT: control target
= control target key end

     0   :  { %14 = vsyncpa [#allocation3], 0  ;;  %s8571_s0 = inlined_call_operand.hbm [shape: bf16[16,128], index: 0, kind: input, shape index: {}]   ;;  %s8572_s1 = inlined_call_operand.hbm [shape: bf16[128,256], index: 1, kind: input, shape index: {}]   ;;  %s8573_s2 = inlined_call_operand.hbm [shape: f32[1,256], index: 2, kind: input, shape index: {}]   ;;  %s8574_s3 = inlined_call_operand.hbm [shape: bf16[256,512], index: 3, kind: input, shape index: {}]   ;;  %s8575_s4 = inlined_call_operand.hbm [shape: f32[1,512], index: 4, kind: input, shape index: {}]   ;;  %s8576_s5 = inlined_call_operand.hbm [shape: bf16[512,1024], index: 5, kind: input, shape index: {}]   ;;  %s8577_s6 = inlined_call_operand.hbm [shape: f32[1,1024], index: 6, kind: input, shape index: {}]   ;;  %s8578_s7 = inlined_call_operand.hbm [shape: bf16[1024,896], index: 7, kind: input, shape index: {}]   ;;  %s8579_s8 = inlined_call_operand.hbm [shape: f32[1,896], index: 8, kind: input, shape index: {}]   ;;  %s8580_s9 = inlined_call_operand.hbm [shape: f32[16,896], index: 9, kind: output, shape index: {}]  }
   0x1   :  { %15 = vsyncpa [#allocation6], 0 }
   0x2   :  { %16 = vsyncpa [#allocation9], 0 }
   0x3   :  { %17 = vsyncpa [#allocation12], 0 }
   0x4   :  { %18 = vsyncpa [#allocation15], 0 }
   0x5   :  { %19 = vsyncpa [#allocation4], 0  ;;  %s8298_s30 = smov [#allocation5]  }
   0x6   :  { %s37_s10 = sshll.u32 %s8298_s30, 4  ;;  %s38_s10 = int_to_ptr.vmem [resolvable:$true] %s37_s10 }
   0x7   :  { %s8094_s11 = scalar_lea.vmem %s38_s10, 2048  ;;  %p8099_p1 = scmp.lt.s32.totalorder %s38_s10, %s38_s10 }
   0x8   :  { %p8095_p0 = scmp.ne.s32.totalorder %s38_s10, %s8094_s11  ;;  %p8100_p2 = scmp.lt.s32.totalorder %s8094_s11, %s8094_s11 }
   0xa   :  { %p8101_p3 = por %p8100_p2, %p8099_p1 }
   0xc   :  { %p8102_p4 = pnand %p8101_p3, %p8095_p0 }
   0xe   :  { %8105 = shalt.err (!%p8102_p4)
}
   0xf   :  { %s8299_s12 = smov 128   ;;  %s8300_s13 = smov 8  }
  0x10   :  { %43 = dma.hbm_to_vmem [thread:$0]  %s8572_s1, 2048, %s38_s10, [#allocation6], %s8299_s12, %s8299_s12, %s8300_s13  }
  0x11   :  { %s8301_s16 = smov [#allocation8]  }
  0x12   :  { %s59_s17 = sshll.u32 %s8301_s16, 4  ;;  %s60_s17 = int_to_ptr.vmem [resolvable:$true] %s59_s17 }
  0x13   :  { %s8114_s18 = scalar_lea.vmem %s60_s17, 8192  ;;  %p8119_p6 = scmp.lt.s32.totalorder %s60_s17, %s60_s17 }
  0x14   :  { %p8115_p5 = scmp.ne.s32.totalorder %s60_s17, %s8114_s18  ;;  %p8120_p7 = scmp.lt.s32.totalorder %s8114_s18, %s8114_s18 }
  0x16   :  { %p8121_p8 = por %p8120_p7, %p8119_p6 }
  0x18   :  { %p8122_p9 = pnand %p8121_p8, %p8115_p5 }
  0x1a   :  { %8125 = shalt.err (!%p8122_p9)
}
  0x1b   :  { %s8302_s19 = smov 256   ;;  %s8303_s20 = smov 16  }
  0x1c   :  { %65 = dma.hbm_to_vmem [thread:$0]  %s8574_s3, 8192, %s60_s17, [#allocation9], %s8302_s19, %s8302_s19, %s8303_s20  }
  0x1d   :  { %s8304_s23 = smov [#allocation11]  }
  0x1e   :  { %s81_s24 = sshll.u32 %s8304_s23, 4  ;;  %s82_s24 = int_to_ptr.vmem [resolvable:$true] %s81_s24 }
  0x1f   :  { %s8134_s1 = scalar_lea.vmem %s82_s24, 32768  ;;  %p8139_p11 = scmp.lt.s32.totalorder %s82_s24, %s82_s24 }
  0x20   :  { %p8135_p10 = scmp.ne.s32.totalorder %s82_s24, %s8134_s1  ;;  %p8140_p12 = scmp.lt.s32.totalorder %s8134_s1, %s8134_s1 }
  0x22   :  { %p8141_p13 = por %p8140_p12, %p8139_p11 }
  0x24   :  { %p8142_p0 = pnand %p8141_p13, %p8135_p10 }
  0x26   :  { %8145 = shalt.err (!%p8142_p0)
}
  0x27   :  { %s8305_s25 = smov 512   ;;  %s8306_s26 = smov 32  }
  0x28   :  { %87 = dma.hbm_to_vmem [thread:$0]  %s8576_s5, 32768, %s82_s24, [#allocation12], %s8305_s25, %s8305_s25, %s8306_s26  }
  0x29   :  { %s8307_s29 = smov [#allocation14]  }
  0x2a   :  { %s103_s30 = sshll.u32 %s8307_s29, 4  ;;  %s104_s30 = int_to_ptr.vmem [resolvable:$true] %s103_s30 }
  0x2b   :  { %s8154_s3 = scalar_lea.vmem %s104_s30, 57344  ;;  %p8159_p2 = scmp.lt.s32.totalorder %s104_s30, %s104_s30 }
  0x2c   :  { %p8155_p1 = scmp.ne.s32.totalorder %s104_s30, %s8154_s3  ;;  %p8160_p3 = scmp.lt.s32.totalorder %s8154_s3, %s8154_s3 }
  0x2e   :  { %p8161_p4 = por %p8160_p3, %p8159_p2 }
  0x30   :  { %p8162_p5 = pnand %p8161_p4, %p8155_p1 }
  0x32   :  { %8165 = shalt.err (!%p8162_p5)
}
  0x33   :  { %s8308_s10 = smov 448   ;;  %s8309_s11 = smov 28  }
  0x34   :  { %109 = dma.hbm_to_vmem [thread:$0]  %s8578_s7, 57344, %s104_s30, [#allocation15], %s8308_s10, %s8308_s10, %s8309_s11  }
  0x35   :  { %s8310_s14 = smov [#allocation2]  }
  0x36   :  { %s25_s15 = sshll.u32 %s8310_s14, 4  ;;  %s26_s15 = int_to_ptr.vmem [resolvable:$true] %s25_s15 }
  0x37   :  { %s8174_s5 = scalar_lea.vmem %s26_s15, 128  ;;  %p8179_p7 = scmp.lt.s32.totalorder %s26_s15, %s26_s15 }
  0x38   :  { %p8175_p6 = scmp.ne.s32.totalorder %s26_s15, %s8174_s5  ;;  %p8180_p8 = scmp.lt.s32.totalorder %s8174_s5, %s8174_s5 }
  0x3a   :  { %p8181_p9 = por %p8180_p8, %p8179_p7 }
  0x3c   :  { %p8182_p10 = pnand %p8181_p9, %p8175_p6 }
  0x3e   :  { %8185 = shalt.err (!%p8182_p10)
}
  0x3f   :  { %s8311_s16 = smov 64   ;;  %s8312_s17 = smov 4  }
  0x40   :  { %31 = dma.hbm_to_vmem [thread:$0]  %s8571_s0, 128, %s26_s15, [#allocation3], %s8311_s16, %s8311_s16, %s8312_s17  }
  0x41   :  { %s8313_s20 = smov [#allocation7]   ;;  %s8314_s7 = smov [#allocation10]  }
  0x42   :  { %s50_s21 = sshll.u32 %s8313_s20, 4  ;;  %s72_s22 = sshll.u32 %s8314_s7, 4  ;;  %s51_s21 = int_to_ptr.vmem [resolvable:$true] %s50_s21  ;;  %s73_s22 = int_to_ptr.vmem [resolvable:$true] %s72_s22 }
  0x43   :  { %s8194_s23 = scalar_lea.vmem %s51_s21, 32  ;;  %p8199_p12 = scmp.lt.s32.totalorder %s51_s21, %s51_s21 }
  0x44   :  { %p8195_p11 = scmp.ne.s32.totalorder %s51_s21, %s8194_s23  ;;  %p8200_p13 = scmp.lt.s32.totalorder %s8194_s23, %s8194_s23 }
  0x46   :  { %p8201_p0 = por %p8200_p13, %p8199_p12 }
  0x48   :  { %p8202_p1 = pnand %p8201_p0, %p8195_p11 }
  0x4a   :  { %8205 = shalt.err (!%p8202_p1)
}
  0x4b   :  { %53 = dma.hbm_to_vmem [thread:$0]  %s8573_s2, 32, %s51_s21, [#allocation6]  }
  0x4c   :  { %s8214_s25 = scalar_lea.vmem %s73_s22, 64  ;;  %p8219_p3 = scmp.lt.s32.totalorder %s73_s22, %s73_s22 }
  0x4d   :  { %p8215_p2 = scmp.ne.s32.totalorder %s73_s22, %s8214_s25  ;;  %p8220_p4 = scmp.lt.s32.totalorder %s8214_s25, %s8214_s25 }
  0x4f   :  { %p8221_p5 = por %p8220_p4, %p8219_p3 }
  0x51   :  { %p8222_p6 = pnand %p8221_p5, %p8215_p2 }
  0x53   :  { %8225 = shalt.err (!%p8222_p6)
}
  0x54   :  { %75 = dma.hbm_to_vmem [thread:$0]  %s8575_s4, 64, %s73_s22, [#allocation9]  }
  0x55   :  { %s8315_s27 = smov [#allocation13]   ;;  %s8316_s29 = smov [#allocation16]  }
  0x56   :  { %s94_s28 = sshll.u32 %s8315_s27, 4  ;;  %s116_s30 = sshll.u32 %s8316_s29, 4  ;;  %s95_s28 = int_to_ptr.vmem [resolvable:$true] %s94_s28  ;;  %s117_s30 = int_to_ptr.vmem [resolvable:$true] %s116_s30 }
  0x57   :  { %s8234_s3 = scalar_lea.vmem %s95_s28, 128  ;;  %p8239_p8 = scmp.lt.s32.totalorder %s95_s28, %s95_s28 }
  0x58   :  { %p8235_p7 = scmp.ne.s32.totalorder %s95_s28, %s8234_s3  ;;  %p8240_p9 = scmp.lt.s32.totalorder %s8234_s3, %s8234_s3 }
  0x5a   :  { %p8241_p10 = por %p8240_p9, %p8239_p8 }
  0x5c   :  { %p8242_p11 = pnand %p8241_p10, %p8235_p7 }
  0x5e   :  { %8245 = shalt.err (!%p8242_p11)
}
  0x5f   :  { %97 = dma.hbm_to_vmem [thread:$0]  %s8577_s6, 128, %s95_s28, [#allocation12]  }
  0x60   :  { %s8254_s11 = scalar_lea.vmem %s117_s30, 112  ;;  %s8258_s4 = scalar_lea.vmem %s117_s30, 128 }
  0x61   :  { %p8255_p12 = scmp.ne.s32.totalorder %s117_s30, %s8254_s11  ;;  %p8259_p13 = scmp.lt.s32.totalorder %s117_s30, %s117_s30 }
  0x62   :  { %p8260_p0 = scmp.lt.s32.totalorder %s8258_s4, %s8254_s11 }
  0x64   :  { %p8261_p1 = por %p8260_p0, %p8259_p13 }
  0x66   :  { %p8262_p2 = pnand %p8261_p1, %p8255_p12 }
  0x68   :  { %8265 = shalt.err (!%p8262_p2)
}
  0x69   :  { %119 = dma.hbm_to_vmem [thread:$0]  %s8579_s8, 112, %s117_s30, [#allocation15]  }
  0x6a   :  { %8286 = dma.done.wait [#allocation3], 128  }
  0x6b   :  { %8287 = vsyncadd [#allocation3], 4294967168 }
  0x6c   :  { %8288 = dma.done.wait [#allocation6], 2080  }
  0x6d   :  { %8289 = vsyncadd [#allocation6], 4294965216 }
  0x6e   :  { %8290 = dma.done.wait [#allocation9], 8256  }
  0x6f   :  { %8291 = vsyncadd [#allocation9], 4294959040 }
  0x70   :  { %8292 = dma.done.wait [#allocation12], 32896  }
  0x71   :  { %8293 = vsyncadd [#allocation12], 4294934400 }
  0x72   :  { %8294 = dma.done.wait [#allocation15], 57456  }
  0x73   :  { %8295 = vsyncadd [#allocation15], 4294909840  ;;  %v8317_v0 = vmov 0   ;;  %v7297_v1 = vld [vmem:[#allocation5 + $0x74] ss:$8 sps:$4 sm:$0xff]   ;;  %s8318_s6 = smov [#allocation17]  }
  0x74   :  { %296 = vmatprep.mubr.bf16.mxu0 %v8317_v0  ;;  %v7299_v2 = vld [vmem:[#allocation5 + $0x70] ss:$8 sps:$4 sm:$0xff]   ;;  %264 = vmatprep.subr.bf16.mxu0 %v7297_v1  ;;  %v7300_v3 = vld [vmem:[#allocation5 + $0x64] ss:$8 sps:$4 sm:$0xff]   ;;  %v7302_v4 = vld [vmem:[#allocation5 + $0x60] ss:$8 sps:$4 sm:$0xff]  }
  0x75   :  { %265 = vmatpush1.bf16.msra.mxu0 %v7299_v2  ;;  %v7303_v5 = vld [vmem:[#allocation5 + $0x54] ss:$8 sps:$4 sm:$0xff]   ;;  %v7305_v6 = vld [vmem:[#allocation5 + $0x50] ss:$8 sps:$4 sm:$0xff]   ;;  %v7306_v7 = vld [vmem:[#allocation5 + $0x44] ss:$8 sps:$4 sm:$0xff]  }
  0x76   :  { %266 = vmatprep.subr.bf16.mxu0 %v7300_v3  ;;  %v7308_v8 = vld [vmem:[#allocation5 + $0x40] ss:$8 sps:$4 sm:$0xff]   ;;  %v7309_v9 = vld [vmem:[#allocation5 + $0x34] ss:$8 sps:$4 sm:$0xff]   ;;  %v7311_v11 = vld [vmem:[#allocation5 + $0x30] ss:$8 sps:$4 sm:$0xff]  }
  0x77   :  { %v7322_v10 = vld [vmem:[#allocation8 + $0xe4] ss:$16 sps:$4 sm:$0xff]   ;;  %v7327_v12 = vld [vmem:[#allocation8 + $0xe0] ss:$16 sps:$4 sm:$0xff]   ;;  %v7326_v26 = vld [vmem:[#allocation8 + $0xec] ss:$16 sps:$4 sm:$0xff]  }
  0x78   :  { %727 = vmatprep.subr.bf16.mxu1 %v7322_v10  ;;  %v7328_v13 = vld [vmem:[#allocation8 + $0xc4] ss:$16 sps:$4 sm:$0xff]   ;;  %v7333_v15 = vld [vmem:[#allocation8 + $0xc0] ss:$16 sps:$4 sm:$0xff]   ;;  %v7324_v30 = vld [vmem:[#allocation8 + $0xe8] ss:$16 sps:$4 sm:$0xff]  }
  0x79   :  { %267 = vmatpush1.bf16.msra.mxu0 %v7302_v4  ;;  %v7312_v14 = vld [vmem:[#allocation5 + $0x24] ss:$8 sps:$4 sm:$0xff]   ;;  %728 = vmatpush1.bf16.msra.mxu1 %v7327_v12  ;;  %v7314_v17 = vld [vmem:[#allocation5 + $0x20] ss:$8 sps:$4 sm:$0xff]   ;;  %v7315_v18 = vld [vmem:[#allocation5 + $0x14] ss:$8 sps:$4 sm:$0xff]  }
  0x7a   :  { %268 = vmatprep.subr.bf16.mxu0 %v7303_v5  ;;  %729 = vmatprep.subr.bf16.mxu1 %v7328_v13  ;;  %v7334_v16 = vld [vmem:[#allocation8 + $0xa4] ss:$16 sps:$4 sm:$0xff]   ;;  %v7339_v19 = vld [vmem:[#allocation8 + $0xa0] ss:$16 sps:$4 sm:$0xff]   ;;  %v7332_v31 = vld [vmem:[#allocation8 + $0xcc] ss:$16 sps:$4 sm:$0xff]  }
  0x7b   :  { %v7340_v20 = vld [vmem:[#allocation8 + $0x84] ss:$16 sps:$4 sm:$0xff]   ;;  %v7345_v23 = vld [vmem:[#allocation8 + $0x80] ss:$16 sps:$4 sm:$0xff]   ;;  %v7330_v34 = vld [vmem:[#allocation8 + $0xc8] ss:$16 sps:$4 sm:$0xff]  }
  0x7c   :  { %v7317_v21 = vld [vmem:[#allocation5 + $0x10] ss:$8 sps:$4 sm:$0xff]   ;;  %v7318_v22 = vld [vmem:[#allocation5 + $0x4] ss:$8 sps:$4 sm:$0xff]   ;;  %v7320_v25 = vld [vmem:[#allocation5] ss:$8 sps:$4 sm:$0xff]  }
  0x7d   :  { %269 = vmatpush1.bf16.msra.mxu0 %v7305_v6  ;;  %730 = vmatpush1.bf16.msra.mxu1 %v7333_v15  ;;  %v7346_v24 = vld [vmem:[#allocation8 + $0x64] ss:$16 sps:$4 sm:$0xff]   ;;  %v7351_v27 = vld [vmem:[#allocation8 + $0x60] ss:$16 sps:$4 sm:$0xff]   ;;  %v7338_v35 = vld [vmem:[#allocation8 + $0xac] ss:$16 sps:$4 sm:$0xff]  }
  0x7e   :  { %270 = vmatprep.subr.bf16.mxu0 %v7306_v7  ;;  %731 = vmatprep.subr.bf16.mxu1 %v7334_v16  ;;  %v7352_v28 = vld [vmem:[#allocation8 + $0x44] ss:$16 sps:$4 sm:$0xff]   ;;  %v7357_v32 = vld [vmem:[#allocation8 + $0x40] ss:$16 sps:$4 sm:$0xff]   ;;  %v7336_v38 = vld [vmem:[#allocation8 + $0xa8] ss:$16 sps:$4 sm:$0xff]  }
  0x7f   :  { %v7321_v29 = vld [vmem:[#allocation2] sm:$0xff]   ;;  %v7363_v36 = vld [vmem:[#allocation8 + $0x20] ss:$16 sps:$4 sm:$0xff]   ;;  %s6385_s8 = sshll.u32 %s8318_s6, 4  ;;  %s6386_s8 = int_to_ptr.vmem [resolvable:$true] %s6385_s8 }
  0x80   :  { %v7358_v33 = vld [vmem:[#allocation8 + $0x24] ss:$16 sps:$4 sm:$0xff]   ;;  %v7344_v39 = vld [vmem:[#allocation8 + $0x8c] ss:$16 sps:$4 sm:$0xff]   ;;  %v7369_v40 = vld [vmem:[#allocation8] ss:$16 sps:$4 sm:$0xff]   ;;  %p8271_p4 = scmp.lt.s32.totalorder %s6386_s8, %s6386_s8 }
  0x81   :  { %271 = vmatpush1.bf16.msra.mxu0 %v7308_v8  ;;  %732 = vmatpush1.bf16.msra.mxu1 %v7339_v19  ;;  %v7364_v37 = vld [vmem:[#allocation8 + $0x4] ss:$16 sps:$4 sm:$0xff]   ;;  %v7342_v42 = vld [vmem:[#allocation8 + $0x88] ss:$16 sps:$4 sm:$0xff]   ;;  %v7350_v43 = vld [vmem:[#allocation8 + $0x6c] ss:$16 sps:$4 sm:$0xff]  }
  0x82   :  { %272 = vmatprep.subr.bf16.mxu0 %v7309_v9  ;;  %733 = vmatprep.subr.bf16.mxu1 %v7340_v20  ;;  %v7370_v41 = vld [vmem:[#allocation8 + $0x1e4] ss:$16 sps:$4 sm:$0xff]   ;;  %v7375_v44 = vld [vmem:[#allocation8 + $0x1e0] ss:$16 sps:$4 sm:$0xff]   ;;  %v7348_v45 = vld [vmem:[#allocation8 + $0x68] ss:$16 sps:$4 sm:$0xff]  }
  0x83   :  { %v7376_v46 = vld [vmem:[#allocation8 + $0x1c4] ss:$16 sps:$4 sm:$0xff]   ;;  %v7356_v47 = vld [vmem:[#allocation8 + $0x4c] ss:$16 sps:$4 sm:$0xff]   ;;  %v7381_v48 = vld [vmem:[#allocation8 + $0x1c0] ss:$16 sps:$4 sm:$0xff]  }
  0x84   :  { %v7382_v49 = vld [vmem:[#allocation8 + $0x1a4] ss:$16 sps:$4 sm:$0xff]   ;;  %v7354_v50 = vld [vmem:[#allocation8 + $0x48] ss:$16 sps:$4 sm:$0xff]   ;;  %v7362_v51 = vld [vmem:[#allocation8 + $0x2c] ss:$16 sps:$4 sm:$0xff]  }
  0x85   :  { %273 = vmatpush1.bf16.msra.mxu0 %v7311_v11  ;;  %734 = vmatpush1.bf16.msra.mxu1 %v7345_v23  ;;  %v7387_v52 = vld [vmem:[#allocation8 + $0x1a0] ss:$16 sps:$4 sm:$0xff]   ;;  %v7388_v53 = vld [vmem:[#allocation8 + $0x184] ss:$16 sps:$4 sm:$0xff]   ;;  %v7360_v54 = vld [vmem:[#allocation8 + $0x28] ss:$16 sps:$4 sm:$0xff]  }
  0x86   :  { %274 = vmatprep.subr.bf16.mxu0 %v7312_v14  ;;  %735 = vmatprep.subr.bf16.mxu1 %v7346_v24  ;;  %v7368_v55 = vld [vmem:[#allocation8 + $0xc] ss:$16 sps:$4 sm:$0xff]   ;;  %v7393_v56 = vld [vmem:[#allocation8 + $0x180] ss:$16 sps:$4 sm:$0xff]   ;;  %v7394_v57 = vld [vmem:[#allocation8 + $0x164] ss:$16 sps:$4 sm:$0xff]  }
  0x87   :  { %v7366_v58 = vld [vmem:[#allocation8 + $0x8] ss:$16 sps:$4 sm:$0xff]   ;;  %v7374_v59 = vld [vmem:[#allocation8 + $0x1ec] ss:$16 sps:$4 sm:$0xff]   ;;  %v7399_v5 = vld [vmem:[#allocation8 + $0x160] ss:$16 sps:$4 sm:$0xff]  }
  0x88   :  { %v7372_v60 = vld [vmem:[#allocation8 + $0x1e8] ss:$16 sps:$4 sm:$0xff]   ;;  %v7380_v61 = vld [vmem:[#allocation8 + $0x1cc] ss:$16 sps:$4 sm:$0xff]   ;;  %v7400_v6 = vld [vmem:[#allocation8 + $0x144] ss:$16 sps:$4 sm:$0xff]  }
  0x89   :  { %275 = vmatpush1.bf16.msra.mxu0 %v7314_v17  ;;  %736 = vmatpush1.bf16.msra.mxu1 %v7351_v27  ;;  %v7378_v62 = vld [vmem:[#allocation8 + $0x1c8] ss:$16 sps:$4 sm:$0xff]   ;;  %v7386_v63 = vld [vmem:[#allocation8 + $0x1ac] ss:$16 sps:$4 sm:$0xff]   ;;  %v7405_v9 = vld [vmem:[#allocation8 + $0x140] ss:$16 sps:$4 sm:$0xff]  }
  0x8a   :  { %276 = vmatprep.subr.bf16.mxu0 %v7315_v18  ;;  %737 = vmatprep.subr.bf16.mxu1 %v7352_v28  ;;  %v7384_v0 = vld [vmem:[#allocation8 + $0x1a8] ss:$16 sps:$4 sm:$0xff]   ;;  %v7392_v1 = vld [vmem:[#allocation8 + $0x18c] ss:$16 sps:$4 sm:$0xff]   ;;  %v7406_v10 = vld [vmem:[#allocation8 + $0x124] ss:$16 sps:$4 sm:$0xff]  }
  0x8b   :  { %v7390_v2 = vld [vmem:[#allocation8 + $0x188] ss:$16 sps:$4 sm:$0xff]   ;;  %v7398_v3 = vld [vmem:[#allocation8 + $0x16c] ss:$16 sps:$4 sm:$0xff]   ;;  %v7411_v13 = vld [vmem:[#allocation8 + $0x120] ss:$16 sps:$4 sm:$0xff]  }
  0x8c   :  { %v7396_v4 = vld [vmem:[#allocation8 + $0x168] ss:$16 sps:$4 sm:$0xff]   ;;  %v7404_v7 = vld [vmem:[#allocation8 + $0x14c] ss:$16 sps:$4 sm:$0xff]   ;;  %v7412_v14 = vld [vmem:[#allocation8 + $0x104] ss:$16 sps:$4 sm:$0xff]  }
  0x8d   :  { %277 = vmatpush1.bf16.msra.mxu0 %v7317_v21  ;;  %738 = vmatpush1.bf16.msra.mxu1 %v7357_v32  ;;  %v7402_v8 = vld [vmem:[#allocation8 + $0x148] ss:$16 sps:$4 sm:$0xff]   ;;  %v7410_v11 = vld [vmem:[#allocation8 + $0x12c] ss:$16 sps:$4 sm:$0xff]   ;;  %v7417_v17 = vld [vmem:[#allocation8 + $0x100] ss:$16 sps:$4 sm:$0xff]  }
  0x8e   :  { %278 = vmatprep.subr.bf16.mxu0 %v7318_v22  ;;  %739 = vmatprep.subr.bf16.mxu1 %v7358_v33  ;;  %v7408_v12 = vld [vmem:[#allocation8 + $0x128] ss:$16 sps:$4 sm:$0xff]   ;;  %v7416_v16 = vld [vmem:[#allocation8 + $0x10c] ss:$16 sps:$4 sm:$0xff]   ;;  %s8266_s14 = scalar_lea.vmem %s6386_s8, 1792 }
  0x8f   :  { %v7414_v15 = vld [vmem:[#allocation8 + $0x108] ss:$16 sps:$4 sm:$0xff]   ;;  %v166_v28 = vld [vmem:[#allocation7] sm:$0x3]  ;;  %p8267_p3 = scmp.ne.s32.totalorder %s6386_s8, %s8266_s14  ;;  %p8272_p5 = scmp.lt.s32.totalorder %s8266_s14, %s8266_s14 }
  0x90   :  { %v897_v18 = vld [vmem:[#allocation11 + $0x1c0] sm:$0xff] }
  0x91   :  { %279 = vmatpush1.bf16.msra.mxu0 %v7320_v25  ;;  %740 = vmatpush1.bf16.msra.mxu1 %v7363_v36  ;;  %v901_v19 = vld [vmem:[#allocation11 + $0x1e0] sm:$0xff]  ;;  %p8273_p6 = por %p8272_p5, %p8271_p4 }
  0x92   :  { %770 = vmatprep.subr.bf16.mxu0 %v7326_v26  ;;  %741 = vmatprep.subr.bf16.mxu1 %v7364_v37  ;;  %v1025_v20 = vld [vmem:[#allocation11 + $0x5c0] sm:$0xff]  ;;  %v6538_v21 = vcombine.low %v897_v18, %v901_v19  ;;  %v6539_v22 = vcombine.high %v897_v18, %v901_v19  ;;  %v168_v26 = vlaneseq }
  0x93   :  { %v1029_v23 = vld [vmem:[#allocation11 + $0x5e0] sm:$0xff]  ;;  %p8274_p7 = pnand %p8273_p6, %p8267_p3 }
  0x94   :  { %297 = vmatmul.mubr.bf16.vlgmr.msra.gmra.mxu0 %v7321_v29  ;;  %v6666_v24 = vcombine.low %v1025_v20, %v1029_v23  ;;  %v6667_v25 = vcombine.high %v1025_v20, %v1029_v23  ;;  %v8398_v27 = vshrl.u32 %v168_v26, 7  ;;  %v861_v18 = vld [vmem:[#allocation11 + $0xa0] sm:$0xff] }
  0x95   :  { %771 = vmatpush1.bf16.msra.mxu0 %v7324_v30  ;;  %742 = vmatpush1.bf16.msra.mxu1 %v7369_v40  ;;  %v985_v19 = vld [vmem:[#allocation11 + $0x480] sm:$0xff] }
  0x96   :  { %772 = vmatprep.subr.bf16.mxu0 %v7332_v31  ;;  %743 = vmatprep.subr.bf16.mxu1 %v7370_v41  ;;  %v8401_v29 = vsub.s32 0, %v8398_v27  ;;  %v8404_v30 = vsub.s32 1, %v8398_v27  ;;  %v989_v20 = vld [vmem:[#allocation11 + $0x4a0] sm:$0xff] }
  0x97   :  { %v853_v26 = vld [vmem:[#allocation11 + $0x60] sm:$0xff] }
  0x98   :  { %v171_v31 = vrot.slane %v166_v28, %v8401_v29  ;;  %v175_v32 = vrot.slane %v166_v28, %v8404_v30  ;;  %v977_v28 = vld [vmem:[#allocation11 + $0x440] sm:$0xff] }
  0x99   :  { %773 = vmatpush1.bf16.msra.mxu0 %v7330_v34  ;;  %744 = vmatpush2.bf16.msra.mxu1 %v7375_v44  ;;  %v889_v44 = vld [vmem:[#allocation11 + $0x180] sm:$0xff] }
  0x9a   :  { %774 = vmatprep.subr.bf16.mxu0 %v7338_v35  ;;  %745 = vmatprep.subr.bf16.mxu1 %v7376_v46  ;;  %v1017_v46 = vld [vmem:[#allocation11 + $0x580] sm:$0xff] }
  0x9d   :  { %775 = vmatpush1.bf16.msra.mxu0 %v7336_v38  ;;  %746 = vmatpush2.bf16.msra.mxu1 %v7381_v48 }
  0x9e   :  { %776 = vmatprep.subr.bf16.mxu0 %v7344_v39  ;;  %747 = vmatprep.subr.bf16.mxu1 %v7382_v49 }
  0xa1   :  { %777 = vmatpush1.bf16.msra.mxu0 %v7342_v42  ;;  %748 = vmatpush2.bf16.msra.mxu1 %v7387_v52 }
  0xa2   :  { %778 = vmatprep.subr.bf16.mxu0 %v7350_v43  ;;  %749 = vmatprep.subr.bf16.mxu1 %v7388_v53 }
  0xa5   :  { %779 = vmatpush1.bf16.msra.mxu0 %v7348_v45  ;;  %750 = vmatpush2.bf16.msra.mxu1 %v7393_v56  ;;  %v893_v45 = vld [vmem:[#allocation11 + $0x1a0] sm:$0xff] }
  0xa6   :  { %780 = vmatprep.subr.bf16.mxu0 %v7356_v47  ;;  %751 = vmatprep.subr.bf16.mxu1 %v7394_v57  ;;  %v1021_v47 = vld [vmem:[#allocation11 + $0x5a0] sm:$0xff] }
  0xa7   :  { %v1009_v56 = vld [vmem:[#allocation11 + $0x540] sm:$0xff] }
  0xa8   :  { %v1013_v57 = vld [vmem:[#allocation11 + $0x560] sm:$0xff] }
  0xa9   :  { %781 = vmatpush1.bf16.msra.mxu0 %v7354_v50  ;;  %752 = vmatpush2.bf16.msra.mxu1 %v7399_v5 }
  0xaa   :  { %782 = vmatprep.subr.bf16.mxu0 %v7362_v51  ;;  %753 = vmatprep.subr.bf16.mxu1 %v7400_v6  ;;  %v6650_v6 = vcombine.low %v1009_v56, %v1013_v57 }
  0xad   :  { %783 = vmatpush1.bf16.msra.mxu0 %v7360_v54  ;;  %754 = vmatpush2.bf16.msra.mxu1 %v7405_v9  ;;  %v881_v54 = vld [vmem:[#allocation11 + $0x140] sm:$0xff] }
  0xae   :  { %784 = vmatprep.subr.bf16.mxu0 %v7368_v55  ;;  %755 = vmatprep.subr.bf16.mxu1 %v7406_v10  ;;  %v885_v55 = vld [vmem:[#allocation11 + $0x160] sm:$0xff] }
  0xaf   :  { %v6522_v5 = vcombine.low %v881_v54, %v885_v55  ;;  %v865_v9 = vld [vmem:[#allocation11 + $0xc0] sm:$0xff] }
  0xb0   :  { %v869_v10 = vld [vmem:[#allocation11 + $0xe0] sm:$0xff] }
  0xb1   :  { %785 = vmatpush1.bf16.msra.mxu0 %v7366_v58  ;;  %756 = vmatpush2.bf16.msra.mxu1 %v7411_v13 }
  0xb2   :  { %786 = vmatprep.subr.bf16.mxu0 %v7374_v59  ;;  %757 = vmatprep.subr.bf16.mxu1 %v7412_v14  ;;  %v6531_v59 = vcombine.high %v889_v44, %v893_v45 }
  0xb5   :  { %787 = vmatpush2.bf16.msra.mxu0 %v7372_v60  ;;  %758 = vmatpush2.bf16.msra.mxu1 %v7417_v17  ;;  %v6659_v60 = vcombine.high %v1017_v46, %v1021_v47  ;;  %v857_v17 = vld [vmem:[#allocation11 + $0x80] sm:$0xff] }
  0xb6   :  { %788 = vmatprep.subr.bf16.mxu0 %v7380_v61  ;;  %2419 = vmatprep.subr.bf16.mxu1 %v6539_v22  ;;  %v6530_v61 = vcombine.low %v889_v44, %v893_v45  ;;  %v6499_v23 = vcombine.high %v857_v17, %v861_v18  ;;  %v961_v44 = vld [vmem:[#allocation11 + $0x3c0] sm:$0xff] }
  0xb7   :  { %v965_v45 = vld [vmem:[#allocation11 + $0x3e0] sm:$0xff] }
  0xb9   :  { %789 = vmatpush2.bf16.msra.mxu0 %v7378_v62  ;;  %v6658_v62 = vcombine.low %v1017_v46, %v1021_v47  ;;  %v1089_v46 = vld [vmem:[#allocation11 + $0x7c0] sm:$0xff] }
  0xba   :  { %790 = vmatprep.subr.bf16.mxu0 %v7386_v63  ;;  %v873_v63 = vld [vmem:[#allocation11 + $0x100] sm:$0xff] }
  0xbb   :  { %v1093_v47 = vld [vmem:[#allocation11 + $0x7e0] sm:$0xff] }
  0xbd   :  { %791 = vmatpush2.bf16.msra.mxu0 %v7384_v0  ;;  %v877_v0 = vld [vmem:[#allocation11 + $0x120] sm:$0xff] }
  0xbe   :  { %792 = vmatprep.subr.bf16.mxu0 %v7392_v1  ;;  %v1001_v1 = vld [vmem:[#allocation11 + $0x500] sm:$0xff]  ;;  %v6514_v13 = vcombine.low %v873_v63, %v877_v0 }
  0xc1   :  { %793 = vmatpush2.bf16.msra.mxu0 %v7390_v2  ;;  %v1005_v2 = vld [vmem:[#allocation11 + $0x520] sm:$0xff] }
  0xc2   :  { %794 = vmatprep.subr.bf16.mxu0 %v7398_v3  ;;  %v6523_v3 = vcombine.high %v881_v54, %v885_v55  ;;  %v6642_v14 = vcombine.low %v1001_v1, %v1005_v2  ;;  %v1081_v54 = vld [vmem:[#allocation11 + $0x780] sm:$0xff] }
  0xc3   :  { %v1085_v55 = vld [vmem:[#allocation11 + $0x7a0] sm:$0xff] }
  0xc5   :  { %795 = vmatpush2.bf16.msra.mxu0 %v7396_v4  ;;  %v6651_v4 = vcombine.high %v1009_v56, %v1013_v57  ;;  %v6602_v56 = vcombine.low %v961_v44, %v965_v45  ;;  %v6730_v57 = vcombine.low %v1089_v46, %v1093_v47 }
  0xc6   :  { %796 = vmatprep.subr.bf16.mxu0 %v7404_v7  ;;  %v6515_v7 = vcombine.high %v873_v63, %v877_v0  ;;  %v1077_v63 = vld [vmem:[#allocation11 + $0x760] sm:$0xff] }
  0xc9   :  { %797 = vmatpush2.bf16.msra.mxu0 %v7402_v8  ;;  %v6643_v8 = vcombine.high %v1001_v1, %v1005_v2  ;;  %v6722_v1 = vcombine.low %v1081_v54, %v1085_v55 }
  0xca   :  { %798 = vmatprep.subr.bf16.mxu0 %v7410_v11  ;;  %v993_v11 = vld [vmem:[#allocation11 + $0x4c0] sm:$0xff] }
  0xcd   :  { %799 = vmatpush2.bf16.msra.mxu0 %v7408_v12  ;;  %v997_v12 = vld [vmem:[#allocation11 + $0x4e0] sm:$0xff] }
  0xce   :  { %800 = vmatprep.subr.bf16.mxu0 %v7416_v16  ;;  %v6635_v16 = vcombine.high %v993_v11, %v997_v12  ;;  %v6634_v22 = vcombine.low %v993_v11, %v997_v12  ;;  %v929_v12 = vld [vmem:[#allocation11 + $0x2c0] sm:$0xff] }
  0xd1   :  { %801 = vmatpush2.bf16.msra.mxu0 %v7414_v15  ;;  %v6507_v15 = vcombine.high %v865_v9, %v869_v10 }
  0xd2   :  { %2462 = vmatprep.subr.bf16.mxu0 %v6667_v25  ;;  %v849_v25 = vld [vmem:[#allocation11 + $0x40] sm:$0xff] }
 0x154   :  { %v298_v33 = vpop.f32.mrf.mxu0 }
 0x155   :  { %v299_v34 = vadd.f32 %v298_v33, %v171_v31  ;;  %v6626_v33 = vcombine.low %v985_v19, %v989_v20 }
 0x156   :  { %v300_v35 = vpop.f32.mrf.mxu0 }
 0x157   :  { %v301_v36 = vadd.f32 %v300_v35, %v175_v32  ;;  %v311_v38 = vmul.f32 0.2, %v299_v34  ;;  %vm307_vm2 = vcmp.gt.f32.partialorder %v299_v34, 0.0 }
 0x158   :  { %v302_v37 = vpop.f32.mrf.mxu0 }
 0x159   :  { %v312_v39 = vmul.f32 0.2, %v301_v36  ;;  %v303_v40 = vadd.f32 %v302_v37, %v171_v31  ;;  %vm308_vm1 = vcmp.gt.f32.partialorder %v301_v36, 0.0  ;;  %v315_v53 = vsel %vm307_vm2, %v299_v34, %v311_v38  ;;  %v981_v31 = vld [vmem:[#allocation11 + $0x460] sm:$0xff] }
 0x15a   :  { %v304_v41 = vpop.f32.mrf.mxu0  ;;  %v6491_v34 = vcombine.high %v849_v25, %v853_v26  ;;  %v6619_v35 = vcombine.high %v977_v28, %v981_v31  ;;  %v845_v37 = vld [vmem:[#allocation11 + $0x20] sm:$0xff] }
 0x15b   :  { %vm309_vm0 = vcmp.gt.f32.partialorder %v303_v40, 0.0  ;;  %v313_v42 = vmul.f32 0.2, %v303_v40  ;;  %v305_v43 = vadd.f32 %v304_v41, %v175_v32  ;;  %v316_v50 = vsel %vm308_vm1, %v301_v36, %v312_v39  ;;  %v841_v36 = vld [vmem:[#allocation11] sm:$0xff] }
 0x15c   :  { %v6498_v32 = vcombine.low %v857_v17, %v861_v18  ;;  %v969_v38 = vld [vmem:[#allocation11 + $0x400] sm:$0xff]  ;;  %v6618_v41 = vcombine.low %v977_v28, %v981_v31 }
 0x15d   :  { %v314_v48 = vmul.f32 0.2, %v305_v43  ;;  %vm310_vm3 = vcmp.gt.f32.partialorder %v305_v43, 0.0  ;;  %v317_v49 = vsel %vm309_vm0, %v303_v40, %v313_v42  ;;  %v973_v39 = vld [vmem:[#allocation11 + $0x420] sm:$0xff]  ;;  %v6490_v40 = vcombine.low %v849_v25, %v853_v26 }
 0x15e   :  { %v319_v58 = vpack.c.bf16 %v317_v49, %v315_v53  ;;  %v6483_v42 = vcombine.high %v841_v36, %v845_v37  ;;  %v6610_v49 = vcombine.low %v969_v38, %v973_v39  ;;  %v957_v53 = vld [vmem:[#allocation11 + $0x3a0] sm:$0xff] }
 0x15f   :  { %v318_v51 = vsel %vm310_vm3, %v305_v43, %v314_v48  ;;  %v6611_v43 = vcombine.high %v969_v38, %v973_v39  ;;  %v6482_v48 = vcombine.low %v841_v36, %v845_v37  ;;  %v1053_v26 = vld [vmem:[#allocation11 + $0x6a0] sm:$0xff] }
 0x160   :  { %v320_v52 = vpack.c.bf16 %v318_v51, %v316_v50  ;;  %v6603_v50 = vcombine.high %v961_v44, %v965_v45  ;;  %v6731_v51 = vcombine.high %v1089_v46, %v1093_v47  ;;  %v1045_v37 = vld [vmem:[#allocation11 + $0x660] sm:$0xff] }
 0x161   :  { %v1037_v45 = vld [vmem:[#allocation11 + $0x620] sm:$0xff] }
 0x162   :  { %759 = vmatprep.mubr.bf16.mxu1 %v320_v52  ;;  %802 = vmatprep.mubr.bf16.mxu0 %v320_v52  ;;  %v953_v52 = vld [vmem:[#allocation11 + $0x380] sm:$0xff] }
 0x163   :  { %760 = vmatmul.mubr.bf16.vlgmr.msra.gmra.mxu1 %v319_v58  ;;  %803 = vmatmul.mubr.bf16.vlgmr.msra.gmra.mxu0 %v319_v58  ;;  %v6595_v58 = vcombine.high %v953_v52, %v957_v53  ;;  %v6594_v0 = vcombine.low %v953_v52, %v957_v53  ;;  %v8416_v53 = vld [vmem:[#allocation11 + $0x5e8] sm:$0xff] }
 0x164   :  { %2420 = vmatpush1.bf16.msra.mxu1 %v6538_v21  ;;  %2463 = vmatpush1.bf16.msra.mxu0 %v6666_v24  ;;  %v6506_v21 = vcombine.low %v865_v9, %v869_v10  ;;  %v6627_v24 = vcombine.high %v985_v19, %v989_v20 }
 0x165   :  { %2421 = vmatprep.subr.bf16.mxu1 %v6531_v59  ;;  %2464 = vmatprep.subr.bf16.mxu0 %v6659_v60  ;;  %v6723_v59 = vcombine.high %v1081_v54, %v1085_v55  ;;  %v945_v60 = vld [vmem:[#allocation11 + $0x340] sm:$0xff] }
 0x168   :  { %2422 = vmatpush1.bf16.msra.mxu1 %v6530_v61  ;;  %2465 = vmatpush1.bf16.msra.mxu0 %v6658_v62  ;;  %v949_v61 = vld [vmem:[#allocation11 + $0x360] sm:$0xff] }
 0x169   :  { %2423 = vmatprep.subr.bf16.mxu1 %v6523_v3  ;;  %2466 = vmatprep.subr.bf16.mxu0 %v6651_v4  ;;  %v1073_v62 = vld [vmem:[#allocation11 + $0x740] sm:$0xff]  ;;  %v6587_v2 = vcombine.high %v945_v60, %v949_v61 }
 0x16a   :  { %v6715_v3 = vcombine.high %v1073_v62, %v1077_v63  ;;  %v937_v4 = vld [vmem:[#allocation11 + $0x300] sm:$0xff]  ;;  %v6714_v9 = vcombine.low %v1073_v62, %v1077_v63 }
 0x16c   :  { %2424 = vmatpush1.bf16.msra.mxu1 %v6522_v5  ;;  %2467 = vmatpush1.bf16.msra.mxu0 %v6650_v6  ;;  %v941_v5 = vld [vmem:[#allocation11 + $0x320] sm:$0xff] }
 0x16d   :  { %2425 = vmatprep.subr.bf16.mxu1 %v6515_v7  ;;  %2468 = vmatprep.subr.bf16.mxu0 %v6643_v8  ;;  %v1065_v6 = vld [vmem:[#allocation11 + $0x700] sm:$0xff]  ;;  %v6586_v8 = vcombine.low %v945_v60, %v949_v61  ;;  %v6579_v10 = vcombine.high %v937_v4, %v941_v5 }
 0x16e   :  { %v1069_v7 = vld [vmem:[#allocation11 + $0x720] sm:$0xff] }
 0x16f   :  { %v6707_v11 = vcombine.high %v1065_v6, %v1069_v7  ;;  %v6706_v17 = vcombine.low %v1065_v6, %v1069_v7 }
 0x170   :  { %2426 = vmatpush1.bf16.msra.mxu1 %v6514_v13  ;;  %2469 = vmatpush1.bf16.msra.mxu0 %v6642_v14  ;;  %v933_v13 = vld [vmem:[#allocation11 + $0x2e0] sm:$0xff] }
 0x171   :  { %2427 = vmatprep.subr.bf16.mxu1 %v6507_v15  ;;  %2470 = vmatprep.subr.bf16.mxu0 %v6635_v16  ;;  %v1057_v14 = vld [vmem:[#allocation11 + $0x6c0] sm:$0xff]  ;;  %v6578_v16 = vcombine.low %v937_v4, %v941_v5  ;;  %v6571_v18 = vcombine.high %v929_v12, %v933_v13  ;;  %v6570_v20 = vcombine.low %v929_v12, %v933_v13 }
 0x172   :  { %v1061_v15 = vld [vmem:[#allocation11 + $0x6e0] sm:$0xff] }
 0x173   :  { %v6699_v19 = vcombine.high %v1057_v14, %v1061_v15 }
 0x174   :  { %2428 = vmatpush1.bf16.msra.mxu1 %v6506_v21  ;;  %2471 = vmatpush1.bf16.msra.mxu0 %v6634_v22  ;;  %v6698_v21 = vcombine.low %v1057_v14, %v1061_v15  ;;  %v921_v22 = vld [vmem:[#allocation11 + $0x280] sm:$0xff] }
 0x175   :  { %2429 = vmatprep.subr.bf16.mxu1 %v6499_v23  ;;  %2472 = vmatprep.subr.bf16.mxu0 %v6627_v24  ;;  %v925_v23 = vld [vmem:[#allocation11 + $0x2a0] sm:$0xff] }
 0x176   :  { %v1049_v24 = vld [vmem:[#allocation11 + $0x680] sm:$0xff]  ;;  %v6563_v25 = vcombine.high %v921_v22, %v925_v23  ;;  %v6562_v28 = vcombine.low %v921_v22, %v925_v23 }
 0x177   :  { %v6690_v31 = vcombine.low %v1049_v24, %v1053_v26 }
 0x178   :  { %2430 = vmatpush1.bf16.msra.mxu1 %v6498_v32  ;;  %2473 = vmatpush1.bf16.msra.mxu0 %v6626_v33  ;;  %v6691_v32 = vcombine.high %v1049_v24, %v1053_v26  ;;  %v913_v33 = vld [vmem:[#allocation11 + $0x240] sm:$0xff] }
 0x179   :  { %2431 = vmatprep.subr.bf16.mxu1 %v6491_v34  ;;  %2474 = vmatprep.subr.bf16.mxu0 %v6619_v35  ;;  %v917_v34 = vld [vmem:[#allocation11 + $0x260] sm:$0xff] }
 0x17a   :  { %v1041_v35 = vld [vmem:[#allocation11 + $0x640] sm:$0xff]  ;;  %v6555_v36 = vcombine.high %v913_v33, %v917_v34  ;;  %v6554_v38 = vcombine.low %v913_v33, %v917_v34 }
 0x17b   :  { %v6682_v39 = vcombine.low %v1041_v35, %v1045_v37 }
 0x17c   :  { %2432 = vmatpush1.bf16.msra.mxu1 %v6490_v40  ;;  %2475 = vmatpush1.bf16.msra.mxu0 %v6618_v41  ;;  %v6683_v40 = vcombine.high %v1041_v35, %v1045_v37  ;;  %v905_v41 = vld [vmem:[#allocation11 + $0x200] sm:$0xff]  ;;  %v1018_v37 = vld [vmem:[#allocation11 + $0x588] sm:$0xff] }
 0x17d   :  { %2433 = vmatprep.subr.bf16.mxu1 %v6483_v42  ;;  %2476 = vmatprep.subr.bf16.mxu0 %v6611_v43  ;;  %v909_v42 = vld [vmem:[#allocation11 + $0x220] sm:$0xff] }
 0x17e   :  { %v1033_v43 = vld [vmem:[#allocation11 + $0x600] sm:$0xff]  ;;  %v6547_v44 = vcombine.high %v905_v41, %v909_v42  ;;  %v6546_v46 = vcombine.low %v905_v41, %v909_v42 }
 0x17f   :  { %v6674_v47 = vcombine.low %v1033_v43, %v1037_v45 }
 0x180   :  { %2434 = vmatpush1.bf16.msra.mxu1 %v6482_v48  ;;  %2477 = vmatpush1.bf16.msra.mxu0 %v6610_v49  ;;  %v6675_v48 = vcombine.high %v1033_v43, %v1037_v45  ;;  %v8408_v49 = vld [vmem:[#allocation11 + $0x1c8] sm:$0xff] }
 0x181   :  { %2435 = vmatprep.subr.bf16.mxu1 %v6603_v50  ;;  %2478 = vmatprep.subr.bf16.mxu0 %v6731_v51  ;;  %v8410_v50 = vld [vmem:[#allocation11 + $0x1e8] sm:$0xff] }
 0x182   :  { %v8412_v51 = vld [vmem:[#allocation11 + $0x5c8] sm:$0xff]  ;;  %v6541_v52 = vcombine.high %v8408_v49, %v8410_v50  ;;  %v6540_v54 = vcombine.low %v8408_v49, %v8410_v50 }
 0x183   :  { %v6668_v55 = vcombine.low %v8412_v51, %v8416_v53  ;;  %v886_v45 = vld [vmem:[#allocation11 + $0x168] sm:$0xff] }
 0x184   :  { %2436 = vmatpush2.bf16.msra.mxu1 %v6602_v56  ;;  %2479 = vmatpush2.bf16.msra.mxu0 %v6730_v57  ;;  %v6669_v56 = vcombine.high %v8412_v51, %v8416_v53  ;;  %v385_v57 = vld [vmem:[#allocation10] sm:$0xf] }
 0x185   :  { %2437 = vmatprep.subr.bf16.mxu1 %v6595_v58  ;;  %2480 = vmatprep.subr.bf16.mxu0 %v6723_v59  ;;  %v8425_v58 = vsub.s32 3, %v8398_v27  ;;  %v8428_v59 = vsub.s32 2, %v8398_v27  ;;  %v390_v60 = vrot.slane %v385_v57, %v8401_v29  ;;  %v394_v63 = vrot.slane %v385_v57, %v8404_v30 }
 0x188   :  { %2438 = vmatpush2.bf16.msra.mxu1 %v6594_v0  ;;  %2481 = vmatpush2.bf16.msra.mxu0 %v6722_v1  ;;  %v402_v0 = vrot.slane %v385_v57, %v8425_v58  ;;  %v398_v1 = vrot.slane %v385_v57, %v8428_v59 }
 0x189   :  { %2439 = vmatprep.subr.bf16.mxu1 %v6587_v2  ;;  %2482 = vmatprep.subr.bf16.mxu0 %v6715_v3 }
 0x18c   :  { %2440 = vmatpush2.bf16.msra.mxu1 %v6586_v8  ;;  %2483 = vmatpush2.bf16.msra.mxu0 %v6714_v9 }
 0x18d   :  { %2441 = vmatprep.subr.bf16.mxu1 %v6579_v10  ;;  %2484 = vmatprep.subr.bf16.mxu0 %v6707_v11 }
 0x190   :  { %2442 = vmatpush2.bf16.msra.mxu1 %v6578_v16  ;;  %2485 = vmatpush2.bf16.msra.mxu0 %v6706_v17 }
 0x191   :  { %2443 = vmatprep.subr.bf16.mxu1 %v6571_v18  ;;  %2486 = vmatprep.subr.bf16.mxu0 %v6699_v19 }
 0x194   :  { %2444 = vmatpush2.bf16.msra.mxu1 %v6570_v20  ;;  %2487 = vmatpush2.bf16.msra.mxu0 %v6698_v21 }
 0x195   :  { %2445 = vmatprep.subr.bf16.mxu1 %v6563_v25  ;;  %2488 = vmatprep.subr.bf16.mxu0 %v6691_v32  ;;  %v894_v32 = vld [vmem:[#allocation11 + $0x1a8] sm:$0xff] }
 0x198   :  { %2446 = vmatpush2.bf16.msra.mxu1 %v6562_v28  ;;  %2489 = vmatpush2.bf16.msra.mxu0 %v6690_v31  ;;  %v890_v31 = vld [vmem:[#allocation11 + $0x188] sm:$0xff] }
 0x199   :  { %2447 = vmatprep.subr.bf16.mxu1 %v6555_v36  ;;  %2490 = vmatprep.subr.bf16.mxu0 %v6683_v40  ;;  %v6533_v43 = vcombine.high %v890_v31, %v894_v32 }
 0x19c   :  { %2448 = vmatpush2.bf16.msra.mxu1 %v6554_v38  ;;  %2491 = vmatpush2.bf16.msra.mxu0 %v6682_v39  ;;  %v1022_v38 = vld [vmem:[#allocation11 + $0x5a8] sm:$0xff] }
 0x19d   :  { %2449 = vmatprep.subr.bf16.mxu1 %v6547_v44  ;;  %2492 = vmatprep.subr.bf16.mxu0 %v6675_v48  ;;  %v882_v44 = vld [vmem:[#allocation11 + $0x148] sm:$0xff] }
 0x19e   :  { %v1014_v48 = vld [vmem:[#allocation11 + $0x568] sm:$0xff]  ;;  %v6525_v57 = vcombine.high %v882_v44, %v886_v45  ;;  %v6524_v49 = vcombine.low %v882_v44, %v886_v45 }
 0x1a0   :  { %2450 = vmatpush2.bf16.msra.mxu1 %v6546_v46  ;;  %2493 = vmatpush2.bf16.msra.mxu0 %v6674_v47  ;;  %v6661_v46 = vcombine.high %v1018_v37, %v1022_v38  ;;  %v1010_v47 = vld [vmem:[#allocation11 + $0x548] sm:$0xff] }
 0x1a1   :  { %2505 = vmatprep.subr.bf16.mxu1 %v6541_v52  ;;  %2548 = vmatprep.subr.bf16.mxu0 %v6669_v56  ;;  %v6532_v52 = vcombine.low %v890_v31, %v894_v32  ;;  %v6660_v56 = vcombine.low %v1018_v37, %v1022_v38  ;;  %v6652_v50 = vcombine.low %v1010_v47, %v1014_v48  ;;  %v1090_v37 = vld [vmem:[#allocation11 + $0x7c8] sm:$0xff] }
 0x1a2   :  { %v1094_v38 = vld [vmem:[#allocation11 + $0x7e8] sm:$0xff] }
 0x1a3   :  { %v6733_v45 = vcombine.high %v1090_v37, %v1094_v38 }
 0x223   :  { %v761_v61 = vpop.f32.mrf.mxu1  ;;  %v804_v62 = vpop.f32.mrf.mxu0 }
 0x224   :  { %v762_v4 = vadd.f32 %v761_v61, %v390_v60  ;;  %v805_v11 = vadd.f32 %v804_v62, %v398_v1  ;;  %v874_v61 = vld [vmem:[#allocation11 + $0x108] sm:$0xff] }
 0x225   :  { %v763_v2 = vpop.f32.mrf.mxu1  ;;  %v806_v3 = vpop.f32.mrf.mxu0  ;;  %v878_v62 = vld [vmem:[#allocation11 + $0x128] sm:$0xff] }
 0x226   :  { %v764_v5 = vadd.f32 %v763_v2, %v394_v63  ;;  %v807_v8 = vadd.f32 %v806_v3, %v402_v0  ;;  %vm813_vm4 = vcmp.gt.f32.partialorder %v762_v4, 0.0  ;;  %v821_v19 = vmul.f32 0.2, %v762_v4  ;;  %v998_v2 = vld [vmem:[#allocation11 + $0x4e8] sm:$0xff] }
 0x227   :  { %v765_v6 = vpop.f32.mrf.mxu1  ;;  %v808_v7 = vpop.f32.mrf.mxu0  ;;  %v823_v21 = vmul.f32 0.2, %v805_v11  ;;  %vm815_vm10 = vcmp.gt.f32.partialorder %v805_v11, 0.0  ;;  %v6517_v51 = vcombine.high %v874_v61, %v878_v62  ;;  %v6516_v3 = vcombine.low %v874_v61, %v878_v62  ;;  %v946_v62 = vld [vmem:[#allocation11 + $0x348] sm:$0xff] }
 0x228   :  { %v766_v9 = vadd.f32 %v765_v6, %v390_v60  ;;  %v809_v10 = vadd.f32 %v808_v7, %v398_v1  ;;  %v822_v14 = vmul.f32 0.2, %v764_v5  ;;  %vm814_vm6 = vcmp.gt.f32.partialorder %v764_v5, 0.0  ;;  %v994_v1 = vld [vmem:[#allocation11 + $0x4c8] sm:$0xff] }
 0x229   :  { %v767_v12 = vpop.f32.mrf.mxu1  ;;  %v810_v13 = vpop.f32.mrf.mxu0  ;;  %v824_v20 = vmul.f32 0.2, %v807_v8  ;;  %vm816_vm8 = vcmp.gt.f32.partialorder %v807_v8, 0.0  ;;  %v829_v33 = vsel %vm813_vm4, %v762_v4, %v821_v19  ;;  %v831_v39 = vsel %vm815_vm10, %v805_v11, %v823_v21  ;;  %v858_v7 = vld [vmem:[#allocation11 + $0x88] sm:$0xff] }
 0x22a   :  { %v825_v15 = vmul.f32 0.2, %v766_v9  ;;  %vm817_vm5 = vcmp.gt.f32.partialorder %v766_v9, 0.0  ;;  %v827_v16 = vmul.f32 0.2, %v809_v10  ;;  %v768_v17 = vadd.f32 %v767_v12, %v394_v63  ;;  %v1002_v63 = vld [vmem:[#allocation11 + $0x508] sm:$0xff] }
 0x22b   :  { %v811_v18 = vadd.f32 %v810_v13, %v402_v0  ;;  %vm819_vm7 = vcmp.gt.f32.partialorder %v809_v10, 0.0  ;;  %v830_v25 = vsel %vm814_vm6, %v764_v5, %v822_v14  ;;  %v832_v34 = vsel %vm816_vm8, %v807_v8, %v824_v20  ;;  %v1006_v0 = vld [vmem:[#allocation11 + $0x528] sm:$0xff] }
 0x22c   :  { %vm818_vm9 = vcmp.gt.f32.partialorder %v768_v17, 0.0  ;;  %v826_v22 = vmul.f32 0.2, %v768_v17  ;;  %v833_v23 = vsel %vm817_vm5, %v766_v9, %v825_v15  ;;  %v835_v26 = vsel %vm819_vm7, %v809_v10, %v827_v16  ;;  %v862_v8 = vld [vmem:[#allocation11 + $0xa8] sm:$0xff] }
 0x22d   :  { %vm820_vm11 = vcmp.gt.f32.partialorder %v811_v18, 0.0  ;;  %v828_v24 = vmul.f32 0.2, %v811_v18  ;;  %v8437_v40 = vpack.c.bf16 %v833_v23, %v829_v33  ;;  %v8441_v42 = vpack.c.bf16 %v835_v26, %v831_v39  ;;  %v986_v9 = vld [vmem:[#allocation11 + $0x488] sm:$0xff] }
 0x22e   :  { %v834_v28 = vsel %vm818_vm9, %v768_v17, %v826_v22  ;;  %v6653_v60 = vcombine.high %v1010_v47, %v1014_v48  ;;  %v6645_v53 = vcombine.high %v1002_v63, %v1006_v0  ;;  %v6644_v4 = vcombine.low %v1002_v63, %v1006_v0  ;;  %v990_v10 = vld [vmem:[#allocation11 + $0x4a8] sm:$0xff] }
 0x22f   :  { %v8435_v35 = vpack.c.bf16 %v834_v28, %v830_v25  ;;  %v836_v36 = vsel %vm820_vm11, %v811_v18, %v828_v24  ;;  %v6637_v6 = vcombine.high %v994_v1, %v998_v2  ;;  %v6636_v12 = vcombine.low %v994_v1, %v998_v2  ;;  %v850_v15 = vld [vmem:[#allocation11 + $0x48] sm:$0xff] }
 0x230   :  { %v8439_v41 = vpack.c.bf16 %v836_v36, %v832_v34  ;;  %v6501_v13 = vcombine.high %v858_v7, %v862_v8  ;;  %v6629_v14 = vcombine.high %v986_v9, %v990_v10  ;;  %v854_v16 = vld [vmem:[#allocation11 + $0x68] sm:$0xff]  ;;  %v6500_v19 = vcombine.low %v858_v7, %v862_v8 }
 0x231   :  { %2451 = vmatprep.mubr.bf16.mxu1 %v8435_v35  ;;  %v978_v17 = vld [vmem:[#allocation11 + $0x448] sm:$0xff]  ;;  %v6628_v20 = vcombine.low %v986_v9, %v990_v10  ;;  %v6493_v21 = vcombine.high %v850_v15, %v854_v16  ;;  %v6492_v28 = vcombine.low %v850_v15, %v854_v16 }
 0x232   :  { %2494 = vmatprep.mubr.bf16.mxu0 %v8439_v41  ;;  %2452 = vmatmul.mubr.bf16.vlgmr.msra.gmra.mxu1 %v8437_v40  ;;  %v982_v18 = vld [vmem:[#allocation11 + $0x468] sm:$0xff] }
 0x233   :  { %2495 = vmatmul.mubr.bf16.vlgmr.msra.gmra.mxu0 %v8441_v42  ;;  %2506 = vmatpush1.bf16.msra.mxu1 %v6540_v54  ;;  %v866_v54 = vld [vmem:[#allocation11 + $0xc8] sm:$0xff]  ;;  %v6621_v22 = vcombine.high %v978_v17, %v982_v18  ;;  %v6620_v31 = vcombine.low %v978_v17, %v982_v18 }
 0x234   :  { %2549 = vmatpush1.bf16.msra.mxu0 %v6668_v55  ;;  %2537 = vmatprep.mubr.bf16.mxu1 %v8435_v35  ;;  %v870_v55 = vld [vmem:[#allocation11 + $0xe8] sm:$0xff] }
 0x235   :  { %2580 = vmatprep.mubr.bf16.mxu0 %v8439_v41  ;;  %2507 = vmatprep.subr.bf16.mxu1 %v6533_v43  ;;  %v6509_v5 = vcombine.high %v866_v54, %v870_v55  ;;  %v6508_v11 = vcombine.low %v866_v54, %v870_v55  ;;  %v842_v23 = vld [vmem:[#allocation11 + $0x8] sm:$0xff] }
 0x236   :  { %2550 = vmatprep.subr.bf16.mxu0 %v6661_v46  ;;  %v846_v24 = vld [vmem:[#allocation11 + $0x28] sm:$0xff] }
 0x237   :  { %2508 = vmatpush1.bf16.msra.mxu1 %v6532_v52  ;;  %v970_v25 = vld [vmem:[#allocation11 + $0x408] sm:$0xff]  ;;  %v6485_v32 = vcombine.high %v842_v23, %v846_v24  ;;  %v6484_v39 = vcombine.low %v842_v23, %v846_v24 }
 0x238   :  { %2551 = vmatpush1.bf16.msra.mxu0 %v6660_v56  ;;  %2509 = vmatprep.subr.bf16.mxu1 %v6525_v57  ;;  %v974_v26 = vld [vmem:[#allocation11 + $0x428] sm:$0xff]  ;;  %v6732_v57 = vcombine.low %v1090_v37, %v1094_v38 }
 0x239   :  { %2552 = vmatprep.subr.bf16.mxu0 %v6653_v60  ;;  %v6613_v33 = vcombine.high %v970_v25, %v974_v26  ;;  %v962_v34 = vld [vmem:[#allocation11 + $0x3c8] sm:$0xff]  ;;  %v6612_v43 = vcombine.low %v970_v25, %v974_v26 }
 0x23a   :  { %v966_v36 = vld [vmem:[#allocation11 + $0x3e8] sm:$0xff] }
 0x23b   :  { %2510 = vmatpush1.bf16.msra.mxu1 %v6524_v49  ;;  %v6605_v44 = vcombine.high %v962_v34, %v966_v36  ;;  %v954_v46 = vld [vmem:[#allocation11 + $0x388] sm:$0xff]  ;;  %v6604_v56 = vcombine.low %v962_v34, %v966_v36 }
 0x23c   :  { %2553 = vmatpush1.bf16.msra.mxu0 %v6652_v50  ;;  %2511 = vmatprep.subr.bf16.mxu1 %v6517_v51  ;;  %v958_v47 = vld [vmem:[#allocation11 + $0x3a8] sm:$0xff] }
 0x23d   :  { %2554 = vmatprep.subr.bf16.mxu0 %v6645_v53  ;;  %v1082_v48 = vld [vmem:[#allocation11 + $0x788] sm:$0xff]  ;;  %v6597_v60 = vcombine.high %v954_v46, %v958_v47  ;;  %v6596_v50 = vcombine.low %v954_v46, %v958_v47  ;;  %v899_v47 = vld [vmem:[#allocation11 + $0x1d0] sm:$0xff] }
 0x23e   :  { %v1086_v52 = vld [vmem:[#allocation11 + $0x7a8] sm:$0xff] }
 0x23f   :  { %2512 = vmatpush1.bf16.msra.mxu1 %v6516_v3  ;;  %v6725_v61 = vcombine.high %v1082_v48, %v1086_v52  ;;  %v950_v63 = vld [vmem:[#allocation11 + $0x368] sm:$0xff]  ;;  %v6724_v51 = vcombine.low %v1082_v48, %v1086_v52  ;;  %v903_v48 = vld [vmem:[#allocation11 + $0x1f0] sm:$0xff] }
 0x240   :  { %2555 = vmatpush1.bf16.msra.mxu0 %v6644_v4  ;;  %2513 = vmatprep.subr.bf16.mxu1 %v6509_v5  ;;  %v1074_v0 = vld [vmem:[#allocation11 + $0x748] sm:$0xff]  ;;  %v6589_v53 = vcombine.high %v946_v62, %v950_v63  ;;  %v6588_v4 = vcombine.low %v946_v62, %v950_v63  ;;  %v1027_v52 = vld [vmem:[#allocation11 + $0x5d0] sm:$0xff] }
 0x241   :  { %2556 = vmatprep.subr.bf16.mxu0 %v6637_v6  ;;  %v1078_v49 = vld [vmem:[#allocation11 + $0x768] sm:$0xff]  ;;  %v891_v63 = vld [vmem:[#allocation11 + $0x190] sm:$0xff] }
 0x242   :  { %v6717_v54 = vcombine.high %v1074_v0, %v1078_v49  ;;  %v938_v55 = vld [vmem:[#allocation11 + $0x308] sm:$0xff]  ;;  %v6716_v5 = vcombine.low %v1074_v0, %v1078_v49  ;;  %v895_v0 = vld [vmem:[#allocation11 + $0x1b0] sm:$0xff]  ;;  %v6542_v49 = vcombine.low %v899_v47, %v903_v48 }
 0x243   :  { %2514 = vmatpush1.bf16.msra.mxu1 %v6508_v11  ;;  %v942_v1 = vld [vmem:[#allocation11 + $0x328] sm:$0xff] }
 0x244   :  { %2557 = vmatpush1.bf16.msra.mxu0 %v6636_v12  ;;  %2515 = vmatprep.subr.bf16.mxu1 %v6501_v13  ;;  %v1066_v2 = vld [vmem:[#allocation11 + $0x708] sm:$0xff]  ;;  %v6581_v6 = vcombine.high %v938_v55, %v942_v1  ;;  %v6580_v12 = vcombine.low %v938_v55, %v942_v1  ;;  %v883_v55 = vld [vmem:[#allocation11 + $0x150] sm:$0xff] }
 0x245   :  { %2558 = vmatprep.subr.bf16.mxu0 %v6629_v14  ;;  %v1070_v3 = vld [vmem:[#allocation11 + $0x728] sm:$0xff]  ;;  %v887_v1 = vld [vmem:[#allocation11 + $0x170] sm:$0xff] }
 0x246   :  { %v6709_v7 = vcombine.high %v1066_v2, %v1070_v3  ;;  %v930_v8 = vld [vmem:[#allocation11 + $0x2c8] sm:$0xff]  ;;  %v6708_v13 = vcombine.low %v1066_v2, %v1070_v3  ;;  %v1011_v3 = vld [vmem:[#allocation11 + $0x550] sm:$0xff] }
 0x247   :  { %2516 = vmatpush1.bf16.msra.mxu1 %v6500_v19  ;;  %v934_v9 = vld [vmem:[#allocation11 + $0x2e8] sm:$0xff] }
 0x248   :  { %2559 = vmatpush1.bf16.msra.mxu0 %v6628_v20  ;;  %2517 = vmatprep.subr.bf16.mxu1 %v6493_v21  ;;  %v1058_v10 = vld [vmem:[#allocation11 + $0x6c8] sm:$0xff]  ;;  %v6573_v14 = vcombine.high %v930_v8, %v934_v9  ;;  %v6572_v20 = vcombine.low %v930_v8, %v934_v9  ;;  %v875_v9 = vld [vmem:[#allocation11 + $0x110] sm:$0xff] }
 0x249   :  { %2560 = vmatprep.subr.bf16.mxu0 %v6621_v22  ;;  %v1062_v11 = vld [vmem:[#allocation11 + $0x6e8] sm:$0xff] }
 0x24a   :  { %v6701_v15 = vcombine.high %v1058_v10, %v1062_v11  ;;  %v922_v16 = vld [vmem:[#allocation11 + $0x288] sm:$0xff]  ;;  %v6700_v21 = vcombine.low %v1058_v10, %v1062_v11  ;;  %v879_v10 = vld [vmem:[#allocation11 + $0x130] sm:$0xff] }
 0x24b   :  { %2518 = vmatpush1.bf16.msra.mxu1 %v6492_v28  ;;  %v926_v17 = vld [vmem:[#allocation11 + $0x2a8] sm:$0xff]  ;;  %v1003_v11 = vld [vmem:[#allocation11 + $0x510] sm:$0xff] }
 0x24c   :  { %2561 = vmatpush1.bf16.msra.mxu0 %v6620_v31  ;;  %2519 = vmatprep.subr.bf16.mxu1 %v6485_v32  ;;  %v1050_v18 = vld [vmem:[#allocation11 + $0x688] sm:$0xff]  ;;  %v6565_v22 = vcombine.high %v922_v16, %v926_v17  ;;  %v6564_v31 = vcombine.low %v922_v16, %v926_v17  ;;  %v867_v17 = vld [vmem:[#allocation11 + $0xd0] sm:$0xff] }
 0x24d   :  { %2562 = vmatprep.subr.bf16.mxu0 %v6613_v33  ;;  %v1054_v19 = vld [vmem:[#allocation11 + $0x6a8] sm:$0xff] }
 0x24e   :  { %v6693_v23 = vcombine.high %v1050_v18, %v1054_v19  ;;  %v914_v24 = vld [vmem:[#allocation11 + $0x248] sm:$0xff]  ;;  %v6692_v32 = vcombine.low %v1050_v18, %v1054_v19  ;;  %v871_v18 = vld [vmem:[#allocation11 + $0xf0] sm:$0xff] }
 0x24f   :  { %2520 = vmatpush1.bf16.msra.mxu1 %v6484_v39  ;;  %v918_v25 = vld [vmem:[#allocation11 + $0x268] sm:$0xff]  ;;  %v995_v19 = vld [vmem:[#allocation11 + $0x4d0] sm:$0xff] }
 0x250   :  { %2563 = vmatpush1.bf16.msra.mxu0 %v6612_v43  ;;  %2521 = vmatprep.subr.bf16.mxu1 %v6605_v44  ;;  %v1042_v26 = vld [vmem:[#allocation11 + $0x648] sm:$0xff]  ;;  %v6557_v33 = vcombine.high %v914_v24, %v918_v25  ;;  %v6556_v43 = vcombine.low %v914_v24, %v918_v25  ;;  %v859_v25 = vld [vmem:[#allocation11 + $0x90] sm:$0xff] }
 0x251   :  { %2564 = vmatprep.subr.bf16.mxu0 %v6733_v45  ;;  %v1046_v28 = vld [vmem:[#allocation11 + $0x668] sm:$0xff] }
 0x252   :  { %v6685_v34 = vcombine.high %v1042_v26, %v1046_v28  ;;  %v906_v36 = vld [vmem:[#allocation11 + $0x208] sm:$0xff]  ;;  %v6684_v44 = vcombine.low %v1042_v26, %v1046_v28  ;;  %v863_v26 = vld [vmem:[#allocation11 + $0xb0] sm:$0xff] }
 0x253   :  { %2522 = vmatpush2.bf16.msra.mxu1 %v6604_v56  ;;  %v910_v37 = vld [vmem:[#allocation11 + $0x228] sm:$0xff]  ;;  %v1031_v56 = vld [vmem:[#allocation11 + $0x5f0] sm:$0xff] }
 0x254   :  { %2565 = vmatpush2.bf16.msra.mxu0 %v6732_v57  ;;  %2523 = vmatprep.subr.bf16.mxu1 %v6597_v60  ;;  %v1034_v38 = vld [vmem:[#allocation11 + $0x608] sm:$0xff]  ;;  %v6549_v45 = vcombine.high %v906_v36, %v910_v37  ;;  %v6548_v57 = vcombine.low %v906_v36, %v910_v37  ;;  %v6671_v62 = vcombine.high %v1027_v52, %v1031_v56  ;;  %v987_v28 = vld [vmem:[#allocation11 + $0x490] sm:$0xff] }
 0x255   :  { %2566 = vmatprep.subr.bf16.mxu0 %v6725_v61  ;;  %v1038_v39 = vld [vmem:[#allocation11 + $0x628] sm:$0xff]  ;;  %v6543_v61 = vcombine.high %v899_v47, %v903_v48  ;;  %v851_v37 = vld [vmem:[#allocation11 + $0x50] sm:$0xff] }
 0x256   :  { %v6677_v46 = vcombine.high %v1034_v38, %v1038_v39  ;;  %v6676_v60 = vcombine.low %v1034_v38, %v1038_v39  ;;  %v855_v38 = vld [vmem:[#allocation11 + $0x70] sm:$0xff] }
 0x257   :  { %2524 = vmatpush2.bf16.msra.mxu1 %v6596_v50  ;;  %v1019_v50 = vld [vmem:[#allocation11 + $0x590] sm:$0xff] }
 0x258   :  { %2567 = vmatpush2.bf16.msra.mxu0 %v6724_v51  ;;  %2525 = vmatprep.subr.bf16.mxu1 %v6589_v53  ;;  %v1023_v51 = vld [vmem:[#allocation11 + $0x5b0] sm:$0xff]  ;;  %v6670_v53 = vcombine.low %v1027_v52, %v1031_v56 }
 0x259   :  { %2568 = vmatprep.subr.bf16.mxu0 %v6717_v54  ;;  %v6535_v54 = vcombine.high %v891_v63, %v895_v0  ;;  %v6663_v2 = vcombine.high %v1019_v50, %v1023_v51  ;;  %v979_v39 = vld [vmem:[#allocation11 + $0x450] sm:$0xff] }
 0x25a   :  { %v843_v48 = vld [vmem:[#allocation11 + $0x10] sm:$0xff] }
 0x25b   :  { %2526 = vmatpush2.bf16.msra.mxu1 %v6588_v4  ;;  %v1015_v4 = vld [vmem:[#allocation11 + $0x570] sm:$0xff] }
 0x25c   :  { %2569 = vmatpush2.bf16.msra.mxu0 %v6716_v5  ;;  %2527 = vmatprep.subr.bf16.mxu1 %v6581_v6  ;;  %v6534_v5 = vcombine.low %v891_v63, %v895_v0  ;;  %v6662_v6 = vcombine.low %v1019_v50, %v1023_v51  ;;  %v6655_v8 = vcombine.high %v1011_v3, %v1015_v4  ;;  %v847_v52 = vld [vmem:[#allocation11 + $0x30] sm:$0xff] }
 0x25d   :  { %2570 = vmatprep.subr.bf16.mxu0 %v6709_v7  ;;  %v6527_v7 = vcombine.high %v883_v55, %v887_v1  ;;  %v971_v56 = vld [vmem:[#allocation11 + $0x410] sm:$0xff] }
 0x25e   :  { %v963_v0 = vld [vmem:[#allocation11 + $0x3d0] sm:$0xff] }
 0x25f   :  { %2528 = vmatpush2.bf16.msra.mxu1 %v6580_v12  ;;  %v1007_v12 = vld [vmem:[#allocation11 + $0x530] sm:$0xff] }
 0x260   :  { %2571 = vmatpush2.bf16.msra.mxu0 %v6708_v13  ;;  %2529 = vmatprep.subr.bf16.mxu1 %v6573_v14  ;;  %v6526_v13 = vcombine.low %v883_v55, %v887_v1  ;;  %v6654_v14 = vcombine.low %v1011_v3, %v1015_v4  ;;  %v6647_v16 = vcombine.high %v1003_v11, %v1007_v12  ;;  %v1091_v50 = vld [vmem:[#allocation11 + $0x7d0] sm:$0xff] }
 0x261   :  { %2572 = vmatprep.subr.bf16.mxu0 %v6701_v15  ;;  %v6519_v15 = vcombine.high %v875_v9, %v879_v10  ;;  %v1095_v51 = vld [vmem:[#allocation11 + $0x7f0] sm:$0xff] }
 0x262   :  { %v6735_v1 = vcombine.high %v1091_v50, %v1095_v51  ;;  %v959_v3 = vld [vmem:[#allocation11 + $0x3b0] sm:$0xff] }
 0x263   :  { %2530 = vmatpush2.bf16.msra.mxu1 %v6572_v20  ;;  %v999_v20 = vld [vmem:[#allocation11 + $0x4f0] sm:$0xff] }
 0x264   :  { %2573 = vmatpush2.bf16.msra.mxu0 %v6700_v21  ;;  %2531 = vmatprep.subr.bf16.mxu1 %v6565_v22  ;;  %v6518_v21 = vcombine.low %v875_v9, %v879_v10  ;;  %v6646_v22 = vcombine.low %v1003_v11, %v1007_v12  ;;  %v6639_v24 = vcombine.high %v995_v19, %v999_v20  ;;  %v1083_v4 = vld [vmem:[#allocation11 + $0x790] sm:$0xff] }
 0x265   :  { %2574 = vmatprep.subr.bf16.mxu0 %v6693_v23  ;;  %v6511_v23 = vcombine.high %v867_v17, %v871_v18  ;;  %v947_v10 = vld [vmem:[#allocation11 + $0x350] sm:$0xff] }
 0x266   :  { %v951_v11 = vld [vmem:[#allocation11 + $0x370] sm:$0xff] }
 0x267   :  { %2532 = vmatpush2.bf16.msra.mxu1 %v6564_v31  ;;  %v991_v31 = vld [vmem:[#allocation11 + $0x4b0] sm:$0xff] }
 0x268   :  { %2575 = vmatpush2.bf16.msra.mxu0 %v6692_v32  ;;  %2533 = vmatprep.subr.bf16.mxu1 %v6557_v33  ;;  %v6510_v32 = vcombine.low %v867_v17, %v871_v18  ;;  %v6638_v33 = vcombine.low %v995_v19, %v999_v20  ;;  %v6631_v36 = vcombine.high %v987_v28, %v991_v31  ;;  %v1075_v12 = vld [vmem:[#allocation11 + $0x750] sm:$0xff] }
 0x269   :  { %2576 = vmatprep.subr.bf16.mxu0 %v6685_v34  ;;  %v6503_v34 = vcombine.high %v859_v25, %v863_v26  ;;  %v939_v18 = vld [vmem:[#allocation11 + $0x310] sm:$0xff] }
 0x26a   :  { %v943_v19 = vld [vmem:[#allocation11 + $0x330] sm:$0xff] }
 0x26b   :  { %2534 = vmatpush2.bf16.msra.mxu1 %v6556_v43  ;;  %v983_v43 = vld [vmem:[#allocation11 + $0x470] sm:$0xff] }
 0x26c   :  { %2577 = vmatpush2.bf16.msra.mxu0 %v6684_v44  ;;  %2535 = vmatprep.subr.bf16.mxu1 %v6549_v45  ;;  %v6502_v44 = vcombine.low %v859_v25, %v863_v26  ;;  %v6630_v45 = vcombine.low %v987_v28, %v991_v31  ;;  %v6623_v47 = vcombine.high %v979_v39, %v983_v43  ;;  %v1067_v20 = vld [vmem:[#allocation11 + $0x710] sm:$0xff] }
 0x26d   :  { %2578 = vmatprep.subr.bf16.mxu0 %v6677_v46  ;;  %v6495_v46 = vcombine.high %v851_v37, %v855_v38  ;;  %v931_v26 = vld [vmem:[#allocation11 + $0x2d0] sm:$0xff] }
 0x26e   :  { %v935_v28 = vld [vmem:[#allocation11 + $0x2f0] sm:$0xff] }
 0x26f   :  { %2536 = vmatpush2.bf16.msra.mxu1 %v6548_v57  ;;  %v975_v57 = vld [vmem:[#allocation11 + $0x430] sm:$0xff] }
 0x270   :  { %2579 = vmatpush2.bf16.msra.mxu0 %v6676_v60  ;;  %2591 = vmatprep.subr.bf16.mxu1 %v6543_v61  ;;  %v6494_v60 = vcombine.low %v851_v37, %v855_v38  ;;  %v6622_v61 = vcombine.low %v979_v39, %v983_v43  ;;  %v6615_v63 = vcombine.high %v971_v56, %v975_v57  ;;  %v1059_v31 = vld [vmem:[#allocation11 + $0x6d0] sm:$0xff] }
 0x271   :  { %2634 = vmatprep.subr.bf16.mxu0 %v6671_v62  ;;  %v6487_v62 = vcombine.high %v843_v48, %v847_v52  ;;  %v923_v38 = vld [vmem:[#allocation11 + $0x290] sm:$0xff] }
 0x272   :  { %2538 = vmatmul.mubr.bf16.vlgmr.msra.gmra.mxu1 %v8437_v40  ;;  %v927_v39 = vld [vmem:[#allocation11 + $0x2b0] sm:$0xff] }
 0x273   :  { %2581 = vmatmul.mubr.bf16.vlgmr.msra.gmra.mxu0 %v8441_v42  ;;  %2592 = vmatpush1.bf16.msra.mxu1 %v6542_v49  ;;  %v967_v49 = vld [vmem:[#allocation11 + $0x3f0] sm:$0xff] }
 0x274   :  { %2623 = vmatprep.mubr.bf16.mxu1 %v8435_v35  ;;  %2635 = vmatpush1.bf16.msra.mxu0 %v6670_v53  ;;  %v6486_v53 = vcombine.low %v843_v48, %v847_v52  ;;  %v6607_v55 = vcombine.high %v963_v0, %v967_v49  ;;  %v1051_v43 = vld [vmem:[#allocation11 + $0x690] sm:$0xff] }
 0x275   :  { %2666 = vmatprep.mubr.bf16.mxu0 %v8439_v41  ;;  %2593 = vmatprep.subr.bf16.mxu1 %v6535_v54  ;;  %v6614_v54 = vcombine.low %v971_v56, %v975_v57  ;;  %v915_v52 = vld [vmem:[#allocation11 + $0x250] sm:$0xff] }
 0x276   :  { %2636 = vmatprep.subr.bf16.mxu0 %v6663_v2  ;;  %v955_v2 = vld [vmem:[#allocation11 + $0x390] sm:$0xff] }
 0x277   :  { %2594 = vmatpush1.bf16.msra.mxu1 %v6534_v5  ;;  %v1087_v5 = vld [vmem:[#allocation11 + $0x7b0] sm:$0xff] }
 0x278   :  { %2637 = vmatpush1.bf16.msra.mxu0 %v6662_v6  ;;  %2595 = vmatprep.subr.bf16.mxu1 %v6527_v7  ;;  %v6606_v6 = vcombine.low %v963_v0, %v967_v49  ;;  %v6734_v7 = vcombine.low %v1091_v50, %v1095_v51  ;;  %v6727_v9 = vcombine.high %v1083_v4, %v1087_v5  ;;  %v919_v56 = vld [vmem:[#allocation11 + $0x270] sm:$0xff] }
 0x279   :  { %2638 = vmatprep.subr.bf16.mxu0 %v6655_v8  ;;  %v6599_v8 = vcombine.high %v955_v2, %v959_v3  ;;  %v1043_v57 = vld [vmem:[#allocation11 + $0x650] sm:$0xff] }
 0x27a   :  { %v907_v49 = vld [vmem:[#allocation11 + $0x210] sm:$0xff] }
 0x27b   :  { %2596 = vmatpush1.bf16.msra.mxu1 %v6526_v13  ;;  %v1079_v13 = vld [vmem:[#allocation11 + $0x770] sm:$0xff] }
 0x27c   :  { %2639 = vmatpush1.bf16.msra.mxu0 %v6654_v14  ;;  %2597 = vmatprep.subr.bf16.mxu1 %v6519_v15  ;;  %v6598_v14 = vcombine.low %v955_v2, %v959_v3  ;;  %v6726_v15 = vcombine.low %v1083_v4, %v1087_v5  ;;  %v6719_v17 = vcombine.high %v1075_v12, %v1079_v13  ;;  %v911_v50 = vld [vmem:[#allocation11 + $0x230] sm:$0xff]  ;;  %v900_v3 = vld [vmem:[#allocation11 + $0x1d8] sm:$0xff] }
 0x27d   :  { %2640 = vmatprep.subr.bf16.mxu0 %v6647_v16  ;;  %v6591_v16 = vcombine.high %v947_v10, %v951_v11  ;;  %v1035_v51 = vld [vmem:[#allocation11 + $0x610] sm:$0xff]  ;;  %v904_v4 = vld [vmem:[#allocation11 + $0x1f8] sm:$0xff] }
 0x27e   :  { %v1028_v5 = vld [vmem:[#allocation11 + $0x5d8] sm:$0xff] }
 0x27f   :  { %2598 = vmatpush1.bf16.msra.mxu1 %v6518_v21  ;;  %v1071_v21 = vld [vmem:[#allocation11 + $0x730] sm:$0xff] }
 0x280   :  { %2641 = vmatpush1.bf16.msra.mxu0 %v6646_v22  ;;  %2599 = vmatprep.subr.bf16.mxu1 %v6511_v23  ;;  %v6590_v22 = vcombine.low %v947_v10, %v951_v11  ;;  %v6718_v23 = vcombine.low %v1075_v12, %v1079_v13  ;;  %v6711_v25 = vcombine.high %v1067_v20, %v1071_v21  ;;  %v892_v11 = vld [vmem:[#allocation11 + $0x198] sm:$0xff] }
 0x281   :  { %2642 = vmatprep.subr.bf16.mxu0 %v6639_v24  ;;  %v6583_v24 = vcombine.high %v939_v18, %v943_v19  ;;  %v896_v12 = vld [vmem:[#allocation11 + $0x1b8] sm:$0xff]  ;;  %v6544_v13 = vcombine.low %v900_v3, %v904_v4 }
 0x283   :  { %2600 = vmatpush1.bf16.msra.mxu1 %v6510_v32  ;;  %v1063_v32 = vld [vmem:[#allocation11 + $0x6f0] sm:$0xff] }
 0x284   :  { %2643 = vmatpush1.bf16.msra.mxu0 %v6638_v33  ;;  %2601 = vmatprep.subr.bf16.mxu1 %v6503_v34  ;;  %v6582_v33 = vcombine.low %v939_v18, %v943_v19  ;;  %v6710_v34 = vcombine.low %v1067_v20, %v1071_v21  ;;  %v6703_v37 = vcombine.high %v1059_v31, %v1063_v32  ;;  %v884_v18 = vld [vmem:[#allocation11 + $0x158] sm:$0xff] }
 0x285   :  { %2644 = vmatprep.subr.bf16.mxu0 %v6631_v36  ;;  %v6575_v36 = vcombine.high %v931_v26, %v935_v28  ;;  %v888_v19 = vld [vmem:[#allocation11 + $0x178] sm:$0xff] }
 0x286   :  { %v1012_v21 = vld [vmem:[#allocation11 + $0x558] sm:$0xff] }
 0x287   :  { %2602 = vmatpush1.bf16.msra.mxu1 %v6502_v44  ;;  %v1055_v44 = vld [vmem:[#allocation11 + $0x6b0] sm:$0xff] }
 0x288   :  { %2645 = vmatpush1.bf16.msra.mxu0 %v6630_v45  ;;  %2603 = vmatprep.subr.bf16.mxu1 %v6495_v46  ;;  %v6574_v45 = vcombine.low %v931_v26, %v935_v28  ;;  %v6702_v46 = vcombine.low %v1059_v31, %v1063_v32  ;;  %v6695_v48 = vcombine.high %v1051_v43, %v1055_v44  ;;  %v876_v28 = vld [vmem:[#allocation11 + $0x118] sm:$0xff] }
 0x289   :  { %2646 = vmatprep.subr.bf16.mxu0 %v6623_v47  ;;  %v6567_v47 = vcombine.high %v923_v38, %v927_v39  ;;  %v880_v31 = vld [vmem:[#allocation11 + $0x138] sm:$0xff] }
 0x28a   :  { %v1004_v32 = vld [vmem:[#allocation11 + $0x518] sm:$0xff] }
 0x28b   :  { %2604 = vmatpush1.bf16.msra.mxu1 %v6494_v60  ;;  %v1047_v60 = vld [vmem:[#allocation11 + $0x670] sm:$0xff] }
 0x28c   :  { %2647 = vmatpush1.bf16.msra.mxu0 %v6622_v61  ;;  %2605 = vmatprep.subr.bf16.mxu1 %v6487_v62  ;;  %v6566_v61 = vcombine.low %v923_v38, %v927_v39  ;;  %v6694_v62 = vcombine.low %v1051_v43, %v1055_v44  ;;  %v6687_v0 = vcombine.high %v1043_v57, %v1047_v60  ;;  %v868_v38 = vld [vmem:[#allocation11 + $0xd8] sm:$0xff] }
 0x28d   :  { %2648 = vmatprep.subr.bf16.mxu0 %v6615_v63  ;;  %v6559_v63 = vcombine.high %v915_v52, %v919_v56  ;;  %v872_v39 = vld [vmem:[#allocation11 + $0xf8] sm:$0xff] }
 0x28e   :  { %v996_v43 = vld [vmem:[#allocation11 + $0x4d8] sm:$0xff] }
 0x28f   :  { %2606 = vmatpush1.bf16.msra.mxu1 %v6486_v53  ;;  %v1039_v53 = vld [vmem:[#allocation11 + $0x630] sm:$0xff]  ;;  %v1000_v44 = vld [vmem:[#allocation11 + $0x4f8] sm:$0xff] }
 0x290   :  { %2649 = vmatpush1.bf16.msra.mxu0 %v6614_v54  ;;  %2607 = vmatprep.subr.bf16.mxu1 %v6607_v55  ;;  %v6558_v54 = vcombine.low %v915_v52, %v919_v56  ;;  %v6686_v55 = vcombine.low %v1043_v57, %v1047_v60  ;;  %v6679_v2 = vcombine.high %v1035_v51, %v1039_v53  ;;  %v864_v52 = vld [vmem:[#allocation11 + $0xb8] sm:$0xff] }
 0x291   :  { %2650 = vmatprep.subr.bf16.mxu0 %v6735_v1  ;;  %v6551_v1 = vcombine.high %v907_v49, %v911_v50  ;;  %v988_v56 = vld [vmem:[#allocation11 + $0x498] sm:$0xff]  ;;  %v6512_v60 = vcombine.low %v868_v38, %v872_v39 }
 0x292   :  { %v992_v57 = vld [vmem:[#allocation11 + $0x4b8] sm:$0xff] }
 0x293   :  { %2608 = vmatpush2.bf16.msra.mxu1 %v6606_v6  ;;  %v1032_v6 = vld [vmem:[#allocation11 + $0x5f8] sm:$0xff] }
 0x294   :  { %2651 = vmatpush2.bf16.msra.mxu0 %v6734_v7  ;;  %2609 = vmatprep.subr.bf16.mxu1 %v6599_v8  ;;  %v6550_v7 = vcombine.low %v907_v49, %v911_v50  ;;  %v6678_v8 = vcombine.low %v1035_v51, %v1039_v53  ;;  %v6673_v10 = vcombine.high %v1028_v5, %v1032_v6  ;;  %v856_v49 = vld [vmem:[#allocation11 + $0x78] sm:$0xff] }
 0x295   :  { %2652 = vmatprep.subr.bf16.mxu0 %v6727_v9  ;;  %v6545_v9 = vcombine.high %v900_v3, %v904_v4  ;;  %v980_v50 = vld [vmem:[#allocation11 + $0x458] sm:$0xff] }
 0x296   :  { %v984_v51 = vld [vmem:[#allocation11 + $0x478] sm:$0xff] }
 0x297   :  { %2610 = vmatpush2.bf16.msra.mxu1 %v6598_v14  ;;  %v1020_v14 = vld [vmem:[#allocation11 + $0x598] sm:$0xff] }
 0x298   :  { %2653 = vmatpush2.bf16.msra.mxu0 %v6726_v15  ;;  %2611 = vmatprep.subr.bf16.mxu1 %v6591_v16  ;;  %v1024_v15 = vld [vmem:[#allocation11 + $0x5b8] sm:$0xff]  ;;  %v6672_v16 = vcombine.low %v1028_v5, %v1032_v6 }
 0x299   :  { %2654 = vmatprep.subr.bf16.mxu0 %v6719_v17  ;;  %v6537_v17 = vcombine.high %v892_v11, %v896_v12  ;;  %v6665_v20 = vcombine.high %v1020_v14, %v1024_v15  ;;  %v848_v3 = vld [vmem:[#allocation11 + $0x38] sm:$0xff] }
 0x29a   :  { %v972_v4 = vld [vmem:[#allocation11 + $0x418] sm:$0xff] }
 0x29b   :  { %2612 = vmatpush2.bf16.msra.mxu1 %v6590_v22  ;;  %v1016_v22 = vld [vmem:[#allocation11 + $0x578] sm:$0xff] }
 0x29c   :  { %2655 = vmatpush2.bf16.msra.mxu0 %v6718_v23  ;;  %2613 = vmatprep.subr.bf16.mxu1 %v6583_v24  ;;  %v6536_v23 = vcombine.low %v892_v11, %v896_v12  ;;  %v6664_v24 = vcombine.low %v1020_v14, %v1024_v15  ;;  %v6657_v26 = vcombine.high %v1012_v21, %v1016_v22  ;;  %v976_v5 = vld [vmem:[#allocation11 + $0x438] sm:$0xff] }
 0x29d   :  { %2656 = vmatprep.subr.bf16.mxu0 %v6711_v25  ;;  %v6529_v25 = vcombine.high %v884_v18, %v888_v19  ;;  %v968_v11 = vld [vmem:[#allocation11 + $0x3f8] sm:$0xff]  ;;  %v6616_v15 = vcombine.low %v972_v4, %v976_v5 }
 0x29e   :  { %v1092_v12 = vld [vmem:[#allocation11 + $0x7d8] sm:$0xff] }
 0x29f   :  { %2614 = vmatpush2.bf16.msra.mxu1 %v6582_v33  ;;  %v1008_v33 = vld [vmem:[#allocation11 + $0x538] sm:$0xff] }
 0x2a0   :  { %2657 = vmatpush2.bf16.msra.mxu0 %v6710_v34  ;;  %2615 = vmatprep.subr.bf16.mxu1 %v6575_v36  ;;  %v6528_v34 = vcombine.low %v884_v18, %v888_v19  ;;  %v6656_v36 = vcombine.low %v1012_v21, %v1016_v22  ;;  %v956_v18 = vld [vmem:[#allocation11 + $0x398] sm:$0xff] }
 0x2a1   :  { %2658 = vmatprep.subr.bf16.mxu0 %v6703_v37  ;;  %v6521_v37 = vcombine.high %v876_v28, %v880_v31  ;;  %v960_v19 = vld [vmem:[#allocation11 + $0x3b8] sm:$0xff] }
 0x2a2   :  { %v1088_v21 = vld [vmem:[#allocation11 + $0x7b8] sm:$0xff] }
 0x2a3   :  { %2616 = vmatpush2.bf16.msra.mxu1 %v6574_v45  ;;  %v6648_v45 = vcombine.low %v1004_v32, %v1008_v33 }
 0x2a4   :  { %2659 = vmatpush2.bf16.msra.mxu0 %v6702_v46  ;;  %2617 = vmatprep.subr.bf16.mxu1 %v6567_v47  ;;  %v6513_v46 = vcombine.high %v868_v38, %v872_v39  ;;  %v6641_v47 = vcombine.high %v996_v43, %v1000_v44  ;;  %v944_v38 = vld [vmem:[#allocation11 + $0x338] sm:$0xff] }
 0x2a5   :  { %2660 = vmatprep.subr.bf16.mxu0 %v6695_v48  ;;  %v860_v48 = vld [vmem:[#allocation11 + $0x98] sm:$0xff] }
 0x2a6   :  { %v6504_v53 = vcombine.low %v860_v48, %v864_v52  ;;  %v1068_v39 = vld [vmem:[#allocation11 + $0x718] sm:$0xff] }
 0x2a7   :  { %2618 = vmatpush2.bf16.msra.mxu1 %v6566_v61  ;;  %v6640_v61 = vcombine.low %v996_v43, %v1000_v44  ;;  %v1072_v43 = vld [vmem:[#allocation11 + $0x738] sm:$0xff] }
 0x2a8   :  { %2661 = vmatpush2.bf16.msra.mxu0 %v6694_v62  ;;  %2619 = vmatprep.subr.bf16.mxu1 %v6559_v63  ;;  %v6505_v62 = vcombine.high %v860_v48, %v864_v52  ;;  %v6633_v63 = vcombine.high %v988_v56, %v992_v57  ;;  %v936_v48 = vld [vmem:[#allocation11 + $0x2f8] sm:$0xff] }
 0x2a9   :  { %2662 = vmatprep.subr.bf16.mxu0 %v6687_v0  ;;  %v852_v0 = vld [vmem:[#allocation11 + $0x58] sm:$0xff] }
 0x2aa   :  { %v6496_v6 = vcombine.low %v852_v0, %v856_v49  ;;  %v1060_v52 = vld [vmem:[#allocation11 + $0x6d8] sm:$0xff] }
 0x2ab   :  { %2620 = vmatpush2.bf16.msra.mxu1 %v6558_v54  ;;  %v6632_v54 = vcombine.low %v988_v56, %v992_v57  ;;  %v1064_v56 = vld [vmem:[#allocation11 + $0x6f8] sm:$0xff] }
 0x2ac   :  { %2663 = vmatpush2.bf16.msra.mxu0 %v6686_v55  ;;  %2621 = vmatprep.subr.bf16.mxu1 %v6551_v1  ;;  %v6497_v55 = vcombine.high %v852_v0, %v856_v49  ;;  %v6625_v1 = vcombine.high %v980_v50, %v984_v51  ;;  %v928_v0 = vld [vmem:[#allocation11 + $0x2b8] sm:$0xff] }
 0x2ad   :  { %2664 = vmatprep.subr.bf16.mxu0 %v6679_v2  ;;  %v844_v2 = vld [vmem:[#allocation11 + $0x18] sm:$0xff] }
 0x2ae   :  { %v6488_v14 = vcombine.low %v844_v2, %v848_v3  ;;  %v1052_v49 = vld [vmem:[#allocation11 + $0x698] sm:$0xff] }
 0x2af   :  { %2622 = vmatpush2.bf16.msra.mxu1 %v6550_v7  ;;  %v6624_v7 = vcombine.low %v980_v50, %v984_v51  ;;  %v1056_v50 = vld [vmem:[#allocation11 + $0x6b8] sm:$0xff] }
 0x2b0   :  { %2665 = vmatpush2.bf16.msra.mxu0 %v6678_v8  ;;  %2677 = vmatprep.subr.bf16.mxu1 %v6545_v9  ;;  %v6489_v8 = vcombine.high %v844_v2, %v848_v3  ;;  %v6617_v9 = vcombine.high %v972_v4, %v976_v5  ;;  %v920_v2 = vld [vmem:[#allocation11 + $0x278] sm:$0xff] }
 0x2b1   :  { %2720 = vmatprep.subr.bf16.mxu0 %v6673_v10  ;;  %v964_v10 = vld [vmem:[#allocation11 + $0x3d8] sm:$0xff] }
 0x2b2   :  { %2624 = vmatmul.mubr.bf16.vlgmr.msra.gmra.mxu1 %v8437_v40  ;;  %v6608_v22 = vcombine.low %v964_v10, %v968_v11  ;;  %v1044_v3 = vld [vmem:[#allocation11 + $0x658] sm:$0xff] }
 0x2b3   :  { %2667 = vmatmul.mubr.bf16.vlgmr.msra.gmra.mxu0 %v8441_v42  ;;  %2678 = vmatpush1.bf16.msra.mxu1 %v6544_v13  ;;  %v1096_v13 = vld [vmem:[#allocation11 + $0x7f8] sm:$0xff] }
 0x2b4   :  { %2709 = vmatprep.mubr.bf16.mxu1 %v8435_v35  ;;  %2721 = vmatpush1.bf16.msra.mxu0 %v6672_v16  ;;  %v6649_v35 = vcombine.high %v1004_v32, %v1008_v33  ;;  %v6609_v16 = vcombine.high %v964_v10, %v968_v11  ;;  %v1080_v32 = vld [vmem:[#allocation11 + $0x778] sm:$0xff]  ;;  %v6600_v33 = vcombine.low %v956_v18, %v960_v19 }
 0x2b5   :  { %2752 = vmatprep.mubr.bf16.mxu0 %v8439_v41  ;;  %2679 = vmatprep.subr.bf16.mxu1 %v6537_v17  ;;  %v6520_v41 = vcombine.low %v876_v28, %v880_v31  ;;  %v6737_v17 = vcombine.high %v1092_v12, %v1096_v13  ;;  %v952_v28 = vld [vmem:[#allocation11 + $0x378] sm:$0xff] }
 0x2b6   :  { %2722 = vmatprep.subr.bf16.mxu0 %v6665_v20  ;;  %v1084_v20 = vld [vmem:[#allocation11 + $0x798] sm:$0xff] }
 0x2b7   :  { %2680 = vmatpush1.bf16.msra.mxu1 %v6536_v23  ;;  %v6736_v23 = vcombine.low %v1092_v12, %v1096_v13  ;;  %v1076_v31 = vld [vmem:[#allocation11 + $0x758] sm:$0xff] }
 0x2b8   :  { %2723 = vmatpush1.bf16.msra.mxu0 %v6664_v24  ;;  %2681 = vmatprep.subr.bf16.mxu1 %v6529_v25  ;;  %v6601_v24 = vcombine.high %v956_v18, %v960_v19  ;;  %v6729_v25 = vcombine.high %v1084_v20, %v1088_v21  ;;  %v1048_v4 = vld [vmem:[#allocation11 + $0x678] sm:$0xff]  ;;  %v7420_v19 = vld [vmem:[#allocation14 + $0x18c] ss:$28 sps:$4 sm:$0xff]  }
 0x2b9   :  { %2724 = vmatprep.subr.bf16.mxu0 %v6657_v26  ;;  %v948_v26 = vld [vmem:[#allocation11 + $0x358] sm:$0xff] }
 0x2ba   :  { %v6592_v44 = vcombine.low %v948_v26, %v952_v28  ;;  %v912_v10 = vld [vmem:[#allocation11 + $0x238] sm:$0xff] }
 0x2bb   :  { %2682 = vmatpush1.bf16.msra.mxu1 %v6528_v34  ;;  %v6728_v34 = vcombine.low %v1084_v20, %v1088_v21  ;;  %v1036_v11 = vld [vmem:[#allocation11 + $0x618] sm:$0xff]  ;;  %v7435_v20 = vld [vmem:[#allocation14 + $0x50c] ss:$28 sps:$4 sm:$0xff]  }
 0x2bc   :  { %2725 = vmatpush1.bf16.msra.mxu0 %v6656_v36  ;;  %2683 = vmatprep.subr.bf16.mxu1 %v6521_v37  ;;  %v6593_v36 = vcombine.high %v948_v26, %v952_v28  ;;  %v6721_v37 = vcombine.high %v1076_v31, %v1080_v32  ;;  %v1040_v12 = vld [vmem:[#allocation11 + $0x638] sm:$0xff]  ;;  %v7418_v21 = vld [vmem:[#allocation14 + $0x188] ss:$28 sps:$4 sm:$0xff]  }
 0x2bd   :  { %2726 = vmatprep.subr.bf16.mxu0 %v6649_v35  ;;  %v940_v35 = vld [vmem:[#allocation11 + $0x318] sm:$0xff]  ;;  %v6680_v18 = vcombine.low %v1036_v11, %v1040_v12 }
 0x2be   :  { %v6584_v57 = vcombine.low %v940_v35, %v944_v38  ;;  %v7441_v26 = vld [vmem:[#allocation14 + $0x4d4] ss:$28 sps:$4 sm:$0xff]  }
 0x2bf   :  { %2684 = vmatpush1.bf16.msra.mxu1 %v6520_v41  ;;  %v6720_v41 = vcombine.low %v1076_v31, %v1080_v32  ;;  %v7421_v32 = vld [vmem:[#allocation14 + $0x150] ss:$28 sps:$4 sm:$0xff]  }
 0x2c0   :  { %2727 = vmatpush1.bf16.msra.mxu0 %v6648_v45  ;;  %2685 = vmatprep.subr.bf16.mxu1 %v6513_v46  ;;  %v6585_v45 = vcombine.high %v940_v35, %v944_v38  ;;  %v6713_v46 = vcombine.high %v1068_v39, %v1072_v43  ;;  %v7447_v38 = vld [vmem:[#allocation14 + $0x49c] ss:$28 sps:$4 sm:$0xff]  }
 0x2c1   :  { %2728 = vmatprep.subr.bf16.mxu0 %v6641_v47  ;;  %v932_v47 = vld [vmem:[#allocation11 + $0x2d8] sm:$0xff] }
 0x2c2   :  { %v6576_v51 = vcombine.low %v932_v47, %v936_v48 }
 0x2c3   :  { %2686 = vmatpush1.bf16.msra.mxu1 %v6512_v60  ;;  %v6712_v60 = vcombine.low %v1068_v39, %v1072_v43  ;;  %v7424_v43 = vld [vmem:[#allocation14 + $0x118] ss:$28 sps:$4 sm:$0xff]  }
 0x2c4   :  { %2729 = vmatpush1.bf16.msra.mxu0 %v6640_v61  ;;  %2687 = vmatprep.subr.bf16.mxu1 %v6505_v62  ;;  %v6577_v61 = vcombine.high %v932_v47, %v936_v48  ;;  %v6705_v62 = vcombine.high %v1060_v52, %v1064_v56 }
 0x2c5   :  { %2730 = vmatprep.subr.bf16.mxu0 %v6633_v63  ;;  %v924_v63 = vld [vmem:[#allocation11 + $0x298] sm:$0xff] }
 0x2c6   :  { %v6568_v5 = vcombine.low %v924_v63, %v928_v0 }
 0x2c7   :  { %2688 = vmatpush1.bf16.msra.mxu1 %v6504_v53  ;;  %v6704_v53 = vcombine.low %v1060_v52, %v1064_v56  ;;  %v7427_v52 = vld [vmem:[#allocation14 + $0xe0] ss:$28 sps:$4 sm:$0xff]  }
 0x2c8   :  { %2731 = vmatpush1.bf16.msra.mxu0 %v6632_v54  ;;  %2689 = vmatprep.subr.bf16.mxu1 %v6497_v55  ;;  %v6569_v54 = vcombine.high %v924_v63, %v928_v0  ;;  %v6697_v55 = vcombine.high %v1052_v49, %v1056_v50  ;;  %v7430_v0 = vld [vmem:[#allocation14 + $0xa8] ss:$28 sps:$4 sm:$0xff]  }
 0x2c9   :  { %2732 = vmatprep.subr.bf16.mxu0 %v6625_v1  ;;  %v916_v1 = vld [vmem:[#allocation11 + $0x258] sm:$0xff] }
 0x2ca   :  { %v6560_v13 = vcombine.low %v916_v1, %v920_v2 }
 0x2cb   :  { %2690 = vmatpush1.bf16.msra.mxu1 %v6496_v6  ;;  %v6696_v6 = vcombine.low %v1052_v49, %v1056_v50 }
 0x2cc   :  { %2733 = vmatpush1.bf16.msra.mxu0 %v6624_v7  ;;  %2691 = vmatprep.subr.bf16.mxu1 %v6489_v8  ;;  %v6561_v7 = vcombine.high %v916_v1, %v920_v2  ;;  %v6689_v8 = vcombine.high %v1044_v3, %v1048_v4  ;;  %v7436_v1 = vld [vmem:[#allocation14 + $0x70] ss:$28 sps:$4 sm:$0xff]   ;;  %v7444_v2 = vld [vmem:[#allocation14 + $0x3c] ss:$28 sps:$4 sm:$0xff]  }
 0x2cd   :  { %2734 = vmatprep.subr.bf16.mxu0 %v6617_v9  ;;  %v908_v9 = vld [vmem:[#allocation11 + $0x218] sm:$0xff] }
 0x2cf   :  { %2692 = vmatpush1.bf16.msra.mxu1 %v6488_v14  ;;  %v6688_v14 = vcombine.low %v1044_v3, %v1048_v4  ;;  %v7463_v3 = vld [vmem:[#allocation14 + $0x3f0] ss:$28 sps:$4 sm:$0xff]   ;;  %v7471_v4 = vld [vmem:[#allocation14 + $0x3bc] ss:$28 sps:$4 sm:$0xff]  }
 0x2d0   :  { %2735 = vmatpush1.bf16.msra.mxu0 %v6616_v15  ;;  %2693 = vmatprep.subr.bf16.mxu1 %v6609_v16  ;;  %v6553_v15 = vcombine.high %v908_v9, %v912_v10  ;;  %v6681_v16 = vcombine.high %v1036_v11, %v1040_v12  ;;  %v7475_v11 = vld [vmem:[#allocation14 + $0x380] ss:$28 sps:$4 sm:$0xff]   ;;  %v7483_v12 = vld [vmem:[#allocation14 + $0x6cc] ss:$28 sps:$4 sm:$0xff]  }
 0x2d1   :  { %2736 = vmatprep.subr.bf16.mxu0 %v6737_v17  ;;  %v6552_v17 = vcombine.low %v908_v9, %v912_v10  ;;  %v7448_v9 = vld [vmem:[#allocation14] ss:$28 sps:$4 sm:$0xff]   ;;  %v7456_v10 = vld [vmem:[#allocation14 + $0x34c] ss:$28 sps:$4 sm:$0xff]  }
 0x2d3   :  { %2694 = vmatpush2.bf16.msra.mxu1 %v6608_v22  ;;  %v8463_v22 = vld [vmem:[#allocation13] sm:$0xff] }
 0x2d4   :  { %2737 = vmatpush2.bf16.msra.mxu0 %v6736_v23  ;;  %2695 = vmatprep.subr.bf16.mxu1 %v6601_v24  ;;  %v7423_v23 = vld [vmem:[#allocation14 + $0x154] ss:$28 sps:$4 sm:$0xff]   ;;  %v7433_v24 = vld [vmem:[#allocation14 + $0x508] ss:$28 sps:$4 sm:$0xff]  }
 0x2d5   :  { %2738 = vmatprep.subr.bf16.mxu0 %v6729_v25  ;;  %v1106_v25 = vrot.slane %v8463_v22, %v8404_v30 }
 0x2d7   :  { %2696 = vmatpush2.bf16.msra.mxu1 %v6600_v33 }
 0x2d8   :  { %2739 = vmatpush2.bf16.msra.mxu0 %v6728_v34  ;;  %2697 = vmatprep.subr.bf16.mxu1 %v6593_v36  ;;  %v7426_v34 = vld [vmem:[#allocation14 + $0x11c] ss:$28 sps:$4 sm:$0xff]   ;;  %v7439_v36 = vld [vmem:[#allocation14 + $0x4d0] ss:$28 sps:$4 sm:$0xff]  }
 0x2d9   :  { %2740 = vmatprep.subr.bf16.mxu0 %v6721_v37 }
 0x2db   :  { %2698 = vmatpush2.bf16.msra.mxu1 %v6592_v44 }
 0x2dc   :  { %2741 = vmatpush2.bf16.msra.mxu0 %v6720_v41  ;;  %2699 = vmatprep.subr.bf16.mxu1 %v6585_v45  ;;  %v7429_v41 = vld [vmem:[#allocation14 + $0xe4] ss:$28 sps:$4 sm:$0xff]   ;;  %v7445_v45 = vld [vmem:[#allocation14 + $0x498] ss:$28 sps:$4 sm:$0xff]  }
 0x2dd   :  { %2742 = vmatprep.subr.bf16.mxu0 %v6713_v46  ;;  %v7453_v46 = vld [vmem:[#allocation14 + $0x464] ss:$28 sps:$4 sm:$0xff]  }
 0x2df   :  { %2700 = vmatpush2.bf16.msra.mxu1 %v6584_v57 }
 0x2e0   :  { %2743 = vmatpush2.bf16.msra.mxu0 %v6712_v60  ;;  %2701 = vmatprep.subr.bf16.mxu1 %v6577_v61  ;;  %v7432_v60 = vld [vmem:[#allocation14 + $0xac] ss:$28 sps:$4 sm:$0xff]   ;;  %v7451_v61 = vld [vmem:[#allocation14 + $0x460] ss:$28 sps:$4 sm:$0xff]  }
 0x2e1   :  { %2744 = vmatprep.subr.bf16.mxu0 %v6705_v62  ;;  %v7459_v62 = vld [vmem:[#allocation14 + $0x42c] ss:$28 sps:$4 sm:$0xff]  }
 0x2e3   :  { %2702 = vmatpush2.bf16.msra.mxu1 %v6576_v51  ;;  %v7438_v51 = vld [vmem:[#allocation14 + $0x74] ss:$28 sps:$4 sm:$0xff]  }
 0x2e4   :  { %2745 = vmatpush2.bf16.msra.mxu0 %v6704_v53  ;;  %2703 = vmatprep.subr.bf16.mxu1 %v6569_v54  ;;  %v7457_v53 = vld [vmem:[#allocation14 + $0x428] ss:$28 sps:$4 sm:$0xff]  }
 0x2e5   :  { %2746 = vmatprep.subr.bf16.mxu0 %v6697_v55  ;;  %v7465_v55 = vld [vmem:[#allocation14 + $0x3f4] ss:$28 sps:$4 sm:$0xff]  }
 0x2e7   :  { %2704 = vmatpush2.bf16.msra.mxu1 %v6568_v5  ;;  %v7442_v5 = vld [vmem:[#allocation14 + $0x38] ss:$28 sps:$4 sm:$0xff]  }
 0x2e8   :  { %2747 = vmatpush2.bf16.msra.mxu0 %v6696_v6  ;;  %2705 = vmatprep.subr.bf16.mxu1 %v6561_v7  ;;  %v7450_v6 = vld [vmem:[#allocation14 + $0x4] ss:$28 sps:$4 sm:$0xff]   ;;  %v7469_v7 = vld [vmem:[#allocation14 + $0x3b8] ss:$28 sps:$4 sm:$0xff]  }
 0x2e9   :  { %2748 = vmatprep.subr.bf16.mxu0 %v6689_v8  ;;  %v7477_v8 = vld [vmem:[#allocation14 + $0x384] ss:$28 sps:$4 sm:$0xff]  }
 0x2eb   :  { %2706 = vmatpush2.bf16.msra.mxu1 %v6560_v13  ;;  %v7454_v13 = vld [vmem:[#allocation14 + $0x348] ss:$28 sps:$4 sm:$0xff]  }
 0x2ec   :  { %2749 = vmatpush2.bf16.msra.mxu0 %v6688_v14  ;;  %2707 = vmatprep.subr.bf16.mxu1 %v6553_v15  ;;  %v7462_v14 = vld [vmem:[#allocation14 + $0x314] ss:$28 sps:$4 sm:$0xff]   ;;  %v7481_v15 = vld [vmem:[#allocation14 + $0x6c8] ss:$28 sps:$4 sm:$0xff]  }
 0x2ed   :  { %2750 = vmatprep.subr.bf16.mxu0 %v6681_v16  ;;  %v7489_v16 = vld [vmem:[#allocation14 + $0x694] ss:$28 sps:$4 sm:$0xff]  }
 0x2ef   :  { %2708 = vmatpush2.bf16.msra.mxu1 %v6552_v17  ;;  %v7460_v17 = vld [vmem:[#allocation14 + $0x310] ss:$28 sps:$4 sm:$0xff]  }
 0x2f0   :  { %2751 = vmatpush2.bf16.msra.mxu0 %v6680_v18  ;;  %5672 = vmatprep.subr.bf16.mxu1 %v7420_v19  ;;  %v7468_v18 = vld [vmem:[#allocation14 + $0x2dc] ss:$28 sps:$4 sm:$0xff]   ;;  %v7487_v19 = vld [vmem:[#allocation14 + $0x690] ss:$28 sps:$4 sm:$0xff]  }
 0x2f1   :  { %5715 = vmatprep.subr.bf16.mxu0 %v7435_v20  ;;  %v7495_v20 = vld [vmem:[#allocation14 + $0x65c] ss:$28 sps:$4 sm:$0xff]  }
 0x2f2   :  { %2710 = vmatmul.mubr.bf16.vlgmr.msra.gmra.mxu1 %v8437_v40  ;;  %v8468_v28 = vpop.f32.mrf.mxu1 }
 0x2f3   :  { %2753 = vmatmul.mubr.bf16.vlgmr.msra.gmra.mxu0 %v8441_v42  ;;  %v8471_v31 = vpop.f32.mrf.mxu0  ;;  %5673 = vmatpush1.bf16.msra.mxu1 %v7418_v21  ;;  %v7466_v21 = vld [vmem:[#allocation14 + $0x2d8] ss:$28 sps:$4 sm:$0xff]  }
 0x2f4   :  { %v2455_v33 = vpop.f32.mrf.mxu1  ;;  %5674 = vmatprep.subr.bf16.mxu1 %v7423_v23  ;;  %5716 = vmatpush1.bf16.msra.mxu0 %v7433_v24  ;;  %v7474_v23 = vld [vmem:[#allocation14 + $0x2a4] ss:$28 sps:$4 sm:$0xff]   ;;  %v7493_v24 = vld [vmem:[#allocation14 + $0x658] ss:$28 sps:$4 sm:$0xff]  }
 0x2f5   :  { %v2456_v37 = vadd.f32 %v2455_v33, %v1106_v25  ;;  %v2498_v35 = vpop.f32.mrf.mxu0  ;;  %5717 = vmatprep.subr.bf16.mxu0 %v7441_v26  ;;  %v7472_v26 = vld [vmem:[#allocation14 + $0x2a0] ss:$28 sps:$4 sm:$0xff]  }
 0x2f6   :  { %v8473_v39 = vpop.f32.mrf.mxu1  ;;  %v7499_v33 = vld [vmem:[#allocation14 + $0x620] ss:$28 sps:$4 sm:$0xff]  }
 0x2f7   :  { %v8475_v40 = vpop.f32.mrf.mxu0  ;;  %5675 = vmatpush1.bf16.msra.mxu1 %v7421_v32  ;;  %v2499_v42 = vadd.f32 %v2498_v35, %v2456_v37  ;;  %v7480_v32 = vld [vmem:[#allocation14 + $0x26c] ss:$28 sps:$4 sm:$0xff]   ;;  %v7486_v35 = vld [vmem:[#allocation14 + $0x234] ss:$28 sps:$4 sm:$0xff]  }
 0x2f8   :  { %v2459_v44 = vpop.f32.mrf.mxu1  ;;  %5676 = vmatprep.subr.bf16.mxu1 %v7426_v34  ;;  %5718 = vmatpush1.bf16.msra.mxu0 %v7439_v36  ;;  %v7504_v34 = vld [vmem:[#allocation14 + $0x5ec] ss:$28 sps:$4 sm:$0xff]   ;;  %v1102_v36 = vrot.slane %v8463_v22, %v8401_v29 }
 0x2f9   :  { %5719 = vmatprep.subr.bf16.mxu0 %v7447_v38  ;;  %v2460_v47 = vadd.f32 %v2459_v44, %v1106_v25  ;;  %v2502_v48 = vpop.f32.mrf.mxu0  ;;  %v2780_v56 = vmul.f32 0.2, %v2499_v42  ;;  %vm2764_vm12 = vcmp.gt.f32.partialorder %v2499_v42, 0.0  ;;  %v7501_v25 = vld [vmem:[#allocation14 + $0x624] ss:$28 sps:$4 sm:$0xff]  }
 0x2fa   :  { %v7478_v37 = vld [vmem:[#allocation14 + $0x268] ss:$28 sps:$4 sm:$0xff]   ;;  %v2454_v44 = vadd.f32 %v8468_v28, %v1102_v36 }
 0x2fb   :  { %5677 = vmatpush1.bf16.msra.mxu1 %v7424_v43  ;;  %v2503_v57 = vadd.f32 %v2502_v48, %v2460_v47  ;;  %v2796_v49 = vsel %vm2764_vm12, %v2499_v42, %v2780_v56  ;;  %v7502_v38 = vld [vmem:[#allocation14 + $0x5e8] ss:$28 sps:$4 sm:$0xff]   ;;  %v2458_v43 = vadd.f32 %v8473_v39, %v1102_v36  ;;  %v7507_v42 = vld [vmem:[#allocation14 + $0x5b4] ss:$28 sps:$4 sm:$0xff]   ;;  %v7510_v48 = vld [vmem:[#allocation14 + $0x57c] ss:$28 sps:$4 sm:$0xff]  }
 0x2fc   :  { %5678 = vmatprep.subr.bf16.mxu1 %v7429_v41  ;;  %5720 = vmatpush1.bf16.msra.mxu0 %v7445_v45  ;;  %v7484_v41 = vld [vmem:[#allocation14 + $0x230] ss:$28 sps:$4 sm:$0xff]   ;;  %v7492_v45 = vld [vmem:[#allocation14 + $0x1fc] ss:$28 sps:$4 sm:$0xff]   ;;  %v7498_v39 = vld [vmem:[#allocation14 + $0x1c4] ss:$28 sps:$4 sm:$0xff]  }
 0x2fd   :  { %5721 = vmatprep.subr.bf16.mxu0 %v7453_v46  ;;  %vm2772_vm13 = vcmp.gt.f32.partialorder %v2503_v57, 0.0  ;;  %v2788_v63 = vmul.f32 0.2, %v2503_v57  ;;  %v7505_v46 = vld [vmem:[#allocation14 + $0x5b0] ss:$28 sps:$4 sm:$0xff]   ;;  %v2501_v47 = vadd.f32 %v8475_v40, %v2458_v43 }
 0x2fe   :  { %v7490_v56 = vld [vmem:[#allocation14 + $0x1f8] ss:$28 sps:$4 sm:$0xff]   ;;  %v7513_v28 = vld [vmem:[#allocation14 + $0x544] ss:$28 sps:$4 sm:$0xff]  }
 0x2ff   :  { %5679 = vmatpush1.bf16.msra.mxu1 %v7427_v52  ;;  %v2804_v50 = vsel %vm2772_vm13, %v2503_v57, %v2788_v63  ;;  %v2497_v52 = vadd.f32 %v8471_v31, %v2454_v44  ;;  %v7508_v57 = vld [vmem:[#allocation14 + $0x578] ss:$28 sps:$4 sm:$0xff]   ;;  %vm2771_vm14 = vcmp.gt.f32.partialorder %v2501_v47, 0.0  ;;  %v7511_v40 = vld [vmem:[#allocation14 + $0x540] ss:$28 sps:$4 sm:$0xff]  }
 0x300   :  { %5680 = vmatprep.subr.bf16.mxu1 %v7432_v60  ;;  %5722 = vmatpush1.bf16.msra.mxu0 %v7451_v61  ;;  %v8477_v54 = vpack.c.bf16 %v2804_v50, %v2796_v49  ;;  %v2787_v60 = vmul.f32 0.2, %v2501_v47  ;;  %v7516_v63 = vld [vmem:[#allocation14 + $0x88c] ss:$28 sps:$4 sm:$0xff]  }
 0x301   :  { %5723 = vmatprep.subr.bf16.mxu0 %v7459_v62  ;;  %v2779_v61 = vmul.f32 0.2, %v2497_v52  ;;  %v7496_v62 = vld [vmem:[#allocation14 + $0x1c0] ss:$28 sps:$4 sm:$0xff]   ;;  %vm2763_vm15 = vcmp.gt.f32.partialorder %v2497_v52, 0.0 }
 0x302   :  { %5704 = vmatprep.mubr.bf16.mxu1 %v8477_v54  ;;  %v7564_v31 = vld [vmem:[#allocation14 + $0xc0c] ss:$28 sps:$4 sm:$0xff]  }
 0x303   :  { %5681 = vmatpush1.bf16.msra.mxu1 %v7430_v0  ;;  %v2803_v0 = vsel %vm2771_vm14, %v2501_v47, %v2787_v60  ;;  %v2795_v49 = vsel %vm2763_vm15, %v2497_v52, %v2779_v61  ;;  %v7514_v50 = vld [vmem:[#allocation14 + $0x888] ss:$28 sps:$4 sm:$0xff]   ;;  %v7534_v47 = vld [vmem:[#allocation14 + $0x73c] ss:$28 sps:$4 sm:$0xff]  }
 0x304   :  { %5682 = vmatprep.subr.bf16.mxu1 %v7438_v51  ;;  %5724 = vmatpush1.bf16.msra.mxu0 %v7457_v53  ;;  %v8486_v51 = vpack.c.bf16 %v2803_v0, %v2795_v49  ;;  %v7519_v53 = vld [vmem:[#allocation14 + $0x854] ss:$28 sps:$4 sm:$0xff]   ;;  %v7526_v36 = vld [vmem:[#allocation14 + $0x7a8] ss:$28 sps:$4 sm:$0xff]   ;;  %v7576_v52 = vld [vmem:[#allocation14 + $0xb9c] ss:$28 sps:$4 sm:$0xff]  }
 0x305   :  { %5725 = vmatprep.subr.bf16.mxu0 %v7465_v55  ;;  %v1110_v55 = vrot.slane %v8463_v22, %v8428_v59  ;;  %v7562_v44 = vld [vmem:[#allocation14 + $0xc08] ss:$28 sps:$4 sm:$0xff]   ;;  %v7543_v0 = vld [vmem:[#allocation14 + $0xa14] ss:$28 sps:$4 sm:$0xff]  }
 0x306   :  { %v7582_v60 = vld [vmem:[#allocation14 + $0xb64] ss:$28 sps:$4 sm:$0xff]   ;;  %v7540_v61 = vld [vmem:[#allocation14 + $0xa4c] ss:$28 sps:$4 sm:$0xff]   ;;  %v7594_v49 = vld [vmem:[#allocation14 + $0xaf4] ss:$28 sps:$4 sm:$0xff]  }
 0x307   :  { %5683 = vmatpush1.bf16.msra.mxu1 %v7436_v1  ;;  %v1114_v1 = vrot.slane %v8463_v22, %v8425_v58 }
 0x308   :  { %5684 = vmatprep.subr.bf16.mxu1 %v7444_v2  ;;  %5726 = vmatpush1.bf16.msra.mxu0 %v7463_v3 }
 0x309   :  { %5727 = vmatprep.subr.bf16.mxu0 %v7471_v4  ;;  %v7517_v4 = vld [vmem:[#allocation14 + $0x850] ss:$28 sps:$4 sm:$0xff]  }
 0x30b   :  { %5685 = vmatpush1.bf16.msra.mxu1 %v7442_v5 }
 0x30c   :  { %5686 = vmatprep.subr.bf16.mxu1 %v7450_v6  ;;  %5728 = vmatpush1.bf16.msra.mxu0 %v7469_v7  ;;  %v7522_v6 = vld [vmem:[#allocation14 + $0x81c] ss:$28 sps:$4 sm:$0xff]  }
 0x30d   :  { %5729 = vmatprep.subr.bf16.mxu0 %v7477_v8 }
 0x30f   :  { %5687 = vmatpush1.bf16.msra.mxu1 %v7448_v9 }
 0x310   :  { %5688 = vmatprep.subr.bf16.mxu1 %v7456_v10  ;;  %5730 = vmatpush1.bf16.msra.mxu0 %v7475_v11 }
 0x311   :  { %5731 = vmatprep.subr.bf16.mxu0 %v7483_v12 }
 0x313   :  { %5689 = vmatpush2.bf16.msra.mxu1 %v7454_v13  ;;  %v7520_v13 = vld [vmem:[#allocation14 + $0x818] ss:$28 sps:$4 sm:$0xff]  }
 0x314   :  { %5690 = vmatprep.subr.bf16.mxu1 %v7462_v14  ;;  %5732 = vmatpush2.bf16.msra.mxu0 %v7481_v15 }
 0x315   :  { %5733 = vmatprep.subr.bf16.mxu0 %v7489_v16  ;;  %v7525_v16 = vld [vmem:[#allocation14 + $0x7e4] ss:$28 sps:$4 sm:$0xff]  }
 0x317   :  { %5691 = vmatpush2.bf16.msra.mxu1 %v7460_v17 }
 0x318   :  { %5692 = vmatprep.subr.bf16.mxu1 %v7468_v18  ;;  %5734 = vmatpush2.bf16.msra.mxu0 %v7487_v19 }
 0x319   :  { %5735 = vmatprep.subr.bf16.mxu0 %v7495_v20 }
 0x31b   :  { %5693 = vmatpush2.bf16.msra.mxu1 %v7466_v21 }
 0x31c   :  { %5694 = vmatprep.subr.bf16.mxu1 %v7474_v23  ;;  %5736 = vmatpush2.bf16.msra.mxu0 %v7493_v24  ;;  %v7523_v23 = vld [vmem:[#allocation14 + $0x7e0] ss:$28 sps:$4 sm:$0xff]  }
 0x31d   :  { %5737 = vmatprep.subr.bf16.mxu0 %v7501_v25 }
 0x31f   :  { %5695 = vmatpush2.bf16.msra.mxu1 %v7472_v26  ;;  %v7528_v26 = vld [vmem:[#allocation14 + $0x7ac] ss:$28 sps:$4 sm:$0xff]  }
 0x320   :  { %5696 = vmatprep.subr.bf16.mxu1 %v7480_v32  ;;  %5738 = vmatpush2.bf16.msra.mxu0 %v7499_v33 }
 0x321   :  { %5739 = vmatprep.subr.bf16.mxu0 %v7504_v34 }
 0x323   :  { %5697 = vmatpush2.bf16.msra.mxu1 %v7478_v37 }
 0x324   :  { %5698 = vmatprep.subr.bf16.mxu1 %v7486_v35  ;;  %5740 = vmatpush2.bf16.msra.mxu0 %v7502_v38  ;;  %v7531_v38 = vld [vmem:[#allocation14 + $0x774] ss:$28 sps:$4 sm:$0xff]  }
 0x325   :  { %5741 = vmatprep.subr.bf16.mxu0 %v7507_v42 }
 0x327   :  { %5699 = vmatpush2.bf16.msra.mxu1 %v7484_v41 }
 0x328   :  { %5700 = vmatprep.subr.bf16.mxu1 %v7492_v45  ;;  %5742 = vmatpush2.bf16.msra.mxu0 %v7505_v46  ;;  %v7570_v45 = vld [vmem:[#allocation14 + $0xbd4] ss:$28 sps:$4 sm:$0xff]  }
 0x329   :  { %5743 = vmatprep.subr.bf16.mxu0 %v7510_v48  ;;  %v7529_v46 = vld [vmem:[#allocation14 + $0x770] ss:$28 sps:$4 sm:$0xff]  }
 0x32a   :  { %v7568_v48 = vld [vmem:[#allocation14 + $0xbd0] ss:$28 sps:$4 sm:$0xff]  }
 0x32b   :  { %5701 = vmatpush2.bf16.msra.mxu1 %v7490_v56  ;;  %v7532_v56 = vld [vmem:[#allocation14 + $0x738] ss:$28 sps:$4 sm:$0xff]  }
 0x32c   :  { %5702 = vmatprep.subr.bf16.mxu1 %v7498_v39  ;;  %5744 = vmatpush2.bf16.msra.mxu0 %v7508_v57  ;;  %v7537_v39 = vld [vmem:[#allocation14 + $0x704] ss:$28 sps:$4 sm:$0xff]   ;;  %v7574_v57 = vld [vmem:[#allocation14 + $0xb98] ss:$28 sps:$4 sm:$0xff]  }
 0x32d   :  { %5745 = vmatprep.subr.bf16.mxu0 %v7513_v28  ;;  %v7535_v28 = vld [vmem:[#allocation14 + $0x700] ss:$28 sps:$4 sm:$0xff]  }
 0x32f   :  { %5703 = vmatpush2.bf16.msra.mxu1 %v7496_v62  ;;  %v7580_v62 = vld [vmem:[#allocation14 + $0xb60] ss:$28 sps:$4 sm:$0xff]  }
 0x330   :  { %5746 = vmatpush2.bf16.msra.mxu0 %v7511_v40  ;;  %5758 = vmatprep.subr.bf16.mxu1 %v7516_v63  ;;  %v7588_v40 = vld [vmem:[#allocation14 + $0xb2c] ss:$28 sps:$4 sm:$0xff]  }
 0x331   :  { %5801 = vmatprep.subr.bf16.mxu0 %v7564_v31  ;;  %v7538_v63 = vld [vmem:[#allocation14 + $0xa48] ss:$28 sps:$4 sm:$0xff]  }
 0x332   :  { %v2539_v2 = vpop.f32.mrf.mxu1  ;;  %5705 = vmatmul.mubr.bf16.vlgmr.msra.gmra.mxu1 %v8486_v51  ;;  %v7586_v31 = vld [vmem:[#allocation14 + $0xb28] ss:$28 sps:$4 sm:$0xff]  }
 0x333   :  { %v2582_v3 = vpop.f32.mrf.mxu0  ;;  %5759 = vmatpush1.bf16.msra.mxu1 %v7514_v50  ;;  %v2540_v7 = vadd.f32 %v2539_v2, %v1110_v55  ;;  %v7541_v50 = vld [vmem:[#allocation14 + $0xa10] ss:$28 sps:$4 sm:$0xff]   ;;  %v7544_v2 = vld [vmem:[#allocation14 + $0x9d8] ss:$28 sps:$4 sm:$0xff]  }
 0x334   :  { %v2541_v5 = vpop.f32.mrf.mxu1  ;;  %5760 = vmatprep.subr.bf16.mxu1 %v7519_v53  ;;  %v7546_v53 = vld [vmem:[#allocation14 + $0x9dc] ss:$28 sps:$4 sm:$0xff]  }
 0x335   :  { %v2542_v8 = vadd.f32 %v2541_v5, %v1114_v1  ;;  %v2584_v9 = vpop.f32.mrf.mxu0  ;;  %v2583_v17 = vadd.f32 %v2582_v3, %v2540_v7  ;;  %v7549_v3 = vld [vmem:[#allocation14 + $0x9a4] ss:$28 sps:$4 sm:$0xff]   ;;  %v7552_v7 = vld [vmem:[#allocation14 + $0x96c] ss:$28 sps:$4 sm:$0xff]  }
 0x336   :  { %v2543_v10 = vpop.f32.mrf.mxu1  ;;  %v7606_v5 = vld [vmem:[#allocation14 + $0xa84] ss:$28 sps:$4 sm:$0xff]  }
 0x337   :  { %v2544_v11 = vadd.f32 %v2543_v10, %v1110_v55  ;;  %v2586_v12 = vpop.f32.mrf.mxu0  ;;  %5761 = vmatpush1.bf16.msra.mxu1 %v7517_v4  ;;  %v2585_v14 = vadd.f32 %v2584_v9, %v2542_v8  ;;  %v2781_v32 = vmul.f32 0.2, %v2583_v17  ;;  %vm2765_vm2 = vcmp.gt.f32.partialorder %v2583_v17, 0.0  ;;  %v7592_v55 = vld [vmem:[#allocation14 + $0xaf0] ss:$28 sps:$4 sm:$0xff]  }
 0x338   :  { %v2545_v15 = vpop.f32.mrf.mxu1  ;;  %5762 = vmatprep.subr.bf16.mxu1 %v7522_v6  ;;  %v7598_v4 = vld [vmem:[#allocation14 + $0xab8] ss:$28 sps:$4 sm:$0xff]   ;;  %v7547_v6 = vld [vmem:[#allocation14 + $0x9a0] ss:$28 sps:$4 sm:$0xff]   ;;  %v7612_v9 = vld [vmem:[#allocation14 + $0xdcc] ss:$28 sps:$4 sm:$0xff]  }
 0x339   :  { %v2587_v18 = vadd.f32 %v2586_v12, %v2544_v11  ;;  %v2546_v19 = vadd.f32 %v2545_v15, %v1114_v1  ;;  %v2588_v21 = vpop.f32.mrf.mxu0  ;;  %v2782_v24 = vmul.f32 0.2, %v2585_v14  ;;  %vm2766_vm1 = vcmp.gt.f32.partialorder %v2585_v14, 0.0  ;;  %v7600_v1 = vld [vmem:[#allocation14 + $0xabc] ss:$28 sps:$4 sm:$0xff]  }
 0x33a   :  { %v2797_v43 = vsel %vm2765_vm2, %v2583_v17, %v2781_v32  ;;  %v7604_v8 = vld [vmem:[#allocation14 + $0xa80] ss:$28 sps:$4 sm:$0xff]   ;;  %v7550_v10 = vld [vmem:[#allocation14 + $0x968] ss:$28 sps:$4 sm:$0xff]   ;;  %v7555_v11 = vld [vmem:[#allocation14 + $0x934] ss:$28 sps:$4 sm:$0xff]  }
 0x33b   :  { %v2789_v20 = vmul.f32 0.2, %v2587_v18  ;;  %5763 = vmatpush1.bf16.msra.mxu1 %v7520_v13  ;;  %vm2773_vm0 = vcmp.gt.f32.partialorder %v2587_v18, 0.0  ;;  %v2589_v25 = vadd.f32 %v2588_v21, %v2546_v19  ;;  %v2798_v37 = vsel %vm2766_vm1, %v2585_v14, %v2782_v24  ;;  %v7610_v12 = vld [vmem:[#allocation14 + $0xdc8] ss:$28 sps:$4 sm:$0xff]  }
 0x33c   :  { %5764 = vmatprep.subr.bf16.mxu1 %v7525_v16  ;;  %v7618_v13 = vld [vmem:[#allocation14 + $0xd94] ss:$28 sps:$4 sm:$0xff]   ;;  %v7558_v15 = vld [vmem:[#allocation14 + $0x8fc] ss:$28 sps:$4 sm:$0xff]   ;;  %v7561_v19 = vld [vmem:[#allocation14 + $0x8c4] ss:$28 sps:$4 sm:$0xff]  }
 0x33d   :  { %vm2774_vm3 = vcmp.gt.f32.partialorder %v2589_v25, 0.0  ;;  %v2790_v33 = vmul.f32 0.2, %v2589_v25  ;;  %v2805_v34 = vsel %vm2773_vm0, %v2587_v18, %v2789_v20  ;;  %v7553_v14 = vld [vmem:[#allocation14 + $0x930] ss:$28 sps:$4 sm:$0xff]  }
 0x33e   :  { %v8495_v41 = vpack.c.bf16 %v2805_v34, %v2797_v43  ;;  %v7616_v16 = vld [vmem:[#allocation14 + $0xd90] ss:$28 sps:$4 sm:$0xff]   ;;  %v7624_v17 = vld [vmem:[#allocation14 + $0xd5c] ss:$28 sps:$4 sm:$0xff]   ;;  %v7630_v21 = vld [vmem:[#allocation14 + $0xd24] ss:$28 sps:$4 sm:$0xff]  }
 0x33f   :  { %5765 = vmatpush1.bf16.msra.mxu1 %v7523_v23  ;;  %v2806_v35 = vsel %vm2774_vm3, %v2589_v25, %v2790_v33  ;;  %v7556_v18 = vld [vmem:[#allocation14 + $0x8f8] ss:$28 sps:$4 sm:$0xff]   ;;  %v7559_v23 = vld [vmem:[#allocation14 + $0x8c0] ss:$28 sps:$4 sm:$0xff]   ;;  %v1117_v25 = vsub.s32 4, %v8398_v27 }
 0x340   :  { %5766 = vmatprep.subr.bf16.mxu1 %v7528_v26  ;;  %v8493_v42 = vpack.c.bf16 %v2806_v35, %v2798_v37  ;;  %v7622_v20 = vld [vmem:[#allocation14 + $0xd58] ss:$28 sps:$4 sm:$0xff]   ;;  %v1121_v26 = vsub.s32 5, %v8398_v27  ;;  %v7628_v32 = vld [vmem:[#allocation14 + $0xd20] ss:$28 sps:$4 sm:$0xff]  }
 0x341   :  { %v7567_v24 = vld [vmem:[#allocation14 + $0x194] ss:$28 sps:$4 sm:$0xff]   ;;  %v7636_v33 = vld [vmem:[#allocation14 + $0xcec] ss:$28 sps:$4 sm:$0xff]   ;;  %v1118_v34 = vrot.slane %v8463_v22, %v1117_v25 }
 0x342   :  { %5747 = vmatprep.mubr.bf16.mxu0 %v8493_v42  ;;  %v7634_v37 = vld [vmem:[#allocation14 + $0xce8] ss:$28 sps:$4 sm:$0xff]  }
 0x343   :  { %5767 = vmatpush1.bf16.msra.mxu1 %v7526_v36  ;;  %5748 = vmatmul.mubr.bf16.vlgmr.msra.gmra.mxu0 %v8495_v41  ;;  %v1122_v36 = vrot.slane %v8463_v22, %v1121_v26 }
 0x344   :  { %5768 = vmatprep.subr.bf16.mxu1 %v7531_v38  ;;  %5802 = vmatpush1.bf16.msra.mxu0 %v7562_v44  ;;  %v7642_v38 = vld [vmem:[#allocation14 + $0xcb4] ss:$28 sps:$4 sm:$0xff]  }
 0x345   :  { %5803 = vmatprep.subr.bf16.mxu0 %v7570_v45 }
 0x347   :  { %5769 = vmatpush1.bf16.msra.mxu1 %v7529_v46 }
 0x348   :  { %5770 = vmatprep.subr.bf16.mxu1 %v7534_v47  ;;  %5804 = vmatpush1.bf16.msra.mxu0 %v7568_v48  ;;  %v7640_v48 = vld [vmem:[#allocation14 + $0xcb0] ss:$28 sps:$4 sm:$0xff]  }
 0x349   :  { %5805 = vmatprep.subr.bf16.mxu0 %v7576_v52 }
 0x34b   :  { %5771 = vmatpush1.bf16.msra.mxu1 %v7532_v56  ;;  %v7648_v56 = vld [vmem:[#allocation14 + $0xc7c] ss:$28 sps:$4 sm:$0xff]  }
 0x34c   :  { %5772 = vmatprep.subr.bf16.mxu1 %v7537_v39  ;;  %5806 = vmatpush1.bf16.msra.mxu0 %v7574_v57 }
 0x34d   :  { %5807 = vmatprep.subr.bf16.mxu0 %v7582_v60 }
 0x34f   :  { %5773 = vmatpush1.bf16.msra.mxu1 %v7535_v28 }
 0x350   :  { %5774 = vmatprep.subr.bf16.mxu1 %v7540_v61  ;;  %5808 = vmatpush1.bf16.msra.mxu0 %v7580_v62 }
 0x351   :  { %5809 = vmatprep.subr.bf16.mxu0 %v7588_v40  ;;  %v7646_v40 = vld [vmem:[#allocation14 + $0xc78] ss:$28 sps:$4 sm:$0xff]  }
 0x353   :  { %5775 = vmatpush2.bf16.msra.mxu1 %v7538_v63 }
 0x354   :  { %5776 = vmatprep.subr.bf16.mxu1 %v7543_v0  ;;  %5810 = vmatpush1.bf16.msra.mxu0 %v7586_v31  ;;  %v7654_v0 = vld [vmem:[#allocation14 + $0xc44] ss:$28 sps:$4 sm:$0xff]  }
 0x355   :  { %5811 = vmatprep.subr.bf16.mxu0 %v7594_v49 }
 0x357   :  { %5777 = vmatpush2.bf16.msra.mxu1 %v7541_v50 }
 0x358   :  { %5778 = vmatprep.subr.bf16.mxu1 %v7546_v53  ;;  %5812 = vmatpush1.bf16.msra.mxu0 %v7592_v55 }
 0x359   :  { %5813 = vmatprep.subr.bf16.mxu0 %v7600_v1  ;;  %v7652_v1 = vld [vmem:[#allocation14 + $0xc40] ss:$28 sps:$4 sm:$0xff]  }
 0x35b   :  { %5779 = vmatpush2.bf16.msra.mxu1 %v7544_v2 }
 0x35c   :  { %5780 = vmatprep.subr.bf16.mxu1 %v7549_v3  ;;  %5814 = vmatpush1.bf16.msra.mxu0 %v7598_v4  ;;  %v7660_v3 = vld [vmem:[#allocation14 + $0x514] ss:$28 sps:$4 sm:$0xff]  }
 0x35d   :  { %5815 = vmatprep.subr.bf16.mxu0 %v7606_v5 }
 0x35f   :  { %5781 = vmatpush2.bf16.msra.mxu1 %v7547_v6 }
 0x360   :  { %5782 = vmatprep.subr.bf16.mxu1 %v7552_v7  ;;  %5816 = vmatpush1.bf16.msra.mxu0 %v7604_v8 }
 0x361   :  { %5817 = vmatprep.subr.bf16.mxu0 %v7612_v9  ;;  %v7565_v9 = vld [vmem:[#allocation14 + $0x190] ss:$28 sps:$4 sm:$0xff]  }
 0x363   :  { %5783 = vmatpush2.bf16.msra.mxu1 %v7550_v10 }
 0x364   :  { %5784 = vmatprep.subr.bf16.mxu1 %v7555_v11  ;;  %5818 = vmatpush2.bf16.msra.mxu0 %v7610_v12  ;;  %v7573_v11 = vld [vmem:[#allocation14 + $0x15c] ss:$28 sps:$4 sm:$0xff]  }
 0x365   :  { %5819 = vmatprep.subr.bf16.mxu0 %v7618_v13  ;;  %v7571_v12 = vld [vmem:[#allocation14 + $0x158] ss:$28 sps:$4 sm:$0xff]   ;;  %v7579_v13 = vld [vmem:[#allocation14 + $0x124] ss:$28 sps:$4 sm:$0xff]  }
 0x367   :  { %5785 = vmatpush2.bf16.msra.mxu1 %v7553_v14  ;;  %v7577_v14 = vld [vmem:[#allocation14 + $0x120] ss:$28 sps:$4 sm:$0xff]  }
 0x368   :  { %5786 = vmatprep.subr.bf16.mxu1 %v7558_v15  ;;  %5820 = vmatpush2.bf16.msra.mxu0 %v7616_v16  ;;  %v7585_v15 = vld [vmem:[#allocation14 + $0xec] ss:$28 sps:$4 sm:$0xff]  }
 0x369   :  { %5821 = vmatprep.subr.bf16.mxu0 %v7624_v17  ;;  %v7583_v16 = vld [vmem:[#allocation14 + $0xe8] ss:$28 sps:$4 sm:$0xff]   ;;  %v7591_v17 = vld [vmem:[#allocation14 + $0xb4] ss:$28 sps:$4 sm:$0xff]  }
 0x36b   :  { %5787 = vmatpush2.bf16.msra.mxu1 %v7556_v18  ;;  %v7589_v18 = vld [vmem:[#allocation14 + $0xb0] ss:$28 sps:$4 sm:$0xff]  }
 0x36c   :  { %5788 = vmatprep.subr.bf16.mxu1 %v7561_v19  ;;  %5822 = vmatpush2.bf16.msra.mxu0 %v7622_v20  ;;  %v7597_v19 = vld [vmem:[#allocation14 + $0x7c] ss:$28 sps:$4 sm:$0xff]  }
 0x36d   :  { %5823 = vmatprep.subr.bf16.mxu0 %v7630_v21  ;;  %v7595_v20 = vld [vmem:[#allocation14 + $0x78] ss:$28 sps:$4 sm:$0xff]   ;;  %v7603_v21 = vld [vmem:[#allocation14 + $0x44] ss:$28 sps:$4 sm:$0xff]  }
 0x36f   :  { %5789 = vmatpush2.bf16.msra.mxu1 %v7559_v23  ;;  %v7601_v23 = vld [vmem:[#allocation14 + $0x40] ss:$28 sps:$4 sm:$0xff]  }
 0x370   :  { %5844 = vmatprep.subr.bf16.mxu1 %v7567_v24  ;;  %5824 = vmatpush2.bf16.msra.mxu0 %v7628_v32  ;;  %v7609_v24 = vld [vmem:[#allocation14 + $0xc] ss:$28 sps:$4 sm:$0xff]  }
 0x371   :  { %5825 = vmatprep.subr.bf16.mxu0 %v7636_v33  ;;  %v7607_v32 = vld [vmem:[#allocation14 + $0x8] ss:$28 sps:$4 sm:$0xff]   ;;  %v7615_v33 = vld [vmem:[#allocation14 + $0x354] ss:$28 sps:$4 sm:$0xff]  }
 0x372   :  { %v2625_v35 = vpop.f32.mrf.mxu1 }
 0x373   :  { %v2668_v43 = vpop.f32.mrf.mxu0  ;;  %v2626_v45 = vadd.f32 %v2625_v35, %v1118_v34  ;;  %v7627_v35 = vld [vmem:[#allocation14 + $0x2e4] ss:$28 sps:$4 sm:$0xff]  }
 0x374   :  { %v2627_v44 = vpop.f32.mrf.mxu1  ;;  %5826 = vmatpush2.bf16.msra.mxu0 %v7634_v37  ;;  %v7619_v37 = vld [vmem:[#allocation14 + $0x318] ss:$28 sps:$4 sm:$0xff]  }
 0x375   :  { %v2628_v46 = vadd.f32 %v2627_v44, %v1122_v36  ;;  %v2670_v47 = vpop.f32.mrf.mxu0  ;;  %5827 = vmatprep.subr.bf16.mxu0 %v7642_v38  ;;  %v2669_v61 = vadd.f32 %v2668_v43, %v2626_v45  ;;  %v7625_v38 = vld [vmem:[#allocation14 + $0x2e0] ss:$28 sps:$4 sm:$0xff]   ;;  %v7633_v43 = vld [vmem:[#allocation14 + $0x2ac] ss:$28 sps:$4 sm:$0xff]   ;;  %v1125_v45 = vsub.s32 6, %v8398_v27 }
 0x376   :  { %v2629_v52 = vpop.f32.mrf.mxu1  ;;  %v7631_v44 = vld [vmem:[#allocation14 + $0x2a8] ss:$28 sps:$4 sm:$0xff]  }
 0x377   :  { %v2630_v39 = vadd.f32 %v2629_v52, %v1118_v34  ;;  %v2672_v57 = vpop.f32.mrf.mxu0  ;;  %v2671_v60 = vadd.f32 %v2670_v47, %v2628_v46  ;;  %v2783_v55 = vmul.f32 0.2, %v2669_v61  ;;  %vm2767_vm6 = vcmp.gt.f32.partialorder %v2669_v61, 0.0  ;;  %v7613_v34 = vld [vmem:[#allocation14 + $0x350] ss:$28 sps:$4 sm:$0xff]  }
 0x378   :  { %v2631_v28 = vpop.f32.mrf.mxu1  ;;  %5828 = vmatpush2.bf16.msra.mxu0 %v7640_v48  ;;  %v1129_v46 = vsub.s32 7, %v8398_v27  ;;  %v7639_v47 = vld [vmem:[#allocation14 + $0x274] ss:$28 sps:$4 sm:$0xff]   ;;  %v1126_v48 = vrot.slane %v8463_v22, %v1125_v45 }
 0x379   :  { %v2673_v62 = vadd.f32 %v2672_v57, %v2630_v39  ;;  %v2632_v63 = vadd.f32 %v2631_v28, %v1122_v36  ;;  %5829 = vmatprep.subr.bf16.mxu0 %v7648_v56  ;;  %v2674_v49 = vpop.f32.mrf.mxu0  ;;  %v2784_v50 = vmul.f32 0.2, %v2671_v60  ;;  %vm2768_vm5 = vcmp.gt.f32.partialorder %v2671_v60, 0.0  ;;  %v7621_v36 = vld [vmem:[#allocation14 + $0x31c] ss:$28 sps:$4 sm:$0xff]  }
 0x37a   :  { %v2799_v7 = vsel %vm2767_vm6, %v2669_v61, %v2783_v55  ;;  %v7637_v52 = vld [vmem:[#allocation14 + $0x270] ss:$28 sps:$4 sm:$0xff]   ;;  %v1130_v56 = vrot.slane %v8463_v22, %v1129_v46  ;;  %v7645_v57 = vld [vmem:[#allocation14 + $0x23c] ss:$28 sps:$4 sm:$0xff]   ;;  %v7676_v46 = vld [vmem:[#allocation14 + $0x468] ss:$28 sps:$4 sm:$0xff]  }
 0x37b   :  { %v2791_v31 = vmul.f32 0.2, %v2673_v62  ;;  %vm2775_vm4 = vcmp.gt.f32.partialorder %v2673_v62, 0.0  ;;  %v2675_v53 = vadd.f32 %v2674_v49, %v2632_v63  ;;  %v2800_v5 = vsel %vm2768_vm5, %v2671_v60, %v2784_v50  ;;  %v7643_v63 = vld [vmem:[#allocation14 + $0x238] ss:$28 sps:$4 sm:$0xff]  }
 0x37c   :  { %5830 = vmatpush2.bf16.msra.mxu0 %v7646_v40  ;;  %v7649_v22 = vld [vmem:[#allocation14 + $0x200] ss:$28 sps:$4 sm:$0xff]  }
 0x37d   :  { %vm2776_vm7 = vcmp.gt.f32.partialorder %v2675_v53, 0.0  ;;  %v2792_v2 = vmul.f32 0.2, %v2675_v53  ;;  %5831 = vmatprep.subr.bf16.mxu0 %v7654_v0  ;;  %v2807_v4 = vsel %vm2775_vm4, %v2673_v62, %v2791_v31  ;;  %v7651_v31 = vld [vmem:[#allocation14 + $0x204] ss:$28 sps:$4 sm:$0xff]  }
 0x37e   :  { %v8509_v10 = vpack.c.bf16 %v2807_v4, %v2799_v7  ;;  %v7657_v4 = vld [vmem:[#allocation14 + $0x1cc] ss:$28 sps:$4 sm:$0xff]  }
 0x37f   :  { %v2808_v6 = vsel %vm2776_vm7, %v2675_v53, %v2792_v2 }
 0x380   :  { %v8507_v8 = vpack.c.bf16 %v2808_v6, %v2800_v5  ;;  %5832 = vmatpush2.bf16.msra.mxu0 %v7652_v1 }
 0x381   :  { %5887 = vmatprep.subr.bf16.mxu0 %v7660_v3 }
 0x382   :  { %5790 = vmatprep.mubr.bf16.mxu1 %v8507_v8 }
 0x383   :  { %5791 = vmatmul.mubr.bf16.vlgmr.msra.gmra.mxu1 %v8509_v10 }
 0x384   :  { %5845 = vmatpush1.bf16.msra.mxu1 %v7565_v9  ;;  %5876 = vmatprep.mubr.bf16.mxu1 %v8477_v54 }
 0x385   :  { %5846 = vmatprep.subr.bf16.mxu1 %v7573_v11 }
 0x388   :  { %5847 = vmatpush1.bf16.msra.mxu1 %v7571_v12  ;;  %v7655_v12 = vld [vmem:[#allocation14 + $0x1c8] ss:$28 sps:$4 sm:$0xff]  }
 0x389   :  { %5848 = vmatprep.subr.bf16.mxu1 %v7579_v13 }
 0x38c   :  { %5849 = vmatpush1.bf16.msra.mxu1 %v7577_v14  ;;  %v7663_v14 = vld [vmem:[#allocation14 + $0x894] ss:$28 sps:$4 sm:$0xff]  }
 0x38d   :  { %5850 = vmatprep.subr.bf16.mxu1 %v7585_v15 }
 0x390   :  { %5851 = vmatpush1.bf16.msra.mxu1 %v7583_v16 }
 0x391   :  { %5852 = vmatprep.subr.bf16.mxu1 %v7591_v17 }
 0x394   :  { %5853 = vmatpush1.bf16.msra.mxu1 %v7589_v18 }
 0x395   :  { %5854 = vmatprep.subr.bf16.mxu1 %v7597_v19 }
 0x398   :  { %5855 = vmatpush1.bf16.msra.mxu1 %v7595_v20  ;;  %v7658_v20 = vld [vmem:[#allocation14 + $0x510] ss:$28 sps:$4 sm:$0xff]  }
 0x399   :  { %5856 = vmatprep.subr.bf16.mxu1 %v7603_v21  ;;  %v7661_v21 = vld [vmem:[#allocation14 + $0x890] ss:$28 sps:$4 sm:$0xff]  }
 0x39c   :  { %5857 = vmatpush1.bf16.msra.mxu1 %v7601_v23 }
 0x39d   :  { %5858 = vmatprep.subr.bf16.mxu1 %v7609_v24  ;;  %v7666_v24 = vld [vmem:[#allocation14 + $0x4dc] ss:$28 sps:$4 sm:$0xff]  }
 0x3a0   :  { %5859 = vmatpush1.bf16.msra.mxu1 %v7607_v32  ;;  %v7669_v32 = vld [vmem:[#allocation14 + $0x85c] ss:$28 sps:$4 sm:$0xff]  }
 0x3a1   :  { %5860 = vmatprep.subr.bf16.mxu1 %v7615_v33  ;;  %v7664_v33 = vld [vmem:[#allocation14 + $0x4d8] ss:$28 sps:$4 sm:$0xff]  }
 0x3a4   :  { %5861 = vmatpush2.bf16.msra.mxu1 %v7613_v34  ;;  %v7667_v34 = vld [vmem:[#allocation14 + $0x858] ss:$28 sps:$4 sm:$0xff]  }
 0x3a5   :  { %5862 = vmatprep.subr.bf16.mxu1 %v7621_v36  ;;  %v7672_v36 = vld [vmem:[#allocation14 + $0x4a4] ss:$28 sps:$4 sm:$0xff]  }
 0x3a8   :  { %5863 = vmatpush2.bf16.msra.mxu1 %v7619_v37  ;;  %v7675_v37 = vld [vmem:[#allocation14 + $0x824] ss:$28 sps:$4 sm:$0xff]  }
 0x3a9   :  { %5864 = vmatprep.subr.bf16.mxu1 %v7627_v35  ;;  %v7670_v35 = vld [vmem:[#allocation14 + $0x4a0] ss:$28 sps:$4 sm:$0xff]  }
 0x3ac   :  { %5865 = vmatpush2.bf16.msra.mxu1 %v7625_v38  ;;  %v7673_v38 = vld [vmem:[#allocation14 + $0x820] ss:$28 sps:$4 sm:$0xff]  }
 0x3ad   :  { %5866 = vmatprep.subr.bf16.mxu1 %v7633_v43  ;;  %v7678_v43 = vld [vmem:[#allocation14 + $0x46c] ss:$28 sps:$4 sm:$0xff]  }
 0x3b0   :  { %5867 = vmatpush2.bf16.msra.mxu1 %v7631_v44  ;;  %v7681_v44 = vld [vmem:[#allocation14 + $0x7ec] ss:$28 sps:$4 sm:$0xff]  }
 0x3b1   :  { %5868 = vmatprep.subr.bf16.mxu1 %v7639_v47  ;;  %v7679_v47 = vld [vmem:[#allocation14 + $0x7e8] ss:$28 sps:$4 sm:$0xff]  }
 0x3b2   :  { %v2711_v39 = vpop.f32.mrf.mxu1 }
 0x3b3   :  { %v2754_v60 = vpop.f32.mrf.mxu0  ;;  %v2712_v61 = vadd.f32 %v2711_v39, %v1126_v48  ;;  %v7685_v39 = vld [vmem:[#allocation14 + $0x7b0] ss:$28 sps:$4 sm:$0xff]  }
 0x3b4   :  { %v2713_v28 = vpop.f32.mrf.mxu1  ;;  %5869 = vmatpush2.bf16.msra.mxu1 %v7637_v52  ;;  %v7687_v52 = vld [vmem:[#allocation14 + $0x7b4] ss:$28 sps:$4 sm:$0xff]  }
 0x3b5   :  { %v2714_v62 = vadd.f32 %v2713_v28, %v1130_v56  ;;  %v2756_v40 = vpop.f32.mrf.mxu0  ;;  %5870 = vmatprep.subr.bf16.mxu1 %v7645_v57  ;;  %v2755_v1 = vadd.f32 %v2754_v60, %v2712_v61  ;;  %v7690_v57 = vld [vmem:[#allocation14 + $0x3fc] ss:$28 sps:$4 sm:$0xff]  }
 0x3b6   :  { %v2715_v0 = vpop.f32.mrf.mxu1  ;;  %v7693_v60 = vld [vmem:[#allocation14 + $0x77c] ss:$28 sps:$4 sm:$0xff]  }
 0x3b7   :  { %v2716_v49 = vadd.f32 %v2715_v0, %v1126_v48  ;;  %v2758_v50 = vpop.f32.mrf.mxu0  ;;  %v2757_v53 = vadd.f32 %v2756_v40, %v2714_v62  ;;  %v2785_v11 = vmul.f32 0.2, %v2755_v1  ;;  %vm2769_vm10 = vcmp.gt.f32.partialorder %v2755_v1, 0.0  ;;  %v7684_v48 = vld [vmem:[#allocation14 + $0x434] ss:$28 sps:$4 sm:$0xff]  }
 0x3b8   :  { %v2717_v55 = vpop.f32.mrf.mxu1  ;;  %5871 = vmatpush2.bf16.msra.mxu1 %v7643_v63  ;;  %v7688_v28 = vld [vmem:[#allocation14 + $0x3f8] ss:$28 sps:$4 sm:$0xff]   ;;  %v7696_v62 = vld [vmem:[#allocation14 + $0x3c4] ss:$28 sps:$4 sm:$0xff]  }
 0x3b9   :  { %v2759_v2 = vadd.f32 %v2758_v50, %v2716_v49  ;;  %v2718_v3 = vadd.f32 %v2717_v55, %v1130_v56  ;;  %5872 = vmatprep.subr.bf16.mxu1 %v7651_v31  ;;  %v2760_v6 = vpop.f32.mrf.mxu0  ;;  %v2786_v7 = vmul.f32 0.2, %v2757_v53  ;;  %vm2770_vm9 = vcmp.gt.f32.partialorder %v2757_v53, 0.0  ;;  %v7682_v56 = vld [vmem:[#allocation14 + $0x430] ss:$28 sps:$4 sm:$0xff]  }
 0x3ba   :  { %v2801_v18 = vsel %vm2769_vm10, %v2755_v1, %v2785_v11  ;;  %v7691_v61 = vld [vmem:[#allocation14 + $0x778] ss:$28 sps:$4 sm:$0xff]   ;;  %v7699_v40 = vld [vmem:[#allocation14 + $0x744] ss:$28 sps:$4 sm:$0xff]   ;;  %v7702_v31 = vld [vmem:[#allocation14 + $0x38c] ss:$28 sps:$4 sm:$0xff]  }
 0x3bb   :  { %v2793_v5 = vmul.f32 0.2, %v2759_v2  ;;  %vm2777_vm8 = vcmp.gt.f32.partialorder %v2759_v2, 0.0  ;;  %v2761_v9 = vadd.f32 %v2760_v6, %v2718_v3  ;;  %v2802_v16 = vsel %vm2770_vm9, %v2757_v53, %v2786_v7  ;;  %v7694_v63 = vld [vmem:[#allocation14 + $0x3c0] ss:$28 sps:$4 sm:$0xff]  }
 0x3bc   :  { %5873 = vmatpush2.bf16.msra.mxu1 %v7649_v22  ;;  %v7697_v0 = vld [vmem:[#allocation14 + $0x740] ss:$28 sps:$4 sm:$0xff]   ;;  %v7705_v49 = vld [vmem:[#allocation14 + $0x70c] ss:$28 sps:$4 sm:$0xff]   ;;  %v7708_v55 = vld [vmem:[#allocation14 + $0x6d4] ss:$28 sps:$4 sm:$0xff]  }
 0x3bd   :  { %vm2778_vm11 = vcmp.gt.f32.partialorder %v2761_v9, 0.0  ;;  %v2794_v13 = vmul.f32 0.2, %v2761_v9  ;;  %5874 = vmatprep.subr.bf16.mxu1 %v7657_v4  ;;  %v2809_v15 = vsel %vm2777_vm8, %v2759_v2, %v2793_v5  ;;  %v7700_v50 = vld [vmem:[#allocation14 + $0x388] ss:$28 sps:$4 sm:$0xff]  }
 0x3be   :  { %v8522_v23 = vpack.c.bf16 %v2809_v15, %v2801_v18  ;;  %v7703_v53 = vld [vmem:[#allocation14 + $0x708] ss:$28 sps:$4 sm:$0xff]   ;;  %v7711_v1 = vld [vmem:[#allocation14 + $0xa54] ss:$28 sps:$4 sm:$0xff]   ;;  %v7714_v3 = vld [vmem:[#allocation14 + $0x69c] ss:$28 sps:$4 sm:$0xff]  }
 0x3bf   :  { %v2810_v17 = vsel %vm2778_vm11, %v2761_v9, %v2794_v13  ;;  %v7706_v2 = vld [vmem:[#allocation14 + $0x6d0] ss:$28 sps:$4 sm:$0xff]   ;;  %v7717_v4 = vld [vmem:[#allocation14 + $0xa1c] ss:$28 sps:$4 sm:$0xff]   ;;  %v7720_v7 = vld [vmem:[#allocation14 + $0x664] ss:$28 sps:$4 sm:$0xff]  }
 0x3c0   :  { %v8520_v19 = vpack.c.bf16 %v2810_v17, %v2802_v16  ;;  %5875 = vmatpush2.bf16.msra.mxu1 %v7655_v12  ;;  %v7709_v22 = vld [vmem:[#allocation14 + $0xa50] ss:$28 sps:$4 sm:$0xff]   ;;  %v7712_v5 = vld [vmem:[#allocation14 + $0x698] ss:$28 sps:$4 sm:$0xff]   ;;  %v7723_v9 = vld [vmem:[#allocation14 + $0x9e4] ss:$28 sps:$4 sm:$0xff]  }
 0x3c1   :  { %5930 = vmatprep.subr.bf16.mxu1 %v7663_v14  ;;  %v7715_v6 = vld [vmem:[#allocation14 + $0xa18] ss:$28 sps:$4 sm:$0xff]   ;;  %v7718_v11 = vld [vmem:[#allocation14 + $0x660] ss:$28 sps:$4 sm:$0xff]   ;;  %v7726_v13 = vld [vmem:[#allocation14 + $0x62c] ss:$28 sps:$4 sm:$0xff]  }
 0x3c2   :  { %5833 = vmatprep.mubr.bf16.mxu0 %v8520_v19  ;;  %v7721_v12 = vld [vmem:[#allocation14 + $0x9e0] ss:$28 sps:$4 sm:$0xff]   ;;  %v7729_v14 = vld [vmem:[#allocation14 + $0x9ac] ss:$28 sps:$4 sm:$0xff]   ;;  %v7732_v17 = vld [vmem:[#allocation14 + $0x5f4] ss:$28 sps:$4 sm:$0xff]  }
 0x3c3   :  { %5877 = vmatmul.mubr.bf16.vlgmr.msra.gmra.mxu1 %v8486_v51  ;;  %5834 = vmatmul.mubr.bf16.vlgmr.msra.gmra.mxu0 %v8522_v23  ;;  %v7724_v15 = vld [vmem:[#allocation14 + $0x628] ss:$28 sps:$4 sm:$0xff]   ;;  %v7735_v18 = vld [vmem:[#allocation14 + $0x974] ss:$28 sps:$4 sm:$0xff]  }
 0x3c4   :  { %5888 = vmatpush1.bf16.msra.mxu0 %v7658_v20  ;;  %5931 = vmatpush1.bf16.msra.mxu1 %v7661_v21  ;;  %v7727_v16 = vld [vmem:[#allocation14 + $0x9a8] ss:$28 sps:$4 sm:$0xff]   ;;  %v7730_v20 = vld [vmem:[#allocation14 + $0x5f0] ss:$28 sps:$4 sm:$0xff]  }
 0x3c5   :  { %5962 = vmatprep.mubr.bf16.mxu1 %v8507_v8  ;;  %5919 = vmatprep.mubr.bf16.mxu0 %v8493_v42  ;;  %v7733_v21 = vld [vmem:[#allocation14 + $0x970] ss:$28 sps:$4 sm:$0xff]  }
 0x3c6   :  { %5889 = vmatprep.subr.bf16.mxu0 %v7666_v24  ;;  %5932 = vmatprep.subr.bf16.mxu1 %v7669_v32  ;;  %v7738_v24 = vld [vmem:[#allocation14 + $0x5bc] ss:$28 sps:$4 sm:$0xff]  }
 0x3c7   :  { %v7741_v32 = vld [vmem:[#allocation14 + $0x93c] ss:$28 sps:$4 sm:$0xff]  }
 0x3c8   :  { %5890 = vmatpush1.bf16.msra.mxu0 %v7664_v33  ;;  %5933 = vmatpush1.bf16.msra.mxu1 %v7667_v34  ;;  %v7736_v33 = vld [vmem:[#allocation14 + $0x5b8] ss:$28 sps:$4 sm:$0xff]  }
 0x3c9   :  { %5891 = vmatprep.subr.bf16.mxu0 %v7672_v36  ;;  %5934 = vmatprep.subr.bf16.mxu1 %v7675_v37  ;;  %v7739_v34 = vld [vmem:[#allocation14 + $0x938] ss:$28 sps:$4 sm:$0xff]   ;;  %v7744_v36 = vld [vmem:[#allocation14 + $0x584] ss:$28 sps:$4 sm:$0xff]  }
 0x3ca   :  { %v7747_v37 = vld [vmem:[#allocation14 + $0x904] ss:$28 sps:$4 sm:$0xff]  }
 0x3cc   :  { %5892 = vmatpush1.bf16.msra.mxu0 %v7670_v35  ;;  %5935 = vmatpush1.bf16.msra.mxu1 %v7673_v38  ;;  %v7742_v35 = vld [vmem:[#allocation14 + $0x580] ss:$28 sps:$4 sm:$0xff]  }
 0x3cd   :  { %5893 = vmatprep.subr.bf16.mxu0 %v7678_v43  ;;  %5936 = vmatprep.subr.bf16.mxu1 %v7681_v44  ;;  %v7745_v38 = vld [vmem:[#allocation14 + $0x900] ss:$28 sps:$4 sm:$0xff]   ;;  %v7750_v43 = vld [vmem:[#allocation14 + $0x54c] ss:$28 sps:$4 sm:$0xff]  }
 0x3ce   :  { %v7753_v44 = vld [vmem:[#allocation14 + $0x8cc] ss:$28 sps:$4 sm:$0xff]  }
 0x3d0   :  { %5894 = vmatpush1.bf16.msra.mxu0 %v7676_v46  ;;  %5937 = vmatpush1.bf16.msra.mxu1 %v7679_v47  ;;  %v7748_v46 = vld [vmem:[#allocation14 + $0x548] ss:$28 sps:$4 sm:$0xff]  }
 0x3d1   :  { %5895 = vmatprep.subr.bf16.mxu0 %v7684_v48  ;;  %5938 = vmatprep.subr.bf16.mxu1 %v7687_v52  ;;  %v7751_v47 = vld [vmem:[#allocation14 + $0x8c8] ss:$28 sps:$4 sm:$0xff]   ;;  %v7756_v48 = vld [vmem:[#allocation14 + $0xc14] ss:$28 sps:$4 sm:$0xff]   ;;  %v7759_v52 = vld [vmem:[#allocation14 + $0x19c] ss:$28 sps:$4 sm:$0xff]  }
 0x3d4   :  { %5896 = vmatpush1.bf16.msra.mxu0 %v7682_v56  ;;  %5939 = vmatpush1.bf16.msra.mxu1 %v7685_v39  ;;  %v7754_v56 = vld [vmem:[#allocation14 + $0xc10] ss:$28 sps:$4 sm:$0xff]   ;;  %v7757_v39 = vld [vmem:[#allocation14 + $0x198] ss:$28 sps:$4 sm:$0xff]  }
 0x3d5   :  { %5897 = vmatprep.subr.bf16.mxu0 %v7690_v57  ;;  %5940 = vmatprep.subr.bf16.mxu1 %v7693_v60  ;;  %v7762_v57 = vld [vmem:[#allocation14 + $0xbdc] ss:$28 sps:$4 sm:$0xff]   ;;  %v7765_v60 = vld [vmem:[#allocation14 + $0x164] ss:$28 sps:$4 sm:$0xff]  }
 0x3d8   :  { %5898 = vmatpush1.bf16.msra.mxu0 %v7688_v28  ;;  %5941 = vmatpush1.bf16.msra.mxu1 %v7691_v61  ;;  %v7760_v28 = vld [vmem:[#allocation14 + $0xbd8] ss:$28 sps:$4 sm:$0xff]   ;;  %v7763_v61 = vld [vmem:[#allocation14 + $0x160] ss:$28 sps:$4 sm:$0xff]  }
 0x3d9   :  { %5899 = vmatprep.subr.bf16.mxu0 %v7696_v62  ;;  %5942 = vmatprep.subr.bf16.mxu1 %v7699_v40  ;;  %v7768_v62 = vld [vmem:[#allocation14 + $0xba4] ss:$28 sps:$4 sm:$0xff]   ;;  %v7771_v40 = vld [vmem:[#allocation14 + $0x12c] ss:$28 sps:$4 sm:$0xff]  }
 0x3dc   :  { %5900 = vmatpush1.bf16.msra.mxu0 %v7694_v63  ;;  %5943 = vmatpush1.bf16.msra.mxu1 %v7697_v0  ;;  %v7766_v63 = vld [vmem:[#allocation14 + $0xba0] ss:$28 sps:$4 sm:$0xff]   ;;  %v7769_v0 = vld [vmem:[#allocation14 + $0x128] ss:$28 sps:$4 sm:$0xff]  }
 0x3dd   :  { %5901 = vmatprep.subr.bf16.mxu0 %v7702_v31  ;;  %5944 = vmatprep.subr.bf16.mxu1 %v7705_v49  ;;  %v7774_v31 = vld [vmem:[#allocation14 + $0xb6c] ss:$28 sps:$4 sm:$0xff]   ;;  %v7777_v49 = vld [vmem:[#allocation14 + $0xf4] ss:$28 sps:$4 sm:$0xff]  }
 0x3e0   :  { %5902 = vmatpush1.bf16.msra.mxu0 %v7700_v50  ;;  %5945 = vmatpush1.bf16.msra.mxu1 %v7703_v53  ;;  %v7772_v50 = vld [vmem:[#allocation14 + $0xb68] ss:$28 sps:$4 sm:$0xff]   ;;  %v7775_v53 = vld [vmem:[#allocation14 + $0xf0] ss:$28 sps:$4 sm:$0xff]  }
 0x3e1   :  { %5903 = vmatprep.subr.bf16.mxu0 %v7708_v55  ;;  %5946 = vmatprep.subr.bf16.mxu1 %v7711_v1  ;;  %v7780_v55 = vld [vmem:[#allocation14 + $0xb34] ss:$28 sps:$4 sm:$0xff]   ;;  %v7783_v1 = vld [vmem:[#allocation14 + $0xbc] ss:$28 sps:$4 sm:$0xff]  }
 0x3e4   :  { %5904 = vmatpush2.bf16.msra.mxu0 %v7706_v2  ;;  %5947 = vmatpush2.bf16.msra.mxu1 %v7709_v22  ;;  %v7778_v2 = vld [vmem:[#allocation14 + $0xb30] ss:$28 sps:$4 sm:$0xff]   ;;  %v7781_v22 = vld [vmem:[#allocation14 + $0xb8] ss:$28 sps:$4 sm:$0xff]  }
 0x3e5   :  { %5905 = vmatprep.subr.bf16.mxu0 %v7714_v3  ;;  %5948 = vmatprep.subr.bf16.mxu1 %v7717_v4  ;;  %v7786_v3 = vld [vmem:[#allocation14 + $0xafc] ss:$28 sps:$4 sm:$0xff]   ;;  %v7789_v4 = vld [vmem:[#allocation14 + $0x84] ss:$28 sps:$4 sm:$0xff]  }
 0x3e8   :  { %5906 = vmatpush2.bf16.msra.mxu0 %v7712_v5  ;;  %5949 = vmatpush2.bf16.msra.mxu1 %v7715_v6  ;;  %v7784_v5 = vld [vmem:[#allocation14 + $0xaf8] ss:$28 sps:$4 sm:$0xff]   ;;  %v7787_v6 = vld [vmem:[#allocation14 + $0x80] ss:$28 sps:$4 sm:$0xff]  }
 0x3e9   :  { %5907 = vmatprep.subr.bf16.mxu0 %v7720_v7  ;;  %5950 = vmatprep.subr.bf16.mxu1 %v7723_v9  ;;  %v7792_v7 = vld [vmem:[#allocation14 + $0xac4] ss:$28 sps:$4 sm:$0xff]   ;;  %v7795_v9 = vld [vmem:[#allocation14 + $0x4c] ss:$28 sps:$4 sm:$0xff]  }
 0x3ec   :  { %5908 = vmatpush2.bf16.msra.mxu0 %v7718_v11  ;;  %5951 = vmatpush2.bf16.msra.mxu1 %v7721_v12  ;;  %v7790_v11 = vld [vmem:[#allocation14 + $0xac0] ss:$28 sps:$4 sm:$0xff]   ;;  %v7793_v12 = vld [vmem:[#allocation14 + $0x48] ss:$28 sps:$4 sm:$0xff]  }
 0x3ed   :  { %5909 = vmatprep.subr.bf16.mxu0 %v7726_v13  ;;  %5952 = vmatprep.subr.bf16.mxu1 %v7729_v14  ;;  %v7798_v13 = vld [vmem:[#allocation14 + $0xa8c] ss:$28 sps:$4 sm:$0xff]   ;;  %v7801_v14 = vld [vmem:[#allocation14 + $0x14] ss:$28 sps:$4 sm:$0xff]  }
 0x3f0   :  { %5910 = vmatpush2.bf16.msra.mxu0 %v7724_v15  ;;  %5953 = vmatpush2.bf16.msra.mxu1 %v7727_v16  ;;  %v7796_v15 = vld [vmem:[#allocation14 + $0xa88] ss:$28 sps:$4 sm:$0xff]   ;;  %v7799_v16 = vld [vmem:[#allocation14 + $0x10] ss:$28 sps:$4 sm:$0xff]  }
 0x3f1   :  { %5911 = vmatprep.subr.bf16.mxu0 %v7732_v17  ;;  %5954 = vmatprep.subr.bf16.mxu1 %v7735_v18  ;;  %v7804_v17 = vld [vmem:[#allocation14 + $0xdd4] ss:$28 sps:$4 sm:$0xff]   ;;  %v7807_v18 = vld [vmem:[#allocation14 + $0x35c] ss:$28 sps:$4 sm:$0xff]  }
 0x3f4   :  { %5912 = vmatpush2.bf16.msra.mxu0 %v7730_v20  ;;  %5955 = vmatpush2.bf16.msra.mxu1 %v7733_v21  ;;  %v7802_v20 = vld [vmem:[#allocation14 + $0xdd0] ss:$28 sps:$4 sm:$0xff]   ;;  %v7805_v21 = vld [vmem:[#allocation14 + $0x358] ss:$28 sps:$4 sm:$0xff]  }
 0x3f5   :  { %5913 = vmatprep.subr.bf16.mxu0 %v7738_v24  ;;  %5956 = vmatprep.subr.bf16.mxu1 %v7741_v32  ;;  %v7810_v24 = vld [vmem:[#allocation14 + $0xd9c] ss:$28 sps:$4 sm:$0xff]   ;;  %v7813_v32 = vld [vmem:[#allocation14 + $0x324] ss:$28 sps:$4 sm:$0xff]  }
 0x3f8   :  { %5914 = vmatpush2.bf16.msra.mxu0 %v7736_v33  ;;  %5957 = vmatpush2.bf16.msra.mxu1 %v7739_v34  ;;  %v7808_v33 = vld [vmem:[#allocation14 + $0xd98] ss:$28 sps:$4 sm:$0xff]   ;;  %v7811_v34 = vld [vmem:[#allocation14 + $0x320] ss:$28 sps:$4 sm:$0xff]  }
 0x3f9   :  { %5915 = vmatprep.subr.bf16.mxu0 %v7744_v36  ;;  %5958 = vmatprep.subr.bf16.mxu1 %v7747_v37  ;;  %v7816_v36 = vld [vmem:[#allocation14 + $0xd64] ss:$28 sps:$4 sm:$0xff]   ;;  %v7819_v37 = vld [vmem:[#allocation14 + $0x2ec] ss:$28 sps:$4 sm:$0xff]  }
 0x3fc   :  { %5916 = vmatpush2.bf16.msra.mxu0 %v7742_v35  ;;  %5959 = vmatpush2.bf16.msra.mxu1 %v7745_v38  ;;  %v7814_v35 = vld [vmem:[#allocation14 + $0xd60] ss:$28 sps:$4 sm:$0xff]   ;;  %v7817_v38 = vld [vmem:[#allocation14 + $0x2e8] ss:$28 sps:$4 sm:$0xff]  }
 0x3fd   :  { %5917 = vmatprep.subr.bf16.mxu0 %v7750_v43  ;;  %5960 = vmatprep.subr.bf16.mxu1 %v7753_v44  ;;  %v7822_v43 = vld [vmem:[#allocation14 + $0xd2c] ss:$28 sps:$4 sm:$0xff]   ;;  %v7825_v44 = vld [vmem:[#allocation14 + $0x2b4] ss:$28 sps:$4 sm:$0xff]  }
 0x400   :  { %5918 = vmatpush2.bf16.msra.mxu0 %v7748_v46  ;;  %5961 = vmatpush2.bf16.msra.mxu1 %v7751_v47  ;;  %v7820_v46 = vld [vmem:[#allocation14 + $0xd28] ss:$28 sps:$4 sm:$0xff]   ;;  %v7823_v47 = vld [vmem:[#allocation14 + $0x2b0] ss:$28 sps:$4 sm:$0xff]  }
 0x401   :  { %5973 = vmatprep.subr.bf16.mxu0 %v7756_v48  ;;  %6016 = vmatprep.subr.bf16.mxu1 %v7759_v52  ;;  %v7828_v48 = vld [vmem:[#allocation14 + $0xcf4] ss:$28 sps:$4 sm:$0xff]   ;;  %v7831_v52 = vld [vmem:[#allocation14 + $0x27c] ss:$28 sps:$4 sm:$0xff]  }
 0x403   :  { %5920 = vmatmul.mubr.bf16.vlgmr.msra.gmra.mxu0 %v8495_v41  ;;  %5963 = vmatmul.mubr.bf16.vlgmr.msra.gmra.mxu1 %v8509_v10 }
 0x404   :  { %5974 = vmatpush1.bf16.msra.mxu0 %v7754_v56  ;;  %6005 = vmatprep.mubr.bf16.mxu0 %v8520_v19  ;;  %v7826_v56 = vld [vmem:[#allocation14 + $0xcf0] ss:$28 sps:$4 sm:$0xff]  }
 0x405   :  { %6017 = vmatpush1.bf16.msra.mxu1 %v7757_v39  ;;  %6048 = vmatprep.mubr.bf16.mxu1 %v8477_v54  ;;  %v7829_v39 = vld [vmem:[#allocation14 + $0x278] ss:$28 sps:$4 sm:$0xff]  }
 0x406   :  { %5975 = vmatprep.subr.bf16.mxu0 %v7762_v57  ;;  %6018 = vmatprep.subr.bf16.mxu1 %v7765_v60  ;;  %v7834_v57 = vld [vmem:[#allocation14 + $0xcbc] ss:$28 sps:$4 sm:$0xff]   ;;  %v7837_v60 = vld [vmem:[#allocation14 + $0x244] ss:$28 sps:$4 sm:$0xff]  }
 0x408   :  { %5976 = vmatpush1.bf16.msra.mxu0 %v7760_v28  ;;  %v7832_v28 = vld [vmem:[#allocation14 + $0xcb8] ss:$28 sps:$4 sm:$0xff]  }
 0x409   :  { %6019 = vmatpush1.bf16.msra.mxu1 %v7763_v61  ;;  %5977 = vmatprep.subr.bf16.mxu0 %v7768_v62  ;;  %v7835_v61 = vld [vmem:[#allocation14 + $0x240] ss:$28 sps:$4 sm:$0xff]  }
 0x40a   :  { %6020 = vmatprep.subr.bf16.mxu1 %v7771_v40  ;;  %v7840_v62 = vld [vmem:[#allocation14 + $0xc84] ss:$28 sps:$4 sm:$0xff]   ;;  %v7843_v40 = vld [vmem:[#allocation14 + $0x20c] ss:$28 sps:$4 sm:$0xff]  }
 0x40c   :  { %5978 = vmatpush1.bf16.msra.mxu0 %v7766_v63  ;;  %v7838_v63 = vld [vmem:[#allocation14 + $0xc80] ss:$28 sps:$4 sm:$0xff]  }
 0x40d   :  { %6021 = vmatpush1.bf16.msra.mxu1 %v7769_v0  ;;  %5979 = vmatprep.subr.bf16.mxu0 %v7774_v31  ;;  %v7841_v0 = vld [vmem:[#allocation14 + $0x208] ss:$28 sps:$4 sm:$0xff]  }
 0x40e   :  { %6022 = vmatprep.subr.bf16.mxu1 %v7777_v49  ;;  %v7846_v31 = vld [vmem:[#allocation14 + $0xc4c] ss:$28 sps:$4 sm:$0xff]   ;;  %v7849_v49 = vld [vmem:[#allocation14 + $0x1d4] ss:$28 sps:$4 sm:$0xff]  }
 0x410   :  { %5980 = vmatpush1.bf16.msra.mxu0 %v7772_v50  ;;  %v7844_v50 = vld [vmem:[#allocation14 + $0xc48] ss:$28 sps:$4 sm:$0xff]  }
 0x411   :  { %6023 = vmatpush1.bf16.msra.mxu1 %v7775_v53  ;;  %5981 = vmatprep.subr.bf16.mxu0 %v7780_v55  ;;  %v7847_v53 = vld [vmem:[#allocation14 + $0x1d0] ss:$28 sps:$4 sm:$0xff]   ;;  %v7852_v55 = vld [vmem:[#allocation14 + $0x51c] ss:$28 sps:$4 sm:$0xff]  }
 0x412   :  { %6024 = vmatprep.subr.bf16.mxu1 %v7783_v1  ;;  %v7855_v1 = vld [vmem:[#allocation14 + $0x89c] ss:$28 sps:$4 sm:$0xff]  }
 0x414   :  { %5982 = vmatpush1.bf16.msra.mxu0 %v7778_v2  ;;  %v7850_v2 = vld [vmem:[#allocation14 + $0x518] ss:$28 sps:$4 sm:$0xff]  }
 0x415   :  { %6025 = vmatpush1.bf16.msra.mxu1 %v7781_v22  ;;  %5983 = vmatprep.subr.bf16.mxu0 %v7786_v3  ;;  %v7853_v22 = vld [vmem:[#allocation14 + $0x898] ss:$28 sps:$4 sm:$0xff]   ;;  %v7858_v3 = vld [vmem:[#allocation14 + $0x4e4] ss:$28 sps:$4 sm:$0xff]  }
 0x416   :  { %6026 = vmatprep.subr.bf16.mxu1 %v7789_v4  ;;  %v7861_v4 = vld [vmem:[#allocation14 + $0x864] ss:$28 sps:$4 sm:$0xff]  }
 0x418   :  { %5984 = vmatpush1.bf16.msra.mxu0 %v7784_v5  ;;  %v7856_v5 = vld [vmem:[#allocation14 + $0x4e0] ss:$28 sps:$4 sm:$0xff]  }
 0x419   :  { %6027 = vmatpush1.bf16.msra.mxu1 %v7787_v6  ;;  %5985 = vmatprep.subr.bf16.mxu0 %v7792_v7  ;;  %v7859_v6 = vld [vmem:[#allocation14 + $0x860] ss:$28 sps:$4 sm:$0xff]   ;;  %v7864_v7 = vld [vmem:[#allocation14 + $0x4ac] ss:$28 sps:$4 sm:$0xff]  }
 0x41a   :  { %6028 = vmatprep.subr.bf16.mxu1 %v7795_v9  ;;  %v7867_v9 = vld [vmem:[#allocation14 + $0x82c] ss:$28 sps:$4 sm:$0xff]  }
 0x41c   :  { %5986 = vmatpush1.bf16.msra.mxu0 %v7790_v11  ;;  %v7862_v11 = vld [vmem:[#allocation14 + $0x4a8] ss:$28 sps:$4 sm:$0xff]  }
 0x41d   :  { %6029 = vmatpush1.bf16.msra.mxu1 %v7793_v12  ;;  %5987 = vmatprep.subr.bf16.mxu0 %v7798_v13  ;;  %v7865_v12 = vld [vmem:[#allocation14 + $0x828] ss:$28 sps:$4 sm:$0xff]   ;;  %v7870_v13 = vld [vmem:[#allocation14 + $0x474] ss:$28 sps:$4 sm:$0xff]  }
 0x41e   :  { %6030 = vmatprep.subr.bf16.mxu1 %v7801_v14  ;;  %v7873_v14 = vld [vmem:[#allocation14 + $0x7f4] ss:$28 sps:$4 sm:$0xff]  }
 0x420   :  { %5988 = vmatpush1.bf16.msra.mxu0 %v7796_v15  ;;  %v7868_v15 = vld [vmem:[#allocation14 + $0x470] ss:$28 sps:$4 sm:$0xff]  }
 0x421   :  { %6031 = vmatpush1.bf16.msra.mxu1 %v7799_v16  ;;  %5989 = vmatprep.subr.bf16.mxu0 %v7804_v17  ;;  %v7871_v16 = vld [vmem:[#allocation14 + $0x7f0] ss:$28 sps:$4 sm:$0xff]   ;;  %v7876_v17 = vld [vmem:[#allocation14 + $0x43c] ss:$28 sps:$4 sm:$0xff]  }
 0x422   :  { %6032 = vmatprep.subr.bf16.mxu1 %v7807_v18  ;;  %v7879_v18 = vld [vmem:[#allocation14 + $0x7bc] ss:$28 sps:$4 sm:$0xff]  }
 0x424   :  { %5990 = vmatpush2.bf16.msra.mxu0 %v7802_v20  ;;  %v7874_v20 = vld [vmem:[#allocation14 + $0x438] ss:$28 sps:$4 sm:$0xff]  }
 0x425   :  { %6033 = vmatpush2.bf16.msra.mxu1 %v7805_v21  ;;  %5991 = vmatprep.subr.bf16.mxu0 %v7810_v24  ;;  %v7877_v21 = vld [vmem:[#allocation14 + $0x7b8] ss:$28 sps:$4 sm:$0xff]   ;;  %v7882_v24 = vld [vmem:[#allocation14 + $0x404] ss:$28 sps:$4 sm:$0xff]  }
 0x426   :  { %6034 = vmatprep.subr.bf16.mxu1 %v7813_v32  ;;  %v7885_v32 = vld [vmem:[#allocation14 + $0x784] ss:$28 sps:$4 sm:$0xff]  }
 0x428   :  { %5992 = vmatpush2.bf16.msra.mxu0 %v7808_v33  ;;  %v7880_v33 = vld [vmem:[#allocation14 + $0x400] ss:$28 sps:$4 sm:$0xff]  }
 0x429   :  { %6035 = vmatpush2.bf16.msra.mxu1 %v7811_v34  ;;  %5993 = vmatprep.subr.bf16.mxu0 %v7816_v36  ;;  %v7883_v34 = vld [vmem:[#allocation14 + $0x780] ss:$28 sps:$4 sm:$0xff]   ;;  %v7888_v36 = vld [vmem:[#allocation14 + $0x3cc] ss:$28 sps:$4 sm:$0xff]  }
 0x42a   :  { %6036 = vmatprep.subr.bf16.mxu1 %v7819_v37  ;;  %v7891_v37 = vld [vmem:[#allocation14 + $0x74c] ss:$28 sps:$4 sm:$0xff]  }
 0x42c   :  { %5994 = vmatpush2.bf16.msra.mxu0 %v7814_v35  ;;  %v7886_v35 = vld [vmem:[#allocation14 + $0x3c8] ss:$28 sps:$4 sm:$0xff]  }
 0x42d   :  { %6037 = vmatpush2.bf16.msra.mxu1 %v7817_v38  ;;  %5995 = vmatprep.subr.bf16.mxu0 %v7822_v43  ;;  %v7889_v38 = vld [vmem:[#allocation14 + $0x748] ss:$28 sps:$4 sm:$0xff]   ;;  %v7894_v43 = vld [vmem:[#allocation14 + $0x394] ss:$28 sps:$4 sm:$0xff]  }
 0x42e   :  { %6038 = vmatprep.subr.bf16.mxu1 %v7825_v44  ;;  %v7897_v44 = vld [vmem:[#allocation14 + $0x714] ss:$28 sps:$4 sm:$0xff]  }
 0x430   :  { %5996 = vmatpush2.bf16.msra.mxu0 %v7820_v46  ;;  %v7892_v46 = vld [vmem:[#allocation14 + $0x390] ss:$28 sps:$4 sm:$0xff]  }
 0x431   :  { %6039 = vmatpush2.bf16.msra.mxu1 %v7823_v47  ;;  %5997 = vmatprep.subr.bf16.mxu0 %v7828_v48  ;;  %v7895_v47 = vld [vmem:[#allocation14 + $0x710] ss:$28 sps:$4 sm:$0xff]   ;;  %v7900_v48 = vld [vmem:[#allocation14 + $0x6dc] ss:$28 sps:$4 sm:$0xff]  }
 0x432   :  { %6040 = vmatprep.subr.bf16.mxu1 %v7831_v52  ;;  %v7903_v52 = vld [vmem:[#allocation14 + $0xa5c] ss:$28 sps:$4 sm:$0xff]  }
 0x434   :  { %5998 = vmatpush2.bf16.msra.mxu0 %v7826_v56  ;;  %v7898_v56 = vld [vmem:[#allocation14 + $0x6d8] ss:$28 sps:$4 sm:$0xff]  }
 0x435   :  { %6041 = vmatpush2.bf16.msra.mxu1 %v7829_v39  ;;  %5999 = vmatprep.subr.bf16.mxu0 %v7834_v57  ;;  %v7901_v39 = vld [vmem:[#allocation14 + $0xa58] ss:$28 sps:$4 sm:$0xff]   ;;  %v7906_v57 = vld [vmem:[#allocation14 + $0x6a4] ss:$28 sps:$4 sm:$0xff]  }
 0x436   :  { %6042 = vmatprep.subr.bf16.mxu1 %v7837_v60  ;;  %v7909_v60 = vld [vmem:[#allocation14 + $0xa24] ss:$28 sps:$4 sm:$0xff]  }
 0x438   :  { %6000 = vmatpush2.bf16.msra.mxu0 %v7832_v28  ;;  %v7904_v28 = vld [vmem:[#allocation14 + $0x6a0] ss:$28 sps:$4 sm:$0xff]  }
 0x439   :  { %6043 = vmatpush2.bf16.msra.mxu1 %v7835_v61  ;;  %6001 = vmatprep.subr.bf16.mxu0 %v7840_v62  ;;  %v7907_v61 = vld [vmem:[#allocation14 + $0xa20] ss:$28 sps:$4 sm:$0xff]   ;;  %v7912_v62 = vld [vmem:[#allocation14 + $0x66c] ss:$28 sps:$4 sm:$0xff]  }
 0x43a   :  { %6044 = vmatprep.subr.bf16.mxu1 %v7843_v40  ;;  %v7915_v40 = vld [vmem:[#allocation14 + $0x9ec] ss:$28 sps:$4 sm:$0xff]  }
 0x43c   :  { %6002 = vmatpush2.bf16.msra.mxu0 %v7838_v63  ;;  %v7910_v63 = vld [vmem:[#allocation14 + $0x668] ss:$28 sps:$4 sm:$0xff]  }
 0x43d   :  { %6045 = vmatpush2.bf16.msra.mxu1 %v7841_v0  ;;  %6003 = vmatprep.subr.bf16.mxu0 %v7846_v31  ;;  %v7913_v0 = vld [vmem:[#allocation14 + $0x9e8] ss:$28 sps:$4 sm:$0xff]   ;;  %v7918_v31 = vld [vmem:[#allocation14 + $0x634] ss:$28 sps:$4 sm:$0xff]  }
 0x43e   :  { %6046 = vmatprep.subr.bf16.mxu1 %v7849_v49  ;;  %v7921_v49 = vld [vmem:[#allocation14 + $0x9b4] ss:$28 sps:$4 sm:$0xff]  }
 0x440   :  { %6004 = vmatpush2.bf16.msra.mxu0 %v7844_v50  ;;  %v5706_v50 = vpop.f32.mrf.mxu1 }
 0x441   :  { %6047 = vmatpush2.bf16.msra.mxu1 %v7847_v53  ;;  %6059 = vmatprep.subr.bf16.mxu0 %v7852_v55  ;;  %v7916_v53 = vld [vmem:[#allocation14 + $0x630] ss:$28 sps:$4 sm:$0xff]  }
 0x442   :  { %6102 = vmatprep.subr.bf16.mxu1 %v7855_v1  ;;  %v7919_v55 = vld [vmem:[#allocation14 + $0x9b0] ss:$28 sps:$4 sm:$0xff]   ;;  %v7924_v1 = vld [vmem:[#allocation14 + $0x5fc] ss:$28 sps:$4 sm:$0xff]  }
 0x443   :  { %6006 = vmatmul.mubr.bf16.vlgmr.msra.gmra.mxu0 %v8522_v23 }
 0x444   :  { %6049 = vmatmul.mubr.bf16.vlgmr.msra.gmra.mxu1 %v8486_v51  ;;  %6060 = vmatpush1.bf16.msra.mxu0 %v7850_v2  ;;  %v7927_v2 = vld [vmem:[#allocation14 + $0x97c] ss:$28 sps:$4 sm:$0xff]  }
 0x445   :  { %6091 = vmatprep.mubr.bf16.mxu0 %v8493_v42  ;;  %6103 = vmatpush1.bf16.msra.mxu1 %v7853_v22  ;;  %v5708_v22 = vpop.f32.mrf.mxu1 }
 0x446   :  { %6134 = vmatprep.mubr.bf16.mxu1 %v8507_v8  ;;  %6061 = vmatprep.subr.bf16.mxu0 %v7858_v3  ;;  %v7922_v3 = vld [vmem:[#allocation14 + $0x5f8] ss:$28 sps:$4 sm:$0xff]  }
 0x447   :  { %6104 = vmatprep.subr.bf16.mxu1 %v7861_v4  ;;  %v7925_v4 = vld [vmem:[#allocation14 + $0x978] ss:$28 sps:$4 sm:$0xff]  }
 0x448   :  { %6062 = vmatpush1.bf16.msra.mxu0 %v7856_v5  ;;  %v7930_v5 = vld [vmem:[#allocation14 + $0x5c4] ss:$28 sps:$4 sm:$0xff]  }
 0x449   :  { %6105 = vmatpush1.bf16.msra.mxu1 %v7859_v6  ;;  %6063 = vmatprep.subr.bf16.mxu0 %v7864_v7  ;;  %v7933_v6 = vld [vmem:[#allocation14 + $0x944] ss:$28 sps:$4 sm:$0xff]   ;;  %v5710_v7 = vpop.f32.mrf.mxu1 }
 0x44a   :  { %6106 = vmatprep.subr.bf16.mxu1 %v7867_v9  ;;  %v7928_v9 = vld [vmem:[#allocation14 + $0x5c0] ss:$28 sps:$4 sm:$0xff]  }
 0x44c   :  { %6064 = vmatpush1.bf16.msra.mxu0 %v7862_v11  ;;  %v5749_v11 = vpop.f32.mrf.mxu0 }
 0x44d   :  { %6107 = vmatpush1.bf16.msra.mxu1 %v7865_v12  ;;  %6065 = vmatprep.subr.bf16.mxu0 %v7870_v13  ;;  %v7931_v12 = vld [vmem:[#allocation14 + $0x940] ss:$28 sps:$4 sm:$0xff]   ;;  %v7936_v13 = vld [vmem:[#allocation14 + $0x58c] ss:$28 sps:$4 sm:$0xff]  }
 0x44e   :  { %6108 = vmatprep.subr.bf16.mxu1 %v7873_v14  ;;  %v7939_v14 = vld [vmem:[#allocation14 + $0x90c] ss:$28 sps:$4 sm:$0xff]  }
 0x450   :  { %6066 = vmatpush1.bf16.msra.mxu0 %v7868_v15  ;;  %v8537_v15 = vld [vmem:[#allocation16] sm:$0xff] }
 0x451   :  { %6109 = vmatpush1.bf16.msra.mxu1 %v7871_v16  ;;  %6067 = vmatprep.subr.bf16.mxu0 %v7876_v17  ;;  %v5712_v16 = vpop.f32.mrf.mxu1  ;;  %v7934_v17 = vld [vmem:[#allocation14 + $0x588] ss:$28 sps:$4 sm:$0xff]  }
 0x452   :  { %6110 = vmatprep.subr.bf16.mxu1 %v7879_v18  ;;  %v5751_v18 = vpop.f32.mrf.mxu0 }
 0x454   :  { %6068 = vmatpush1.bf16.msra.mxu0 %v7874_v20  ;;  %v5792_v20 = vpop.f32.mrf.mxu1 }
 0x455   :  { %6111 = vmatpush1.bf16.msra.mxu1 %v7877_v21  ;;  %6069 = vmatprep.subr.bf16.mxu0 %v7882_v24  ;;  %v7937_v21 = vld [vmem:[#allocation14 + $0x908] ss:$28 sps:$4 sm:$0xff]   ;;  %v7942_v24 = vld [vmem:[#allocation14 + $0x554] ss:$28 sps:$4 sm:$0xff]  }
 0x456   :  { %6112 = vmatprep.subr.bf16.mxu1 %v7885_v32  ;;  %v3336_v32 = vrot.slane %v8537_v15, %v8401_v29  ;;  %v7946_v29 = vld [vmem:[#allocation14 + $0xc18] ss:$28 sps:$4 sm:$0xff]  }
 0x458   :  { %6070 = vmatpush1.bf16.msra.mxu0 %v7880_v33  ;;  %v7945_v33 = vld [vmem:[#allocation14 + $0x8d4] ss:$28 sps:$4 sm:$0xff]  }
 0x459   :  { %6113 = vmatpush1.bf16.msra.mxu1 %v7883_v34  ;;  %6071 = vmatprep.subr.bf16.mxu0 %v7888_v36  ;;  %v3340_v34 = vrot.slane %v8537_v15, %v8404_v30  ;;  %v7940_v36 = vld [vmem:[#allocation14 + $0x550] ss:$28 sps:$4 sm:$0xff]   ;;  %v7950_v30 = vld [vmem:[#allocation14 + $0x1a0] ss:$28 sps:$4 sm:$0xff]  }
 0x45a   :  { %6114 = vmatprep.subr.bf16.mxu1 %v7891_v37  ;;  %v5753_v37 = vpop.f32.mrf.mxu0 }
 0x45c   :  { %6072 = vmatpush1.bf16.msra.mxu0 %v7886_v35  ;;  %v5794_v35 = vpop.f32.mrf.mxu1 }
 0x45d   :  { %6115 = vmatpush1.bf16.msra.mxu1 %v7889_v38  ;;  %6073 = vmatprep.subr.bf16.mxu0 %v7894_v43  ;;  %v7943_v38 = vld [vmem:[#allocation14 + $0x8d0] ss:$28 sps:$4 sm:$0xff]   ;;  %v7948_v43 = vld [vmem:[#allocation14 + $0xc1c] ss:$28 sps:$4 sm:$0xff]  }
 0x45e   :  { %6116 = vmatprep.subr.bf16.mxu1 %v7897_v44  ;;  %v5707_v44 = vadd.f32 %v5706_v50, %v3336_v32 }
 0x460   :  { %6074 = vmatpush1.bf16.msra.mxu0 %v7892_v46  ;;  %v7949_v46 = vld [vmem:[#allocation14 + $0x360] ss:$28 sps:$4 sm:$0xff]  }
 0x461   :  { %6117 = vmatpush1.bf16.msra.mxu1 %v7895_v47  ;;  %6075 = vmatprep.subr.bf16.mxu0 %v7900_v48  ;;  %v5709_v47 = vadd.f32 %v5708_v22, %v3340_v34  ;;  %v5750_v48 = vadd.f32 %v5749_v11, %v5707_v44 }
 0x462   :  { %6118 = vmatprep.subr.bf16.mxu1 %v7903_v52  ;;  %v5755_v52 = vpop.f32.mrf.mxu0 }
 0x464   :  { %6076 = vmatpush2.bf16.msra.mxu0 %v7898_v56  ;;  %v5796_v56 = vpop.f32.mrf.mxu1 }
 0x465   :  { %6119 = vmatpush2.bf16.msra.mxu1 %v7901_v39  ;;  %6077 = vmatprep.subr.bf16.mxu0 %v7906_v57  ;;  %v5711_v39 = vadd.f32 %v5710_v7, %v3336_v32  ;;  %v5752_v57 = vadd.f32 %v5751_v18, %v5709_v47  ;;  %v7968_v18 = vld [vmem:[#allocation14 + $0xb3c] ss:$28 sps:$4 sm:$0xff]   ;;  %v7973_v32 = vld [vmem:[#allocation14 + $0xb04] ss:$28 sps:$4 sm:$0xff]  }
 0x466   :  { %6120 = vmatprep.subr.bf16.mxu1 %v7909_v60  ;;  %v5793_v60 = vadd.f32 %v5792_v20, %v5750_v48  ;;  %v5798_v50 = vpop.f32.mrf.mxu1  ;;  %v7969_v20 = vld [vmem:[#allocation14 + $0x280] ss:$28 sps:$4 sm:$0xff]   ;;  %v7980_v48 = vld [vmem:[#allocation14 + $0x50] ss:$28 sps:$4 sm:$0xff]  }
 0x468   :  { %6078 = vmatpush2.bf16.msra.mxu0 %v7904_v28  ;;  %v7953_v28 = vld [vmem:[#allocation14 + $0xbe4] ss:$28 sps:$4 sm:$0xff]  }
 0x469   :  { %6121 = vmatpush2.bf16.msra.mxu1 %v7907_v61  ;;  %6079 = vmatprep.subr.bf16.mxu0 %v7912_v62  ;;  %v5713_v61 = vadd.f32 %v5712_v16, %v3340_v34  ;;  %v7964_v16 = vld [vmem:[#allocation14 + $0x2b8] ss:$28 sps:$4 sm:$0xff]  }
 0x46a   :  { %6122 = vmatprep.subr.bf16.mxu1 %v7915_v40  ;;  %v7954_v40 = vld [vmem:[#allocation14 + $0x328] ss:$28 sps:$4 sm:$0xff]  }
 0x46c   :  { %6080 = vmatpush2.bf16.msra.mxu0 %v7910_v63  ;;  %v5754_v63 = vadd.f32 %v5753_v37, %v5711_v39  ;;  %v7988_v39 = vld [vmem:[#allocation14 + $0xddc] ss:$28 sps:$4 sm:$0xff]  }
 0x46d   :  { %6123 = vmatpush2.bf16.msra.mxu1 %v7913_v0  ;;  %6081 = vmatprep.subr.bf16.mxu0 %v7918_v31  ;;  %v5795_v0 = vadd.f32 %v5794_v35, %v5752_v57  ;;  %v7975_v35 = vld [vmem:[#allocation14 + $0x88] ss:$28 sps:$4 sm:$0xff]   ;;  %v7989_v57 = vld [vmem:[#allocation14 + $0xa60] ss:$28 sps:$4 sm:$0xff]  }
 0x46e   :  { %6124 = vmatprep.subr.bf16.mxu1 %v7921_v49  ;;  %v7951_v49 = vld [vmem:[#allocation14 + $0xbe0] ss:$28 sps:$4 sm:$0xff]   ;;  %v5797_v22 = vadd.f32 %v5796_v56, %v5754_v63  ;;  %v7981_v56 = vld [vmem:[#allocation14 + $0xa90] ss:$28 sps:$4 sm:$0xff]   ;;  %v7995_v63 = vld [vmem:[#allocation14 + $0x868] ss:$28 sps:$4 sm:$0xff]  }
 0x470   :  { %6082 = vmatpush2.bf16.msra.mxu0 %v7916_v53 }
 0x471   :  { %6125 = vmatpush2.bf16.msra.mxu1 %v7919_v55  ;;  %6083 = vmatprep.subr.bf16.mxu0 %v7924_v1  ;;  %v7955_v55 = vld [vmem:[#allocation14 + $0x168] ss:$28 sps:$4 sm:$0xff]  }
 0x472   :  { %6126 = vmatprep.subr.bf16.mxu1 %v7927_v2  ;;  %v7958_v1 = vld [vmem:[#allocation14 + $0xbac] ss:$28 sps:$4 sm:$0xff]   ;;  %v5756_v2 = vadd.f32 %v5755_v52, %v5713_v61  ;;  %v7984_v52 = vld [vmem:[#allocation14 + $0x1d8] ss:$28 sps:$4 sm:$0xff]   ;;  %v7993_v61 = vld [vmem:[#allocation14 + $0xda4] ss:$28 sps:$4 sm:$0xff]  }
 0x474   :  { %6084 = vmatpush2.bf16.msra.mxu0 %v7922_v3 }
 0x475   :  { %6127 = vmatpush2.bf16.msra.mxu1 %v7925_v4  ;;  %6085 = vmatprep.subr.bf16.mxu0 %v7930_v5  ;;  %v7959_v4 = vld [vmem:[#allocation14 + $0x2f0] ss:$28 sps:$4 sm:$0xff]  }
 0x476   :  { %6128 = vmatprep.subr.bf16.mxu1 %v7933_v6  ;;  %v5799_v6 = vadd.f32 %v5798_v50, %v5756_v2  ;;  %v8000_v50 = vld [vmem:[#allocation14 + $0x830] ss:$28 sps:$4 sm:$0xff]   ;;  %v8008_v2 = vld [vmem:[#allocation14 + $0xcfc] ss:$28 sps:$4 sm:$0xff]  }
 0x478   :  { %6086 = vmatpush2.bf16.msra.mxu0 %v7928_v9  ;;  %v7956_v9 = vld [vmem:[#allocation14 + $0xba8] ss:$28 sps:$4 sm:$0xff]  }
 0x479   :  { %6129 = vmatpush2.bf16.msra.mxu1 %v7931_v12  ;;  %6087 = vmatprep.subr.bf16.mxu0 %v7936_v13  ;;  %v7960_v12 = vld [vmem:[#allocation14 + $0x130] ss:$28 sps:$4 sm:$0xff]  }
 0x47a   :  { %6130 = vmatprep.subr.bf16.mxu1 %v7939_v14  ;;  %v7963_v13 = vld [vmem:[#allocation14 + $0xb74] ss:$28 sps:$4 sm:$0xff]  }
 0x47c   :  { %6088 = vmatpush2.bf16.msra.mxu0 %v7934_v17  ;;  %v7965_v17 = vld [vmem:[#allocation14 + $0xf8] ss:$28 sps:$4 sm:$0xff]  }
 0x47d   :  { %6131 = vmatpush2.bf16.msra.mxu1 %v7937_v21  ;;  %6089 = vmatprep.subr.bf16.mxu0 %v7942_v24  ;;  %v7966_v21 = vld [vmem:[#allocation14 + $0xb38] ss:$28 sps:$4 sm:$0xff]   ;;  %v7970_v24 = vld [vmem:[#allocation14 + $0xc0] ss:$28 sps:$4 sm:$0xff]  }
 0x47e   :  { %6132 = vmatprep.subr.bf16.mxu1 %v7945_v33  ;;  %v7974_v33 = vld [vmem:[#allocation14 + $0x248] ss:$28 sps:$4 sm:$0xff]  }
 0x480   :  { %6090 = vmatpush2.bf16.msra.mxu0 %v7940_v36  ;;  %v7971_v36 = vld [vmem:[#allocation14 + $0xb00] ss:$28 sps:$4 sm:$0xff]  }
 0x481   :  { %6133 = vmatpush2.bf16.msra.mxu1 %v7943_v38  ;;  %6145 = vmatprep.subr.bf16.mxu0 %v7948_v43  ;;  %v7978_v38 = vld [vmem:[#allocation14 + $0xacc] ss:$28 sps:$4 sm:$0xff]  }
 0x482   :  { %7186 = vmatprep.subr.bf16.mxu1 %v7949_v46  ;;  %v7979_v43 = vld [vmem:[#allocation14 + $0x210] ss:$28 sps:$4 sm:$0xff]   ;;  %v7976_v46 = vld [vmem:[#allocation14 + $0xac8] ss:$28 sps:$4 sm:$0xff]  }
 0x483   :  { %6092 = vmatmul.mubr.bf16.vlgmr.msra.gmra.mxu0 %v8495_v41  ;;  %v5835_v62 = vpop.f32.mrf.mxu0 }
 0x484   :  { %6135 = vmatmul.mubr.bf16.vlgmr.msra.gmra.mxu1 %v8509_v10  ;;  %v5836_v31 = vadd.f32 %v5835_v62, %v5793_v60  ;;  %6146 = vmatpush1.bf16.msra.mxu0 %v7946_v29  ;;  %v7983_v29 = vld [vmem:[#allocation14 + $0xa94] ss:$28 sps:$4 sm:$0xff]   ;;  %v7994_v62 = vld [vmem:[#allocation14 + $0xa28] ss:$28 sps:$4 sm:$0xff]  }
 0x485   :  { %6177 = vmatprep.mubr.bf16.mxu0 %v8520_v19  ;;  %7187 = vmatpush3.bf16.msra.mxu1 %v7950_v30  ;;  %v5837_v53 = vpop.f32.mrf.mxu0  ;;  %v7985_v30 = vld [vmem:[#allocation14 + $0x18] ss:$28 sps:$4 sm:$0xff]  }
 0x486   :  { %8058 = vtanh.f32 %v5836_v31  ;;  %6220 = vmatprep.mubr.bf16.mxu1 %v8477_v54  ;;  %v5838_v3 = vadd.f32 %v5837_v53, %v5795_v0  ;;  %6147 = vmatprep.subr.bf16.mxu0 %v7953_v28  ;;  %v7961_v54 = vld [vmem:[#allocation14 + $0xb70] ss:$28 sps:$4 sm:$0xff]   ;;  %v7986_v60 = vld [vmem:[#allocation14 + $0xdd8] ss:$28 sps:$4 sm:$0xff]   ;;  %v7990_v28 = vld [vmem:[#allocation14 + $0x8a0] ss:$28 sps:$4 sm:$0xff]  }
 0x487   :  { %7188 = vmatprep.subr.bf16.mxu1 %v7954_v40  ;;  %v5839_v5 = vpop.f32.mrf.mxu0  ;;  %v7991_v40 = vld [vmem:[#allocation14 + $0xda0] ss:$28 sps:$4 sm:$0xff]   ;;  %v7998_v0 = vld [vmem:[#allocation14 + $0xd6c] ss:$28 sps:$4 sm:$0xff]   ;;  %v8003_v53 = vld [vmem:[#allocation14 + $0xd34] ss:$28 sps:$4 sm:$0xff]  }
 0x488   :  { %8060 = vtanh.f32 %v5838_v3  ;;  %v5840_v7 = vadd.f32 %v5839_v5, %v5797_v22  ;;  %6148 = vmatpush1.bf16.msra.mxu0 %v7951_v49  ;;  %v7999_v31 = vld [vmem:[#allocation14 + $0x9f0] ss:$28 sps:$4 sm:$0xff]   ;;  %v7996_v49 = vld [vmem:[#allocation14 + $0xd68] ss:$28 sps:$4 sm:$0xff]   ;;  %v8006_v22 = vld [vmem:[#allocation14 + $0xcf8] ss:$28 sps:$4 sm:$0xff]  }
 0x489   :  { %7189 = vmatpush3.bf16.msra.mxu1 %v7955_v55  ;;  %v5841_v11 = vpop.f32.mrf.mxu0  ;;  %6149 = vmatprep.subr.bf16.mxu0 %v7958_v1  ;;  %v8004_v55 = vld [vmem:[#allocation14 + $0x9b8] ss:$28 sps:$4 sm:$0xff]   ;;  %v8010_v3 = vld [vmem:[#allocation14 + $0x7c0] ss:$28 sps:$4 sm:$0xff]   ;;  %v8014_v5 = vld [vmem:[#allocation14 + $0x948] ss:$28 sps:$4 sm:$0xff]  }
 0x48a   :  { %8062 = vtanh.f32 %v5840_v7  ;;  %v5842_v14 = vadd.f32 %v5841_v11, %v5799_v6  ;;  %7190 = vmatprep.subr.bf16.mxu1 %v7959_v4  ;;  %v8005_v1 = vld [vmem:[#allocation14 + $0x7f8] ss:$28 sps:$4 sm:$0xff]   ;;  %v8013_v4 = vld [vmem:[#allocation14 + $0xcc4] ss:$28 sps:$4 sm:$0xff]   ;;  %v8019_v11 = vld [vmem:[#allocation14 + $0x910] ss:$28 sps:$4 sm:$0xff]  }
 0x48b   :  { %v8011_v6 = vld [vmem:[#allocation14 + $0xcc0] ss:$28 sps:$4 sm:$0xff]   ;;  %v8015_v7 = vld [vmem:[#allocation14 + $0x788] ss:$28 sps:$4 sm:$0xff]  }
 0x48c   :  { %8064 = vtanh.f32 %v5842_v14  ;;  %6150 = vmatpush1.bf16.msra.mxu0 %v7956_v9  ;;  %v8018_v9 = vld [vmem:[#allocation14 + $0xc8c] ss:$28 sps:$4 sm:$0xff]   ;;  %v8023_v14 = vld [vmem:[#allocation14 + $0xc54] ss:$28 sps:$4 sm:$0xff]  }
 0x48d   :  { %7191 = vmatpush3.bf16.msra.mxu1 %v7960_v12  ;;  %6151 = vmatprep.subr.bf16.mxu0 %v7963_v13  ;;  %v8016_v12 = vld [vmem:[#allocation14 + $0xc88] ss:$28 sps:$4 sm:$0xff]   ;;  %v8020_v13 = vld [vmem:[#allocation14 + $0x750] ss:$28 sps:$4 sm:$0xff]  }
 0x48e   :  { %7192 = vmatprep.subr.bf16.mxu1 %v7964_v16  ;;  %v8024_v16 = vld [vmem:[#allocation14 + $0x8d8] ss:$28 sps:$4 sm:$0xff]  }
 0x490   :  { %6152 = vmatpush1.bf16.msra.mxu0 %v7961_v54  ;;  %v8021_v54 = vld [vmem:[#allocation14 + $0xc50] ss:$28 sps:$4 sm:$0xff]  }
 0x491   :  { %7193 = vmatpush3.bf16.msra.mxu1 %v7965_v17  ;;  %6153 = vmatprep.subr.bf16.mxu0 %v7968_v18  ;;  %v8025_v17 = vld [vmem:[#allocation14 + $0x718] ss:$28 sps:$4 sm:$0xff]   ;;  %v8026_v18 = vld [vmem:[#allocation14 + $0x6e0] ss:$28 sps:$4 sm:$0xff]  }
 0x492   :  { %7194 = vmatprep.subr.bf16.mxu1 %v7969_v20  ;;  %v8027_v20 = vld [vmem:[#allocation14 + $0x520] ss:$28 sps:$4 sm:$0xff]  }
 0x493   :  { %v8059_v34 = vpop.eup %8058 }
 0x494   :  { %6366 = vst [vmem:[#allocation17] sm:$0xff] %v8059_v34  ;;  %6154 = vmatpush1.bf16.msra.mxu0 %v7966_v21  ;;  %v8028_v21 = vld [vmem:[#allocation14 + $0x6a8] ss:$28 sps:$4 sm:$0xff]   ;;  %v8032_v34 = vld [vmem:[#allocation14 + $0x638] ss:$28 sps:$4 sm:$0xff]  }
 0x495   :  { %v8061_v37 = vpop.eup %8060  ;;  %7195 = vmatpush3.bf16.msra.mxu1 %v7970_v24  ;;  %6155 = vmatprep.subr.bf16.mxu0 %v7973_v32  ;;  %v8029_v24 = vld [vmem:[#allocation14 + $0x4e8] ss:$28 sps:$4 sm:$0xff]   ;;  %v8030_v32 = vld [vmem:[#allocation14 + $0x670] ss:$28 sps:$4 sm:$0xff]  }
 0x496   :  { %6367 = vst [vmem:[#allocation17 + $0x8] sm:$0xff] %v8061_v37  ;;  %7196 = vmatprep.subr.bf16.mxu1 %v7974_v33  ;;  %v8031_v33 = vld [vmem:[#allocation14 + $0x4b0] ss:$28 sps:$4 sm:$0xff]   ;;  %v8034_v37 = vld [vmem:[#allocation14 + $0x600] ss:$28 sps:$4 sm:$0xff]  }
 0x497   :  { %v8063_v44 = vpop.eup %8062 }
 0x498   :  { %6373 = vst [vmem:[#allocation17 + $0x38] sm:$0xff] %v8063_v44  ;;  %6156 = vmatpush1.bf16.msra.mxu0 %v7971_v36  ;;  %v8033_v36 = vld [vmem:[#allocation14 + $0x478] ss:$28 sps:$4 sm:$0xff]  }
 0x499   :  { %v8065_v47 = vpop.eup %8064  ;;  %7197 = vmatpush3.bf16.msra.mxu1 %v7975_v35  ;;  %6157 = vmatprep.subr.bf16.mxu0 %v7978_v38  ;;  %v8035_v35 = vld [vmem:[#allocation14 + $0x440] ss:$28 sps:$4 sm:$0xff]   ;;  %v8036_v38 = vld [vmem:[#allocation14 + $0x5c8] ss:$28 sps:$4 sm:$0xff]   ;;  %v8040_v44 = vld [vmem:[#allocation14 + $0x558] ss:$28 sps:$4 sm:$0xff]  }
 0x49a   :  { %6374 = vst [vmem:[#allocation17 + $0x40] sm:$0xff] %v8065_v47  ;;  %7198 = vmatprep.subr.bf16.mxu1 %v7979_v43  ;;  %v8038_v43 = vld [vmem:[#allocation14 + $0x590] ss:$28 sps:$4 sm:$0xff]   ;;  %v8042_v47 = vld [vmem:[#allocation14 + $0xde0] ss:$28 sps:$4 sm:$0xff]  }
 0x49c   :  { %6158 = vmatpush1.bf16.msra.mxu0 %v7976_v46  ;;  %v8041_v46 = vld [vmem:[#allocation14 + $0x398] ss:$28 sps:$4 sm:$0xff]  }
 0x49d   :  { %7199 = vmatpush3.bf16.msra.mxu1 %v7980_v48  ;;  %6159 = vmatprep.subr.bf16.mxu0 %v7983_v29  ;;  %v8043_v48 = vld [vmem:[#allocation14 + $0xc20] ss:$28 sps:$4 sm:$0xff]   ;;  %v8044_v29 = vld [vmem:[#allocation14 + $0xda8] ss:$28 sps:$4 sm:$0xff]  }
 0x49e   :  { %7200 = vmatprep.subr.bf16.mxu1 %v7984_v52  ;;  %v8045_v52 = vld [vmem:[#allocation14 + $0xbe8] ss:$28 sps:$4 sm:$0xff]  }
 0x4a0   :  { %6160 = vmatpush1.bf16.msra.mxu0 %v7981_v56  ;;  %v8046_v56 = vld [vmem:[#allocation14 + $0xd70] ss:$28 sps:$4 sm:$0xff]  }
 0x4a1   :  { %7201 = vmatpush3.bf16.msra.mxu1 %v7985_v30  ;;  %6161 = vmatprep.subr.bf16.mxu0 %v7988_v39  ;;  %v8047_v30 = vld [vmem:[#allocation14 + $0xbb0] ss:$28 sps:$4 sm:$0xff]   ;;  %v8048_v39 = vld [vmem:[#allocation14 + $0xd38] ss:$28 sps:$4 sm:$0xff]  }
 0x4a2   :  { %7230 = vmatprep.subr.bf16.mxu1 %v7989_v57  ;;  %v8049_v57 = vld [vmem:[#allocation14 + $0xb78] ss:$28 sps:$4 sm:$0xff]  }
 0x4a4   :  { %6221 = vmatmul.mubr.bf16.vlgmr.msra.gmra.mxu1 %v8486_v51  ;;  %6162 = vmatpush2.bf16.msra.mxu0 %v7986_v60  ;;  %v8001_v51 = vld [vmem:[#allocation14 + $0xd30] ss:$28 sps:$4 sm:$0xff]   ;;  %v5878_v60 = vpop.f32.mrf.mxu1 }
 0x4a5   :  { %7231 = vmatpush3.bf16.msra.mxu1 %v7990_v28  ;;  %6302 = vmatprep.mubr.bf16.mxu1 %v8507_v8  ;;  %v8009_v8 = vld [vmem:[#allocation14 + $0x980] ss:$28 sps:$4 sm:$0xff]  }
 0x4a6   :  { %6163 = vmatprep.subr.bf16.mxu0 %v7993_v61  ;;  %7232 = vmatprep.subr.bf16.mxu1 %v7994_v62  ;;  %v8050_v28 = vld [vmem:[#allocation14 + $0xd00] ss:$28 sps:$4 sm:$0xff]   ;;  %v5880_v62 = vpop.f32.mrf.mxu1 }
 0x4a7   :  { %v8051_v61 = vld [vmem:[#allocation14 + $0xb40] ss:$28 sps:$4 sm:$0xff]  }
 0x4a8   :  { %6164 = vmatpush2.bf16.msra.mxu0 %v7991_v40  ;;  %v8053_v40 = vld [vmem:[#allocation14 + $0xb08] ss:$28 sps:$4 sm:$0xff]  }
 0x4a9   :  { %7233 = vmatpush3.bf16.msra.mxu1 %v7995_v63  ;;  %6165 = vmatprep.subr.bf16.mxu0 %v7998_v0  ;;  %v8054_v0 = vld [vmem:[#allocation14 + $0xc90] ss:$28 sps:$4 sm:$0xff]  }
 0x4aa   :  { %7234 = vmatprep.subr.bf16.mxu1 %v7999_v31  ;;  %v3344_v31 = vrot.slane %v8537_v15, %v8428_v59 }
 0x4ac   :  { %6166 = vmatpush2.bf16.msra.mxu0 %v7996_v49  ;;  %v8055_v49 = vld [vmem:[#allocation14 + $0xad0] ss:$28 sps:$4 sm:$0xff]  }
 0x4ad   :  { %7235 = vmatpush3.bf16.msra.mxu1 %v8000_v50  ;;  %6167 = vmatprep.subr.bf16.mxu0 %v8003_v53 }
 0x4ae   :  { %7236 = vmatprep.subr.bf16.mxu1 %v8004_v55  ;;  %v8056_v55 = vld [vmem:[#allocation14 + $0xc58] ss:$28 sps:$4 sm:$0xff]  }
 0x4b0   :  { %6168 = vmatpush2.bf16.msra.mxu0 %v8001_v51  ;;  %v3348_v51 = vrot.slane %v8537_v15, %v8425_v58 }
 0x4b1   :  { %7237 = vmatpush3.bf16.msra.mxu1 %v8005_v1  ;;  %6169 = vmatprep.subr.bf16.mxu0 %v8008_v2  ;;  %v5879_v2 = vadd.f32 %v5878_v60, %v3344_v31 }
 0x4b2   :  { %7238 = vmatprep.subr.bf16.mxu1 %v8009_v8  ;;  %v8057_v8 = vld [vmem:[#allocation14 + $0xa98] ss:$28 sps:$4 sm:$0xff]  }
 0x4b4   :  { %6170 = vmatpush2.bf16.msra.mxu0 %v8006_v22 }
 0x4b5   :  { %7239 = vmatpush3.bf16.msra.mxu1 %v8010_v3  ;;  %6171 = vmatprep.subr.bf16.mxu0 %v8013_v4  ;;  %v5881_v3 = vadd.f32 %v5880_v62, %v3348_v51 }
 0x4b6   :  { %7240 = vmatprep.subr.bf16.mxu1 %v8014_v5 }
 0x4b8   :  { %6172 = vmatpush2.bf16.msra.mxu0 %v8011_v6 }
 0x4b9   :  { %7241 = vmatpush3.bf16.msra.mxu1 %v8015_v7  ;;  %6173 = vmatprep.subr.bf16.mxu0 %v8018_v9 }
 0x4ba   :  { %7242 = vmatprep.subr.bf16.mxu1 %v8019_v11 }
 0x4bc   :  { %6174 = vmatpush2.bf16.msra.mxu0 %v8016_v12 }
 0x4bd   :  { %7243 = vmatpush3.bf16.msra.mxu1 %v8020_v13  ;;  %6175 = vmatprep.subr.bf16.mxu0 %v8023_v14 }
 0x4be   :  { %7244 = vmatprep.subr.bf16.mxu1 %v8024_v16 }
 0x4c0   :  { %6176 = vmatpush2.bf16.msra.mxu0 %v8021_v54 }
 0x4c1   :  { %7245 = vmatpush3.bf16.msra.mxu1 %v8025_v17  ;;  %7208 = vmatprep.subr.bf16.mxu0 %v8026_v18 }
 0x4c3   :  { %6178 = vmatmul.mubr.bf16.vlgmr.msra.gmra.mxu0 %v8522_v23  ;;  %v5921_v63 = vpop.f32.mrf.mxu0 }
 0x4c4   :  { %6303 = vmatmul.mubr.bf16.vlgmr.msra.gmra.mxu1 %v8509_v10  ;;  %7209 = vmatpush3.bf16.msra.mxu0 %v8027_v20  ;;  %v8037_v10 = vld [vmem:[#allocation14 + $0x408] ss:$28 sps:$4 sm:$0xff]   ;;  %v5922_v4 = vadd.f32 %v5921_v63, %v5879_v2 }
 0x4c5   :  { %6261 = vmatprep.mubr.bf16.mxu0 %v8493_v42  ;;  %7210 = vmatprep.subr.bf16.mxu0 %v8028_v21  ;;  %v8039_v42 = vld [vmem:[#allocation14 + $0x3d0] ss:$28 sps:$4 sm:$0xff]   ;;  %v5923_v53 = vpop.f32.mrf.mxu0 }
 0x4c6   :  { %v5924_v59 = vadd.f32 %v5923_v53, %v5881_v3 }
 0x4c7   :  { %v5925_v22 = vpop.f32.mrf.mxu0 }
 0x4c8   :  { %7211 = vmatpush3.bf16.msra.mxu0 %v8029_v24 }
 0x4c9   :  { %7212 = vmatprep.subr.bf16.mxu0 %v8030_v32  ;;  %v5927_v7 = vpop.f32.mrf.mxu0 }
 0x4cc   :  { %7213 = vmatpush3.bf16.msra.mxu0 %v8031_v33 }
 0x4cd   :  { %7214 = vmatprep.subr.bf16.mxu0 %v8032_v34 }
 0x4d0   :  { %7215 = vmatpush3.bf16.msra.mxu0 %v8033_v36 }
 0x4d1   :  { %7216 = vmatprep.subr.bf16.mxu0 %v8034_v37 }
 0x4d4   :  { %7217 = vmatpush3.bf16.msra.mxu0 %v8035_v35 }
 0x4d5   :  { %7218 = vmatprep.subr.bf16.mxu0 %v8036_v38 }
 0x4d8   :  { %7219 = vmatpush3.bf16.msra.mxu0 %v8037_v10 }
 0x4d9   :  { %7220 = vmatprep.subr.bf16.mxu0 %v8038_v43 }
 0x4dc   :  { %7221 = vmatpush3.bf16.msra.mxu0 %v8039_v42 }
 0x4dd   :  { %7222 = vmatprep.subr.bf16.mxu0 %v8040_v44 }
 0x4e0   :  { %7223 = vmatpush3.bf16.msra.mxu0 %v8041_v46  ;;  %v3352_v46 = vrot.slane %v8537_v15, %v1117_v25 }
 0x4e1   :  { %7252 = vmatprep.subr.bf16.mxu0 %v8042_v47 }
 0x4e3   :  { %6262 = vmatmul.mubr.bf16.vlgmr.msra.gmra.mxu0 %v8495_v41  ;;  %v8052_v41 = vld [vmem:[#allocation14 + $0xcc8] ss:$28 sps:$4 sm:$0xff]  }
 0x4e4   :  { %7253 = vmatpush3.bf16.msra.mxu0 %v8043_v48  ;;  %6343 = vmatprep.mubr.bf16.mxu0 %v8520_v19  ;;  %v5882_v19 = vpop.f32.mrf.mxu1 }
 0x4e5   :  { %7254 = vmatprep.subr.bf16.mxu0 %v8044_v29  ;;  %v5883_v6 = vadd.f32 %v5882_v19, %v3344_v31  ;;  %v3356_v29 = vrot.slane %v8537_v15, %v1121_v26 }
 0x4e6   :  { %v5884_v50 = vpop.f32.mrf.mxu1 }
 0x4e7   :  { %v5885_v9 = vadd.f32 %v5884_v50, %v3348_v51  ;;  %v5926_v12 = vadd.f32 %v5925_v22, %v5883_v6 }
 0x4e8   :  { %7255 = vmatpush3.bf16.msra.mxu0 %v8045_v52  ;;  %v5964_v1 = vpop.f32.mrf.mxu1 }
 0x4e9   :  { %7256 = vmatprep.subr.bf16.mxu0 %v8046_v56  ;;  %v5965_v11 = vadd.f32 %v5964_v1, %v5922_v4  ;;  %v5928_v16 = vadd.f32 %v5927_v7, %v5885_v9 }
 0x4ea   :  { %v5966_v5 = vpop.f32.mrf.mxu1 }
 0x4eb   :  { %v5967_v58 = vadd.f32 %v5966_v5, %v5924_v59 }
 0x4ec   :  { %7257 = vmatpush3.bf16.msra.mxu0 %v8047_v30  ;;  %v5968_v13 = vpop.f32.mrf.mxu1 }
 0x4ed   :  { %7258 = vmatprep.subr.bf16.mxu0 %v8048_v39  ;;  %v5969_v18 = vadd.f32 %v5968_v13, %v5926_v12 }
 0x4ee   :  { %v5970_v21 = vpop.f32.mrf.mxu1 }
 0x4ef   :  { %v5971_v32 = vadd.f32 %v5970_v21, %v5928_v16  ;;  %v3360_v16 = vrot.slane %v8537_v15, %v1125_v45 }
 0x4f0   :  { %7259 = vmatpush3.bf16.msra.mxu0 %v8049_v57 }
 0x4f1   :  { %7260 = vmatprep.subr.bf16.mxu0 %v8050_v28 }
 0x4f4   :  { %7261 = vmatpush3.bf16.msra.mxu0 %v8051_v61 }
 0x4f5   :  { %7262 = vmatprep.subr.bf16.mxu0 %v8052_v41 }
 0x4f8   :  { %7263 = vmatpush3.bf16.msra.mxu0 %v8053_v40 }
 0x4f9   :  { %7264 = vmatprep.subr.bf16.mxu0 %v8054_v0 }
 0x4fc   :  { %7265 = vmatpush3.bf16.msra.mxu0 %v8055_v49 }
 0x4fd   :  { %7266 = vmatprep.subr.bf16.mxu0 %v8056_v55 }
 0x500   :  { %7267 = vmatpush3.bf16.msra.mxu0 %v8057_v8 }
 0x503   :  { %v6007_v14 = vpop.f32.mrf.mxu0  ;;  %6344 = vmatmul.mubr.bf16.vlgmr.msra.gmra.mxu0 %v8522_v23 }
 0x504   :  { %v6008_v54 = vadd.f32 %v6007_v14, %v5965_v11  ;;  %v6050_v10 = vpop.f32.mrf.mxu1 }
 0x505   :  { %v6009_v17 = vpop.f32.mrf.mxu0  ;;  %v6051_v56 = vadd.f32 %v6050_v10, %v3352_v46 }
 0x506   :  { %8066 = vtanh.f32 %v6008_v54  ;;  %v6010_v20 = vadd.f32 %v6009_v17, %v5967_v58  ;;  %v6052_v43 = vpop.f32.mrf.mxu1 }
 0x507   :  { %v6011_v24 = vpop.f32.mrf.mxu0  ;;  %v6053_v39 = vadd.f32 %v6052_v43, %v3356_v29 }
 0x508   :  { %8068 = vtanh.f32 %v6010_v20  ;;  %v6012_v33 = vadd.f32 %v6011_v24, %v5969_v18  ;;  %v6054_v42 = vpop.f32.mrf.mxu1 }
 0x509   :  { %v6013_v34 = vpop.f32.mrf.mxu0  ;;  %v6055_v28 = vadd.f32 %v6054_v42, %v3352_v46 }
 0x50a   :  { %8070 = vtanh.f32 %v6012_v33  ;;  %v6014_v36 = vadd.f32 %v6013_v34, %v5971_v32  ;;  %v6056_v47 = vpop.f32.mrf.mxu1 }
 0x50b   :  { %v6057_v41 = vadd.f32 %v6056_v47, %v3356_v29 }
 0x50c   :  { %8072 = vtanh.f32 %v6014_v36 }
 0x513   :  { %v8067_v37 = vpop.eup %8066 }
 0x514   :  { %6368 = vst [vmem:[#allocation17 + $0x10] sm:$0xff] %v8067_v37 }
 0x515   :  { %v8069_v35 = vpop.eup %8068 }
 0x516   :  { %6369 = vst [vmem:[#allocation17 + $0x18] sm:$0xff] %v8069_v35 }
 0x517   :  { %v8071_v23 = vpop.eup %8070 }
 0x518   :  { %6375 = vst [vmem:[#allocation17 + $0x48] sm:$0xff] %v8071_v23 }
 0x519   :  { %v8073_v38 = vpop.eup %8072 }
 0x51a   :  { %6376 = vst [vmem:[#allocation17 + $0x50] sm:$0xff] %v8073_v38 }
 0x543   :  { %v6093_v44 = vpop.f32.mrf.mxu0 }
 0x544   :  { %v6136_v52 = vpop.f32.mrf.mxu1  ;;  %v6094_v57 = vadd.f32 %v6093_v44, %v6051_v56 }
 0x545   :  { %v6095_v48 = vpop.f32.mrf.mxu0 }
 0x546   :  { %v6138_v60 = vpop.f32.mrf.mxu1  ;;  %v6096_v61 = vadd.f32 %v6095_v48, %v6053_v39  ;;  %v6137_v40 = vadd.f32 %v6136_v52, %v6094_v57 }
 0x547   :  { %v6097_v30 = vpop.f32.mrf.mxu0 }
 0x548   :  { %v6098_v19 = vadd.f32 %v6097_v30, %v6055_v28  ;;  %v6140_v63 = vpop.f32.mrf.mxu1  ;;  %v6139_v0 = vadd.f32 %v6138_v60, %v6096_v61 }
 0x549   :  { %v6099_v62 = vpop.f32.mrf.mxu0 }
 0x54a   :  { %v6100_v31 = vadd.f32 %v6099_v62, %v6057_v41  ;;  %v6141_v53 = vadd.f32 %v6140_v63, %v6098_v19  ;;  %v6142_v55 = vpop.f32.mrf.mxu1 }
 0x54c   :  { %v6143_v1 = vadd.f32 %v6142_v55, %v6100_v31 }
 0x564   :  { %v7202_v59 = vpop.f32.mrf.mxu1 }
 0x566   :  { %v7203_v7 = vpop.f32.mrf.mxu1 }
 0x567   :  { %v7204_v54 = vadd.f32 %v7203_v7, %v7202_v59 }
 0x568   :  { %v7205_v9 = vpop.f32.mrf.mxu1 }
 0x569   :  { %v6223_v21 = vadd.f32 %v7204_v54, %v3360_v16 }
 0x56a   :  { %v7206_v12 = vpop.f32.mrf.mxu1 }
 0x56b   :  { %v7207_v24 = vadd.f32 %v7206_v12, %v7205_v9 }
 0x56d   :  { %v6226_v37 = vadd.f32 %v7207_v24, %v3360_v16 }
 0x583   :  { %v6179_v25 = vpop.f32.mrf.mxu0 }
 0x584   :  { %v6180_v49 = vadd.f32 %v6179_v25, %v6137_v40  ;;  %v7246_v14 = vpop.f32.mrf.mxu1 }
 0x585   :  { %v6181_v50 = vpop.f32.mrf.mxu0 }
 0x586   :  { %8074 = vtanh.f32 %v6180_v49  ;;  %v6182_v26 = vadd.f32 %v6181_v50, %v6139_v0  ;;  %v7247_v17 = vpop.f32.mrf.mxu1 }
 0x587   :  { %v6183_v51 = vpop.f32.mrf.mxu0  ;;  %v7248_v35 = vadd.f32 %v7247_v17, %v7246_v14 }
 0x588   :  { %8076 = vtanh.f32 %v6182_v26  ;;  %v6184_v2 = vadd.f32 %v6183_v51, %v6141_v53  ;;  %v7249_v32 = vpop.f32.mrf.mxu1 }
 0x589   :  { %v6185_v8 = vpop.f32.mrf.mxu0 }
 0x58a   :  { %8078 = vtanh.f32 %v6184_v2  ;;  %v6186_v22 = vadd.f32 %v6185_v8, %v6143_v1  ;;  %v7250_v23 = vpop.f32.mrf.mxu1 }
 0x58b   :  { %v7251_v44 = vadd.f32 %v7250_v23, %v7249_v32 }
 0x58c   :  { %8080 = vtanh.f32 %v6186_v22 }
 0x593   :  { %v8075_v3 = vpop.eup %8074 }
 0x594   :  { %6370 = vst [vmem:[#allocation17 + $0x20] sm:$0xff] %v8075_v3 }
 0x595   :  { %v8077_v4 = vpop.eup %8076 }
 0x596   :  { %6371 = vst [vmem:[#allocation17 + $0x28] sm:$0xff] %v8077_v4 }
 0x597   :  { %v8079_v5 = vpop.eup %8078 }
 0x598   :  { %6377 = vst [vmem:[#allocation17 + $0x58] sm:$0xff] %v8079_v5 }
 0x599   :  { %v8081_v6 = vpop.eup %8080 }
 0x59a   :  { %6378 = vst [vmem:[#allocation17 + $0x60] sm:$0xff] %v8081_v6 }
 0x5a3   :  { %v7224_v11 = vpop.f32.mrf.mxu0 }
 0x5a5   :  { %v7225_v13 = vpop.f32.mrf.mxu0 }
 0x5a6   :  { %v7226_v18 = vadd.f32 %v7225_v13, %v7224_v11 }
 0x5a7   :  { %v7227_v58 = vpop.f32.mrf.mxu0 }
 0x5a8   :  { %v6264_v33 = vadd.f32 %v7226_v18, %v6223_v21 }
 0x5a9   :  { %v7228_v20 = vpop.f32.mrf.mxu0 }
 0x5aa   :  { %v7229_v34 = vadd.f32 %v7228_v20, %v7227_v58  ;;  %v6305_v43 = vadd.f32 %v7248_v35, %v6264_v33 }
 0x5ac   :  { %v6267_v10 = vadd.f32 %v7229_v34, %v6226_v37 }
 0x5ae   :  { %v6308_v46 = vadd.f32 %v7251_v44, %v6267_v10 }
 0x5c3   :  { %v7268_v36 = vpop.f32.mrf.mxu0 }
 0x5c5   :  { %v7269_v38 = vpop.f32.mrf.mxu0 }
 0x5c6   :  { %v7270_v42 = vadd.f32 %v7269_v38, %v7268_v36 }
 0x5c7   :  { %v7271_v27 = vpop.f32.mrf.mxu0 }
 0x5c8   :  { %v6346_v45 = vadd.f32 %v7270_v42, %v6305_v43 }
 0x5c9   :  { %v7272_v15 = vpop.f32.mrf.mxu0 }
 0x5ca   :  { %8082 = vtanh.f32 %v6346_v45  ;;  %v7273_v47 = vadd.f32 %v7272_v15, %v7271_v27 }
 0x5cc   :  { %v6349_v48 = vadd.f32 %v7273_v47, %v6308_v46 }
 0x5ce   :  { %8084 = vtanh.f32 %v6349_v48 }
 0x5d7   :  { %v8083_v29 = vpop.eup %8082 }
 0x5d8   :  { %6372 = vst [vmem:[#allocation17 + $0x30] sm:$0xff] %v8083_v29 }
 0x5db   :  { %v8085_v52 = vpop.eup %8084 }
 0x5dc   :  { %6379 = vst [vmem:[#allocation17 + $0x68] sm:$0xff] %v8085_v52 }
 0x5dd   :  { %8277 = shalt.err (!%p8274_p7)
}
 0x5de   :  { %s8319_s15 = smov 896   ;;  %s8320_s5 = smov 56  }
 0x5df   :  { %6391 = dma.vmem_to_hbm [thread:$0]  %s6386_s8, 1792, %s8580_s9, [#allocation4], %s8319_s15, %s8319_s15, %s8320_s5  }
 0x5e0   :  { %8296 = dma.done.wait [#allocation4], 1792  }
 0x5e1   :  { %8297 = vsyncadd [#allocation4], 4294965504 }
 0x5e2   :  { %6395 = vsyncpa [#allocation3], 1 }
 0x5e3   :  { %6396 = vsyncpa [#allocation6], 1 }
 0x5e4   :  { %6397 = vsyncpa [#allocation9], 1 }
 0x5e5   :  { %6398 = vsyncpa [#allocation12], 1 }
 0x5e6   :  { %6399 = vsyncpa [#allocation15], 1 }
 0x5e7   :  { %6400 = vsyncpa [#allocation4], 1 }

</bundles_post_ra>
